<compile_context>
chip_gen: v6e
topology: v6e:2x2x1
jax: 0.10.0
libtpu: 0.0.40
codegen_flags: <defaults>
</compile_context>

<pallas_src>
import jax
import jax.numpy as jnp
from jax.experimental import pallas as pl
from jax.experimental.pallas import tpu as pltpu


def _make_kernel(H, W, C):
    Wp = W + 2                       # padded width (stride of the flat row grid)
    HWP = H * Wp                     # rows of the flat output grid (2 junk cols / row)
    TOT = (H + 3) * Wp               # rows of the padded input slab
    pad_lo = Wp + 1                  # halo rows above the interior
    pad_hi = TOT - (pad_lo + HWP)    # halo rows below the interior (= 2*Wp - 1)
    offs = tuple(kh * Wp + kw for kh in range(3) for kw in range(3))

    def kernel(x_ref, w1_ref, s1_ref, b1_ref, w2_ref, s2_ref, b2_ref,
               mask_ref, o_ref, p2_ref):
        # ---- conv1: 9 taps, each one big contiguous lane-dense 2-D matmul ----
        # bf16 operands, f32 accumulation (MXU native precision).
        acc = jnp.dot(x_ref[0, offs[0]:offs[0] + HWP, :].astype(jnp.bfloat16),
                      w1_ref[0], preferred_element_type=jnp.float32)
        for t in range(1, 9):
            st = offs[t]
            acc = acc + jnp.dot(x_ref[0, st:st + HWP, :].astype(jnp.bfloat16),
                                w1_ref[t], preferred_element_type=jnp.float32)

        # BN1 (folded (1,C) scale/bias) + ReLU; zero the 2 junk columns of each flat
        # row so they double as conv2's zero padding along W.
        y1 = jnp.maximum(acc * s1_ref[...] + b1_ref[...], 0.0) * mask_ref[...]

        # ---- build conv2's zero-padded input slab in VMEM scratch ----
        # Only the top/bottom halo rows need zeroing (interior is fully overwritten).
        # Done every grid step: scratch is per-core and uninitialized, and the batch
        # axis may be megacore-split.
        p2_ref[0:pad_lo, :] = jnp.zeros((pad_lo, C), jnp.float32)
        p2_ref[pad_lo + HWP:TOT, :] = jnp.zeros((pad_hi, C), jnp.float32)
        p2_ref[pad_lo:pad_lo + HWP, :] = y1

        # ---- conv2: same 9-tap flat-slice matmul structure ----
        # Center tap (kh=kw=1) is exactly y1 -> consume it from vregs directly.
        acc2 = jnp.dot(y1.astype(jnp.bfloat16), w2_ref[4],
                       preferred_element_type=jnp.float32)
        for t in (0, 1, 2, 3, 5, 6, 7, 8):
            st = offs[t]
            acc2 = acc2 + jnp.dot(p2_ref[st:st + HWP, :].astype(jnp.bfloat16),
                                  w2_ref[t], preferred_element_type=jnp.float32)
        y2 = acc2 * s2_ref[...] + b2_ref[...]                     # BN2

        # ---- identity shortcut (stride=1, no downsample) + final ReLU ----
        residual = x_ref[0, pad_lo:pad_lo + HWP, :].astype(jnp.float32)
        o_ref[0] = jnp.maximum(y2 + residual, 0.0).astype(o_ref.dtype)

    return kernel


def basic_block(x_nchw, w1, g1, be1, m1, v1, w2, g2, be2, m2, v2, *, eps=1e-5):
    """BasicBlock forward. x_nchw: (N, C, H, W). Conv weights in PyTorch OIHW layout
    (C, C, 3, 3); BN params are (gamma, beta, running_mean, running_var), each (C,)."""
    N, C, H, W = x_nchw.shape
    cout, cin, kh, kw = w1.shape
    assert (cin, kh, kw) == (C, 3, 3) and cout == C, \
        "identity-shortcut BasicBlock requires inplanes == planes and 3x3 kernels"

    Wp = W + 2
    Hp = H + 3                      # pad 1 left/right/top, 2 bottom (flat-slice slack)
    TOT = Hp * Wp
    HWP = H * Wp

    # NCHW -> NHWC, zero-pad spatially, flatten (H, W) into a lane-dense (rows, C) slab.
    x_nhwc = jnp.transpose(x_nchw, (0, 2, 3, 1))
    x_flat = jnp.pad(x_nhwc, ((0, 0), (1, 2), (1, 1), (0, 0))).reshape(N, TOT, C)

    # Conv weights (Cout, Cin, 3, 3) -> (9, Cin, Cout) bf16 taps, tap index = kh*3 + kw.
    def taps(w):
        return jnp.transpose(w, (2, 3, 1, 0)).reshape(9, C, C).astype(jnp.bfloat16)

    # Fold inference-mode BatchNorm into per-channel scale/bias (lane-dense (1, C) rows,
    # kept in f32 so BN is applied at full precision on the f32 accumulators).
    def fold_bn(g, b, m, v):
        s = (g * jax.lax.rsqrt(v + eps)).astype(jnp.float32)
        return s.reshape(1, C), (b - m * s).astype(jnp.float32).reshape(1, C)

    s1, bb1 = fold_bn(g1, be1, m1, v1)
    s2, bb2 = fold_bn(g2, be2, m2, v2)

    # 1.0 on real output columns, 0.0 on the 2 junk columns of each flat row.
    mask = (jnp.arange(HWP, dtype=jnp.int32) % Wp < W).astype(jnp.float32).reshape(HWP, 1)

    flops = 2 * 2 * 9 * N * HWP * C * C
    bytes_accessed = (4 * N * TOT * C          # input slab (f32)
                      + 4 * N * HWP * C        # output slab (f32)
                      + 2 * 2 * 9 * C * C      # conv taps (bf16)
                      + 4 * 4 * C + 4 * HWP)   # bn scale/bias + mask

    out_flat = pl.pallas_call(
        _make_kernel(H, W, C),
        out_shape=jax.ShapeDtypeStruct((N, HWP, C), x_nchw.dtype),
        grid_spec=pltpu.PrefetchScalarGridSpec(
            num_scalar_prefetch=0,
            grid=(N,),
            in_specs=[
                pl.BlockSpec((1, TOT, C), lambda n: (n, 0, 0)),   # padded input slab
                pl.BlockSpec((9, C, C), lambda n: (0, 0, 0)),     # conv1 taps (bf16)
                pl.BlockSpec((1, C), lambda n: (0, 0)),           # bn1 scale
                pl.BlockSpec((1, C), lambda n: (0, 0)),           # bn1 bias
                pl.BlockSpec((9, C, C), lambda n: (0, 0, 0)),     # conv2 taps (bf16)
                pl.BlockSpec((1, C), lambda n: (0, 0)),           # bn2 scale
                pl.BlockSpec((1, C), lambda n: (0, 0)),           # bn2 bias
                pl.BlockSpec((HWP, 1), lambda n: (0, 0)),         # junk-column mask
            ],
            out_specs=pl.BlockSpec((1, HWP, C), lambda n: (n, 0, 0)),
            scratch_shapes=[pltpu.VMEM((TOT, C), jnp.float32)],   # padded conv2 input
        ),
        compiler_params=pltpu.CompilerParams(
            dimension_semantics=("parallel",),
            vmem_limit_bytes=32 * 1024 * 1024),
        cost_estimate=pl.CostEstimate(
            flops=flops, transcendentals=0, bytes_accessed=bytes_accessed),
    )(x_flat, taps(w1), s1, bb1, taps(w2), s2, bb2, mask)

    out = out_flat.reshape(N, H, Wp, C)[:, :, :W, :]          # drop junk columns
    return jnp.transpose(out, (0, 3, 1, 2))                   # back to NCHW


def basic_block_ref(x, w1, g1, be1, m1, v1, w2, g2, be2, m2, v2, eps=1e-5):
    """Pure-JAX/XLA reference matching the PyTorch BasicBlock forward (eval-mode BN),
    computed at full f32 precision."""
    def conv3x3(a, w):
        return jax.lax.conv_general_dilated(
            a, w, window_strides=(1, 1), padding=((1, 1), (1, 1)),
            dimension_numbers=("NCHW", "OIHW", "NCHW"),
            precision=jax.lax.Precision.HIGHEST)

    def bn(a, g, b, m, v):
        s = g * jax.lax.rsqrt(v + eps)
        return a * s[None, :, None, None] + (b - m * s)[None, :, None, None]

    out = jax.nn.relu(bn(conv3x3(x, w1), g1, be1, m1, v1))
    out = bn(conv3x3(out, w2), g2, be2, m2, v2)
    return jax.nn.relu(out + x)


if __name__ == "__main__":
    N, C, H, W = 2, 128, 16, 16
    key = jax.random.PRNGKey(0)
    keys = jax.random.split(key, 11)

    def bf16ify(a):
        # Round to bf16-representable f32 so conv1's MXU input truncation is exact and
        # the kernel can be compared tightly against the f32 XLA conv reference.
        return a.astype(jnp.bfloat16).astype(jnp.float32)

    x = bf16ify(jax.random.normal(keys[0], (N, C, H, W), jnp.float32))
    w1 = bf16ify(jax.random.normal(keys[1], (C, C, 3, 3), jnp.float32) * 0.05)
    w2 = bf16ify(jax.random.normal(keys[2], (C, C, 3, 3), jnp.float32) * 0.05)
    g1 = jax.random.uniform(keys[3], (C,), jnp.float32, 0.5, 1.5)
    be1 = 0.1 * jax.random.normal(keys[4], (C,), jnp.float32)
    m1 = 0.1 * jax.random.normal(keys[5], (C,), jnp.float32)
    v1 = jax.random.uniform(keys[6], (C,), jnp.float32, 0.5, 1.5)
    g2 = jax.random.uniform(keys[7], (C,), jnp.float32, 0.5, 1.5)
    be2 = 0.1 * jax.random.normal(keys[8], (C,), jnp.float32)
    m2 = 0.1 * jax.random.normal(keys[9], (C,), jnp.float32)
    v2 = jax.random.uniform(keys[10], (C,), jnp.float32, 0.5, 1.5)

    out = basic_block(x, w1, g1, be1, m1, v1, w2, g2, be2, m2, v2)
    out = jax.block_until_ready(out)

    ref = basic_block_ref(x, w1, g1, be1, m1, v1, w2, g2, be2, m2, v2)
    max_err = float(jnp.max(jnp.abs(out - ref)))
    # Kernel runs bf16 MXU matmuls with f32 accumulation (standard TPU convnet
    # precision); tolerance is set accordingly vs. the true-f32 reference.
    if not jnp.allclose(out, ref, atol=3e-2, rtol=3e-2):
        raise AssertionError(f"Pallas BasicBlock does not match reference "
                             f"(max abs err = {max_err})")

    print("KERNEL_OK")
</pallas_src>

<mosaic_0001>
module attributes {stable_mosaic.version = 11 : i64} {
  func.func @kernel(%arg0: i32, %arg1: memref<1x342x128xf32, #tpu.memory_space<vmem>>, %arg2: memref<9x128x128xbf16, #tpu.memory_space<vmem>>, %arg3: memref<1x128xf32, #tpu.memory_space<vmem>>, %arg4: memref<1x128xf32, #tpu.memory_space<vmem>>, %arg5: memref<9x128x128xbf16, #tpu.memory_space<vmem>>, %arg6: memref<1x128xf32, #tpu.memory_space<vmem>>, %arg7: memref<1x128xf32, #tpu.memory_space<vmem>>, %arg8: memref<288x1xf32, #tpu.memory_space<vmem>>, %arg9: memref<1x288x128xf32, #tpu.memory_space<vmem>>, %arg10: memref<342x128xf32, #tpu.memory_space<vmem>>) attributes {dimension_semantics = [#tpu.dimension_semantics<parallel>], iteration_bounds = array<i64: 2>, scalar_prefetch = 0 : i64, scratch_operands = 1 : i64, tpu.core_type = #tpu.core_type<tc>, window_params = [{transform_indices = @transform_0, window_bounds = array<i64: 1, 342, 128>}, {pipeline_mode = #tpu.pipeline_mode<synchronous>, transform_indices = @transform_1, window_bounds = array<i64: 9, 128, 128>}, {pipeline_mode = #tpu.pipeline_mode<synchronous>, transform_indices = @transform_2, window_bounds = array<i64: 1, 128>}, {pipeline_mode = #tpu.pipeline_mode<synchronous>, transform_indices = @transform_3, window_bounds = array<i64: 1, 128>}, {pipeline_mode = #tpu.pipeline_mode<synchronous>, transform_indices = @transform_4, window_bounds = array<i64: 9, 128, 128>}, {pipeline_mode = #tpu.pipeline_mode<synchronous>, transform_indices = @transform_5, window_bounds = array<i64: 1, 128>}, {pipeline_mode = #tpu.pipeline_mode<synchronous>, transform_indices = @transform_6, window_bounds = array<i64: 1, 128>}, {pipeline_mode = #tpu.pipeline_mode<synchronous>, transform_indices = @transform_7, window_bounds = array<i64: 288, 1>}, {transform_indices = @transform_8, window_bounds = array<i64: 1, 288, 128>}]} {
    %c0 = arith.constant 0 : index
    %c0_0 = arith.constant 0 : index
    %c0_1 = arith.constant 0 : index
    %0 = vector.load %arg1[%c0, %c0_0, %c0_1] : memref<1x342x128xf32, #tpu.memory_space<vmem>>, vector<1x288x128xf32>
    %1 = vector.shape_cast %0 : vector<1x288x128xf32> to vector<288x128xf32>
    %2 = arith.truncf %1 : vector<288x128xf32> to vector<288x128xbf16>
    %c0_2 = arith.constant 0 : index
    %c0_3 = arith.constant 0 : index
    %c0_4 = arith.constant 0 : index
    %3 = vector.load %arg2[%c0_2, %c0_3, %c0_4] : memref<9x128x128xbf16, #tpu.memory_space<vmem>>, vector<1x128x128xbf16>
    %4 = vector.shape_cast %3 : vector<1x128x128xbf16> to vector<128x128xbf16>
    %cst = arith.constant dense<0.000000e+00> : vector<288x128xf32>
    %5 = tpu.matmul %2, %4, %cst {dimension_numbers = #tpu.dot_dimension_numbers<[1], [0], [0], [1], [0, 0, 1, 1], [], []>} : vector<288x128xbf16>, vector<128x128xbf16>, vector<288x128xf32> -> vector<288x128xf32>
    %c0_5 = arith.constant 0 : index
    %c1 = arith.constant 1 : index
    %c0_6 = arith.constant 0 : index
    %6 = vector.load %arg1[%c0_5, %c1, %c0_6] : memref<1x342x128xf32, #tpu.memory_space<vmem>>, vector<1x288x128xf32>
    %7 = vector.shape_cast %6 : vector<1x288x128xf32> to vector<288x128xf32>
    %8 = arith.truncf %7 : vector<288x128xf32> to vector<288x128xbf16>
    %c1_7 = arith.constant 1 : index
    %c0_8 = arith.constant 0 : index
    %c0_9 = arith.constant 0 : index
    %9 = vector.load %arg2[%c1_7, %c0_8, %c0_9] : memref<9x128x128xbf16, #tpu.memory_space<vmem>>, vector<1x128x128xbf16>
    %10 = vector.shape_cast %9 : vector<1x128x128xbf16> to vector<128x128xbf16>
    %cst_10 = arith.constant dense<0.000000e+00> : vector<288x128xf32>
    %11 = tpu.matmul %8, %10, %cst_10 {dimension_numbers = #tpu.dot_dimension_numbers<[1], [0], [0], [1], [0, 0, 1, 1], [], []>} : vector<288x128xbf16>, vector<128x128xbf16>, vector<288x128xf32> -> vector<288x128xf32>
    %12 = arith.addf %5, %11 : vector<288x128xf32>
    %c0_11 = arith.constant 0 : index
    %c2 = arith.constant 2 : index
    %c0_12 = arith.constant 0 : index
    %13 = vector.load %arg1[%c0_11, %c2, %c0_12] : memref<1x342x128xf32, #tpu.memory_space<vmem>>, vector<1x288x128xf32>
    %14 = vector.shape_cast %13 : vector<1x288x128xf32> to vector<288x128xf32>
    %15 = arith.truncf %14 : vector<288x128xf32> to vector<288x128xbf16>
    %c2_13 = arith.constant 2 : index
    %c0_14 = arith.constant 0 : index
    %c0_15 = arith.constant 0 : index
    %16 = vector.load %arg2[%c2_13, %c0_14, %c0_15] : memref<9x128x128xbf16, #tpu.memory_space<vmem>>, vector<1x128x128xbf16>
    %17 = vector.shape_cast %16 : vector<1x128x128xbf16> to vector<128x128xbf16>
    %cst_16 = arith.constant dense<0.000000e+00> : vector<288x128xf32>
    %18 = tpu.matmul %15, %17, %cst_16 {dimension_numbers = #tpu.dot_dimension_numbers<[1], [0], [0], [1], [0, 0, 1, 1], [], []>} : vector<288x128xbf16>, vector<128x128xbf16>, vector<288x128xf32> -> vector<288x128xf32>
    %19 = arith.addf %12, %18 : vector<288x128xf32>
    %c0_17 = arith.constant 0 : index
    %c18 = arith.constant 18 : index
    %c0_18 = arith.constant 0 : index
    %20 = vector.load %arg1[%c0_17, %c18, %c0_18] : memref<1x342x128xf32, #tpu.memory_space<vmem>>, vector<1x288x128xf32>
    %21 = vector.shape_cast %20 : vector<1x288x128xf32> to vector<288x128xf32>
    %22 = arith.truncf %21 : vector<288x128xf32> to vector<288x128xbf16>
    %c3 = arith.constant 3 : index
    %c0_19 = arith.constant 0 : index
    %c0_20 = arith.constant 0 : index
    %23 = vector.load %arg2[%c3, %c0_19, %c0_20] : memref<9x128x128xbf16, #tpu.memory_space<vmem>>, vector<1x128x128xbf16>
    %24 = vector.shape_cast %23 : vector<1x128x128xbf16> to vector<128x128xbf16>
    %cst_21 = arith.constant dense<0.000000e+00> : vector<288x128xf32>
    %25 = tpu.matmul %22, %24, %cst_21 {dimension_numbers = #tpu.dot_dimension_numbers<[1], [0], [0], [1], [0, 0, 1, 1], [], []>} : vector<288x128xbf16>, vector<128x128xbf16>, vector<288x128xf32> -> vector<288x128xf32>
    %26 = arith.addf %19, %25 : vector<288x128xf32>
    %c0_22 = arith.constant 0 : index
    %c19 = arith.constant 19 : index
    %c0_23 = arith.constant 0 : index
    %27 = vector.load %arg1[%c0_22, %c19, %c0_23] : memref<1x342x128xf32, #tpu.memory_space<vmem>>, vector<1x288x128xf32>
    %28 = vector.shape_cast %27 : vector<1x288x128xf32> to vector<288x128xf32>
    %29 = arith.truncf %28 : vector<288x128xf32> to vector<288x128xbf16>
    %c4 = arith.constant 4 : index
    %c0_24 = arith.constant 0 : index
    %c0_25 = arith.constant 0 : index
    %30 = vector.load %arg2[%c4, %c0_24, %c0_25] : memref<9x128x128xbf16, #tpu.memory_space<vmem>>, vector<1x128x128xbf16>
    %31 = vector.shape_cast %30 : vector<1x128x128xbf16> to vector<128x128xbf16>
    %cst_26 = arith.constant dense<0.000000e+00> : vector<288x128xf32>
    %32 = tpu.matmul %29, %31, %cst_26 {dimension_numbers = #tpu.dot_dimension_numbers<[1], [0], [0], [1], [0, 0, 1, 1], [], []>} : vector<288x128xbf16>, vector<128x128xbf16>, vector<288x128xf32> -> vector<288x128xf32>
    %33 = arith.addf %26, %32 : vector<288x128xf32>
    %c0_27 = arith.constant 0 : index
    %c20 = arith.constant 20 : index
    %c0_28 = arith.constant 0 : index
    %34 = vector.load %arg1[%c0_27, %c20, %c0_28] : memref<1x342x128xf32, #tpu.memory_space<vmem>>, vector<1x288x128xf32>
    %35 = vector.shape_cast %34 : vector<1x288x128xf32> to vector<288x128xf32>
    %36 = arith.truncf %35 : vector<288x128xf32> to vector<288x128xbf16>
    %c5 = arith.constant 5 : index
    %c0_29 = arith.constant 0 : index
    %c0_30 = arith.constant 0 : index
    %37 = vector.load %arg2[%c5, %c0_29, %c0_30] : memref<9x128x128xbf16, #tpu.memory_space<vmem>>, vector<1x128x128xbf16>
    %38 = vector.shape_cast %37 : vector<1x128x128xbf16> to vector<128x128xbf16>
    %cst_31 = arith.constant dense<0.000000e+00> : vector<288x128xf32>
    %39 = tpu.matmul %36, %38, %cst_31 {dimension_numbers = #tpu.dot_dimension_numbers<[1], [0], [0], [1], [0, 0, 1, 1], [], []>} : vector<288x128xbf16>, vector<128x128xbf16>, vector<288x128xf32> -> vector<288x128xf32>
    %40 = arith.addf %33, %39 : vector<288x128xf32>
    %c0_32 = arith.constant 0 : index
    %c36 = arith.constant 36 : index
    %c0_33 = arith.constant 0 : index
    %41 = vector.load %arg1[%c0_32, %c36, %c0_33] : memref<1x342x128xf32, #tpu.memory_space<vmem>>, vector<1x288x128xf32>
    %42 = vector.shape_cast %41 : vector<1x288x128xf32> to vector<288x128xf32>
    %43 = arith.truncf %42 : vector<288x128xf32> to vector<288x128xbf16>
    %c6 = arith.constant 6 : index
    %c0_34 = arith.constant 0 : index
    %c0_35 = arith.constant 0 : index
    %44 = vector.load %arg2[%c6, %c0_34, %c0_35] : memref<9x128x128xbf16, #tpu.memory_space<vmem>>, vector<1x128x128xbf16>
    %45 = vector.shape_cast %44 : vector<1x128x128xbf16> to vector<128x128xbf16>
    %cst_36 = arith.constant dense<0.000000e+00> : vector<288x128xf32>
    %46 = tpu.matmul %43, %45, %cst_36 {dimension_numbers = #tpu.dot_dimension_numbers<[1], [0], [0], [1], [0, 0, 1, 1], [], []>} : vector<288x128xbf16>, vector<128x128xbf16>, vector<288x128xf32> -> vector<288x128xf32>
    %47 = arith.addf %40, %46 : vector<288x128xf32>
    %c0_37 = arith.constant 0 : index
    %c37 = arith.constant 37 : index
    %c0_38 = arith.constant 0 : index
    %48 = vector.load %arg1[%c0_37, %c37, %c0_38] : memref<1x342x128xf32, #tpu.memory_space<vmem>>, vector<1x288x128xf32>
    %49 = vector.shape_cast %48 : vector<1x288x128xf32> to vector<288x128xf32>
    %50 = arith.truncf %49 : vector<288x128xf32> to vector<288x128xbf16>
    %c7 = arith.constant 7 : index
    %c0_39 = arith.constant 0 : index
    %c0_40 = arith.constant 0 : index
    %51 = vector.load %arg2[%c7, %c0_39, %c0_40] : memref<9x128x128xbf16, #tpu.memory_space<vmem>>, vector<1x128x128xbf16>
    %52 = vector.shape_cast %51 : vector<1x128x128xbf16> to vector<128x128xbf16>
    %cst_41 = arith.constant dense<0.000000e+00> : vector<288x128xf32>
    %53 = tpu.matmul %50, %52, %cst_41 {dimension_numbers = #tpu.dot_dimension_numbers<[1], [0], [0], [1], [0, 0, 1, 1], [], []>} : vector<288x128xbf16>, vector<128x128xbf16>, vector<288x128xf32> -> vector<288x128xf32>
    %54 = arith.addf %47, %53 : vector<288x128xf32>
    %c0_42 = arith.constant 0 : index
    %c38 = arith.constant 38 : index
    %c0_43 = arith.constant 0 : index
    %55 = vector.load %arg1[%c0_42, %c38, %c0_43] : memref<1x342x128xf32, #tpu.memory_space<vmem>>, vector<1x288x128xf32>
    %56 = vector.shape_cast %55 : vector<1x288x128xf32> to vector<288x128xf32>
    %57 = arith.truncf %56 : vector<288x128xf32> to vector<288x128xbf16>
    %c8 = arith.constant 8 : index
    %c0_44 = arith.constant 0 : index
    %c0_45 = arith.constant 0 : index
    %58 = vector.load %arg2[%c8, %c0_44, %c0_45] : memref<9x128x128xbf16, #tpu.memory_space<vmem>>, vector<1x128x128xbf16>
    %59 = vector.shape_cast %58 : vector<1x128x128xbf16> to vector<128x128xbf16>
    %cst_46 = arith.constant dense<0.000000e+00> : vector<288x128xf32>
    %60 = tpu.matmul %57, %59, %cst_46 {dimension_numbers = #tpu.dot_dimension_numbers<[1], [0], [0], [1], [0, 0, 1, 1], [], []>} : vector<288x128xbf16>, vector<128x128xbf16>, vector<288x128xf32> -> vector<288x128xf32>
    %61 = arith.addf %54, %60 : vector<288x128xf32>
    %c0_47 = arith.constant 0 : index
    %c0_48 = arith.constant 0 : index
    %62 = vector.load %arg3[%c0_47, %c0_48] : memref<1x128xf32, #tpu.memory_space<vmem>>, vector<1x128xf32>
    %63 = vector.broadcast %62 : vector<1x128xf32> to vector<288x128xf32>
    %64 = arith.mulf %61, %63 : vector<288x128xf32>
    %c0_49 = arith.constant 0 : index
    %c0_50 = arith.constant 0 : index
    %65 = vector.load %arg4[%c0_49, %c0_50] : memref<1x128xf32, #tpu.memory_space<vmem>>, vector<1x128xf32>
    %66 = vector.broadcast %65 : vector<1x128xf32> to vector<288x128xf32>
    %67 = arith.addf %64, %66 : vector<288x128xf32>
    %cst_51 = arith.constant 0.000000e+00 : f32
    %68 = vector.broadcast %cst_51 : f32 to vector<288x128xf32>
    %69 = arith.maximumf %67, %68 : vector<288x128xf32>
    %c0_52 = arith.constant 0 : index
    %c0_53 = arith.constant 0 : index
    %70 = vector.load %arg8[%c0_52, %c0_53] : memref<288x1xf32, #tpu.memory_space<vmem>>, vector<288x1xf32>
    %71 = vector.broadcast %70 : vector<288x1xf32> to vector<288x128xf32>
    %72 = arith.mulf %69, %71 : vector<288x128xf32>
    %cst_54 = arith.constant 0.000000e+00 : f32
    %73 = vector.broadcast %cst_54 : f32 to vector<19x128xf32>
    %c0_55 = arith.constant 0 : index
    %c0_56 = arith.constant 0 : index
    %74 = vector.load %arg10[%c0_55, %c0_56] : memref<342x128xf32, #tpu.memory_space<vmem>>, vector<19x128xf32>
    tpu.vector_store %arg10[%c0_55, %c0_56], %73 {strides = array<i32>} : memref<342x128xf32, #tpu.memory_space<vmem>>, vector<19x128xf32>,
    %cst_57 = arith.constant 0.000000e+00 : f32
    %75 = vector.broadcast %cst_57 : f32 to vector<35x128xf32>
    %c307 = arith.constant 307 : index
    %c0_58 = arith.constant 0 : index
    %76 = vector.load %arg10[%c307, %c0_58] : memref<342x128xf32, #tpu.memory_space<vmem>>, vector<35x128xf32>
    tpu.vector_store %arg10[%c307, %c0_58], %75 {strides = array<i32>} : memref<342x128xf32, #tpu.memory_space<vmem>>, vector<35x128xf32>,
    %c19_59 = arith.constant 19 : index
    %c0_60 = arith.constant 0 : index
    %77 = vector.load %arg10[%c19_59, %c0_60] : memref<342x128xf32, #tpu.memory_space<vmem>>, vector<288x128xf32>
    tpu.vector_store %arg10[%c19_59, %c0_60], %72 {strides = array<i32>} : memref<342x128xf32, #tpu.memory_space<vmem>>, vector<288x128xf32>,
    %78 = arith.truncf %72 : vector<288x128xf32> to vector<288x128xbf16>
    %c4_61 = arith.constant 4 : index
    %c0_62 = arith.constant 0 : index
    %c0_63 = arith.constant 0 : index
    %79 = vector.load %arg5[%c4_61, %c0_62, %c0_63] : memref<9x128x128xbf16, #tpu.memory_space<vmem>>, vector<1x128x128xbf16>
    %80 = vector.shape_cast %79 : vector<1x128x128xbf16> to vector<128x128xbf16>
    %cst_64 = arith.constant dense<0.000000e+00> : vector<288x128xf32>
    %81 = tpu.matmul %78, %80, %cst_64 {dimension_numbers = #tpu.dot_dimension_numbers<[1], [0], [0], [1], [0, 0, 1, 1], [], []>} : vector<288x128xbf16>, vector<128x128xbf16>, vector<288x128xf32> -> vector<288x128xf32>
    %c0_65 = arith.constant 0 : index
    %c0_66 = arith.constant 0 : index
    %82 = vector.load %arg10[%c0_65, %c0_66] : memref<342x128xf32, #tpu.memory_space<vmem>>, vector<288x128xf32>
    %83 = arith.truncf %82 : vector<288x128xf32> to vector<288x128xbf16>
    %c0_67 = arith.constant 0 : index
    %c0_68 = arith.constant 0 : index
    %c0_69 = arith.constant 0 : index
    %84 = vector.load %arg5[%c0_67, %c0_68, %c0_69] : memref<9x128x128xbf16, #tpu.memory_space<vmem>>, vector<1x128x128xbf16>
    %85 = vector.shape_cast %84 : vector<1x128x128xbf16> to vector<128x128xbf16>
    %cst_70 = arith.constant dense<0.000000e+00> : vector<288x128xf32>
    %86 = tpu.matmul %83, %85, %cst_70 {dimension_numbers = #tpu.dot_dimension_numbers<[1], [0], [0], [1], [0, 0, 1, 1], [], []>} : vector<288x128xbf16>, vector<128x128xbf16>, vector<288x128xf32> -> vector<288x128xf32>
    %87 = arith.addf %81, %86 : vector<288x128xf32>
    %c1_71 = arith.constant 1 : index
    %c0_72 = arith.constant 0 : index
    %88 = vector.load %arg10[%c1_71, %c0_72] : memref<342x128xf32, #tpu.memory_space<vmem>>, vector<288x128xf32>
    %89 = arith.truncf %88 : vector<288x128xf32> to vector<288x128xbf16>
    %c1_73 = arith.constant 1 : index
    %c0_74 = arith.constant 0 : index
    %c0_75 = arith.constant 0 : index
    %90 = vector.load %arg5[%c1_73, %c0_74, %c0_75] : memref<9x128x128xbf16, #tpu.memory_space<vmem>>, vector<1x128x128xbf16>
    %91 = vector.shape_cast %90 : vector<1x128x128xbf16> to vector<128x128xbf16>
    %cst_76 = arith.constant dense<0.000000e+00> : vector<288x128xf32>
    %92 = tpu.matmul %89, %91, %cst_76 {dimension_numbers = #tpu.dot_dimension_numbers<[1], [0], [0], [1], [0, 0, 1, 1], [], []>} : vector<288x128xbf16>, vector<128x128xbf16>, vector<288x128xf32> -> vector<288x128xf32>
    %93 = arith.addf %87, %92 : vector<288x128xf32>
    %c2_77 = arith.constant 2 : index
    %c0_78 = arith.constant 0 : index
    %94 = vector.load %arg10[%c2_77, %c0_78] : memref<342x128xf32, #tpu.memory_space<vmem>>, vector<288x128xf32>
    %95 = arith.truncf %94 : vector<288x128xf32> to vector<288x128xbf16>
    %c2_79 = arith.constant 2 : index
    %c0_80 = arith.constant 0 : index
    %c0_81 = arith.constant 0 : index
    %96 = vector.load %arg5[%c2_79, %c0_80, %c0_81] : memref<9x128x128xbf16, #tpu.memory_space<vmem>>, vector<1x128x128xbf16>
    %97 = vector.shape_cast %96 : vector<1x128x128xbf16> to vector<128x128xbf16>
    %cst_82 = arith.constant dense<0.000000e+00> : vector<288x128xf32>
    %98 = tpu.matmul %95, %97, %cst_82 {dimension_numbers = #tpu.dot_dimension_numbers<[1], [0], [0], [1], [0, 0, 1, 1], [], []>} : vector<288x128xbf16>, vector<128x128xbf16>, vector<288x128xf32> -> vector<288x128xf32>
    %99 = arith.addf %93, %98 : vector<288x128xf32>
    %c18_83 = arith.constant 18 : index
    %c0_84 = arith.constant 0 : index
    %100 = vector.load %arg10[%c18_83, %c0_84] : memref<342x128xf32, #tpu.memory_space<vmem>>, vector<288x128xf32>
    %101 = arith.truncf %100 : vector<288x128xf32> to vector<288x128xbf16>
    %c3_85 = arith.constant 3 : index
    %c0_86 = arith.constant 0 : index
    %c0_87 = arith.constant 0 : index
    %102 = vector.load %arg5[%c3_85, %c0_86, %c0_87] : memref<9x128x128xbf16, #tpu.memory_space<vmem>>, vector<1x128x128xbf16>
    %103 = vector.shape_cast %102 : vector<1x128x128xbf16> to vector<128x128xbf16>
    %cst_88 = arith.constant dense<0.000000e+00> : vector<288x128xf32>
    %104 = tpu.matmul %101, %103, %cst_88 {dimension_numbers = #tpu.dot_dimension_numbers<[1], [0], [0], [1], [0, 0, 1, 1], [], []>} : vector<288x128xbf16>, vector<128x128xbf16>, vector<288x128xf32> -> vector<288x128xf32>
    %105 = arith.addf %99, %104 : vector<288x128xf32>
    %c20_89 = arith.constant 20 : index
    %c0_90 = arith.constant 0 : index
    %106 = vector.load %arg10[%c20_89, %c0_90] : memref<342x128xf32, #tpu.memory_space<vmem>>, vector<288x128xf32>
    %107 = arith.truncf %106 : vector<288x128xf32> to vector<288x128xbf16>
    %c5_91 = arith.constant 5 : index
    %c0_92 = arith.constant 0 : index
    %c0_93 = arith.constant 0 : index
    %108 = vector.load %arg5[%c5_91, %c0_92, %c0_93] : memref<9x128x128xbf16, #tpu.memory_space<vmem>>, vector<1x128x128xbf16>
    %109 = vector.shape_cast %108 : vector<1x128x128xbf16> to vector<128x128xbf16>
    %cst_94 = arith.constant dense<0.000000e+00> : vector<288x128xf32>
    %110 = tpu.matmul %107, %109, %cst_94 {dimension_numbers = #tpu.dot_dimension_numbers<[1], [0], [0], [1], [0, 0, 1, 1], [], []>} : vector<288x128xbf16>, vector<128x128xbf16>, vector<288x128xf32> -> vector<288x128xf32>
    %111 = arith.addf %105, %110 : vector<288x128xf32>
    %c36_95 = arith.constant 36 : index
    %c0_96 = arith.constant 0 : index
    %112 = vector.load %arg10[%c36_95, %c0_96] : memref<342x128xf32, #tpu.memory_space<vmem>>, vector<288x128xf32>
    %113 = arith.truncf %112 : vector<288x128xf32> to vector<288x128xbf16>
    %c6_97 = arith.constant 6 : index
    %c0_98 = arith.constant 0 : index
    %c0_99 = arith.constant 0 : index
    %114 = vector.load %arg5[%c6_97, %c0_98, %c0_99] : memref<9x128x128xbf16, #tpu.memory_space<vmem>>, vector<1x128x128xbf16>
    %115 = vector.shape_cast %114 : vector<1x128x128xbf16> to vector<128x128xbf16>
    %cst_100 = arith.constant dense<0.000000e+00> : vector<288x128xf32>
    %116 = tpu.matmul %113, %115, %cst_100 {dimension_numbers = #tpu.dot_dimension_numbers<[1], [0], [0], [1], [0, 0, 1, 1], [], []>} : vector<288x128xbf16>, vector<128x128xbf16>, vector<288x128xf32> -> vector<288x128xf32>
    %117 = arith.addf %111, %116 : vector<288x128xf32>
    %c37_101 = arith.constant 37 : index
    %c0_102 = arith.constant 0 : index
    %118 = vector.load %arg10[%c37_101, %c0_102] : memref<342x128xf32, #tpu.memory_space<vmem>>, vector<288x128xf32>
    %119 = arith.truncf %118 : vector<288x128xf32> to vector<288x128xbf16>
    %c7_103 = arith.constant 7 : index
    %c0_104 = arith.constant 0 : index
    %c0_105 = arith.constant 0 : index
    %120 = vector.load %arg5[%c7_103, %c0_104, %c0_105] : memref<9x128x128xbf16, #tpu.memory_space<vmem>>, vector<1x128x128xbf16>
    %121 = vector.shape_cast %120 : vector<1x128x128xbf16> to vector<128x128xbf16>
    %cst_106 = arith.constant dense<0.000000e+00> : vector<288x128xf32>
    %122 = tpu.matmul %119, %121, %cst_106 {dimension_numbers = #tpu.dot_dimension_numbers<[1], [0], [0], [1], [0, 0, 1, 1], [], []>} : vector<288x128xbf16>, vector<128x128xbf16>, vector<288x128xf32> -> vector<288x128xf32>
    %123 = arith.addf %117, %122 : vector<288x128xf32>
    %c38_107 = arith.constant 38 : index
    %c0_108 = arith.constant 0 : index
    %124 = vector.load %arg10[%c38_107, %c0_108] : memref<342x128xf32, #tpu.memory_space<vmem>>, vector<288x128xf32>
    %125 = arith.truncf %124 : vector<288x128xf32> to vector<288x128xbf16>
    %c8_109 = arith.constant 8 : index
    %c0_110 = arith.constant 0 : index
    %c0_111 = arith.constant 0 : index
    %126 = vector.load %arg5[%c8_109, %c0_110, %c0_111] : memref<9x128x128xbf16, #tpu.memory_space<vmem>>, vector<1x128x128xbf16>
    %127 = vector.shape_cast %126 : vector<1x128x128xbf16> to vector<128x128xbf16>
    %cst_112 = arith.constant dense<0.000000e+00> : vector<288x128xf32>
    %128 = tpu.matmul %125, %127, %cst_112 {dimension_numbers = #tpu.dot_dimension_numbers<[1], [0], [0], [1], [0, 0, 1, 1], [], []>} : vector<288x128xbf16>, vector<128x128xbf16>, vector<288x128xf32> -> vector<288x128xf32>
    %129 = arith.addf %123, %128 : vector<288x128xf32>
    %c0_113 = arith.constant 0 : index
    %c0_114 = arith.constant 0 : index
    %130 = vector.load %arg6[%c0_113, %c0_114] : memref<1x128xf32, #tpu.memory_space<vmem>>, vector<1x128xf32>
    %131 = vector.broadcast %130 : vector<1x128xf32> to vector<288x128xf32>
    %132 = arith.mulf %129, %131 : vector<288x128xf32>
    %c0_115 = arith.constant 0 : index
    %c0_116 = arith.constant 0 : index
    %133 = vector.load %arg7[%c0_115, %c0_116] : memref<1x128xf32, #tpu.memory_space<vmem>>, vector<1x128xf32>
    %134 = vector.broadcast %133 : vector<1x128xf32> to vector<288x128xf32>
    %135 = arith.addf %132, %134 : vector<288x128xf32>
    %c0_117 = arith.constant 0 : index
    %c19_118 = arith.constant 19 : index
    %c0_119 = arith.constant 0 : index
    %136 = vector.load %arg1[%c0_117, %c19_118, %c0_119] : memref<1x342x128xf32, #tpu.memory_space<vmem>>, vector<1x288x128xf32>
    %137 = vector.shape_cast %136 : vector<1x288x128xf32> to vector<288x128xf32>
    %138 = arith.addf %135, %137 : vector<288x128xf32>
    %cst_120 = arith.constant 0.000000e+00 : f32
    %139 = vector.broadcast %cst_120 : f32 to vector<288x128xf32>
    %140 = arith.maximumf %138, %139 : vector<288x128xf32>
    %c0_121 = arith.constant 0 : index
    %c0_122 = arith.constant 0 : index
    %c0_123 = arith.constant 0 : index
    %141 = vector.load %arg9[%c0_121, %c0_122, %c0_123] : memref<1x288x128xf32, #tpu.memory_space<vmem>>, vector<1x288x128xf32>
    %142 = vector.shape_cast %141 : vector<1x288x128xf32> to vector<288x128xf32>
    %143 = vector.shape_cast %140 : vector<288x128xf32> to vector<1x288x128xf32>
    tpu.vector_store %arg9[%c0_121, %c0_122, %c0_123], %143 {strides = array<i32>} : memref<1x288x128xf32, #tpu.memory_space<vmem>>, vector<1x288x128xf32>,
    return
  }
  func.func @transform_0(%arg0: i32) -> (i32, i32, i32) {
    %c0_i32 = arith.constant 0 : i32
    %c0_i32_0 = arith.constant 0 : i32
    %c0_i32_1 = arith.constant 0 : i32
    return %arg0, %c0_i32, %c0_i32_0 : i32, i32, i32
  }
  func.func @transform_1(%arg0: i32) -> (i32, i32, i32) {
    %c0_i32 = arith.constant 0 : i32
    %c0_i32_0 = arith.constant 0 : i32
    %c0_i32_1 = arith.constant 0 : i32
    %c0_i32_2 = arith.constant 0 : i32
    return %c0_i32, %c0_i32_0, %c0_i32_1 : i32, i32, i32
  }
  func.func @transform_2(%arg0: i32) -> (i32, i32) {
    %c0_i32 = arith.constant 0 : i32
    %c0_i32_0 = arith.constant 0 : i32
    %c0_i32_1 = arith.constant 0 : i32
    return %c0_i32, %c0_i32_0 : i32, i32
  }
  func.func @transform_3(%arg0: i32) -> (i32, i32) {
    %c0_i32 = arith.constant 0 : i32
    %c0_i32_0 = arith.constant 0 : i32
    %c0_i32_1 = arith.constant 0 : i32
    return %c0_i32, %c0_i32_0 : i32, i32
  }
  func.func @transform_4(%arg0: i32) -> (i32, i32, i32) {
    %c0_i32 = arith.constant 0 : i32
    %c0_i32_0 = arith.constant 0 : i32
    %c0_i32_1 = arith.constant 0 : i32
    %c0_i32_2 = arith.constant 0 : i32
    return %c0_i32, %c0_i32_0, %c0_i32_1 : i32, i32, i32
  }
  func.func @transform_5(%arg0: i32) -> (i32, i32) {
    %c0_i32 = arith.constant 0 : i32
    %c0_i32_0 = arith.constant 0 : i32
    %c0_i32_1 = arith.constant 0 : i32
    return %c0_i32, %c0_i32_0 : i32, i32
  }
  func.func @transform_6(%arg0: i32) -> (i32, i32) {
    %c0_i32 = arith.constant 0 : i32
    %c0_i32_0 = arith.constant 0 : i32
    %c0_i32_1 = arith.constant 0 : i32
    return %c0_i32, %c0_i32_0 : i32, i32
  }
  func.func @transform_7(%arg0: i32) -> (i32, i32) {
    %c0_i32 = arith.constant 0 : i32
    %c0_i32_0 = arith.constant 0 : i32
    %c0_i32_1 = arith.constant 0 : i32
    return %c0_i32, %c0_i32_0 : i32, i32
  }
  func.func @transform_8(%arg0: i32) -> (i32, i32, i32) {
    %c0_i32 = arith.constant 0 : i32
    %c0_i32_0 = arith.constant 0 : i32
    %c0_i32_1 = arith.constant 0 : i32
    return %arg0, %c0_i32, %c0_i32_0 : i32, i32, i32
  }
}

</mosaic_0001>

<bundles_post_ra>
// kernel: tpu_custom_call.1
= control target key start
LH: loop header
LB: loop body
LE: loop exit
PB: predicated region body
PF: predicated region fallthrough
CT: control target
= control target key end

     0   :  { %13 = vsyncpa [#allocation4], 0  ;;  %s11623_s0 = inlined_call_operand.vmem [shape: f32[2,342,128], index: 0, kind: input, shape index: {}]   ;;  %s11624_s1 = inlined_call_operand.vmem [shape: bf16[9,128,128], index: 1, kind: input, shape index: {}]   ;;  %s11625_s2 = inlined_call_operand.vmem [shape: f32[1,128], index: 2, kind: input, shape index: {}]   ;;  %s11626_s3 = inlined_call_operand.vmem [shape: f32[1,128], index: 3, kind: input, shape index: {}]   ;;  %s11627_s4 = inlined_call_operand.vmem [shape: bf16[9,128,128], index: 4, kind: input, shape index: {}]   ;;  %s11628_s5 = inlined_call_operand.vmem [shape: f32[1,128], index: 5, kind: input, shape index: {}]   ;;  %s11629_s6 = inlined_call_operand.vmem [shape: f32[1,128], index: 6, kind: input, shape index: {}]   ;;  %s11630_s7 = inlined_call_operand.vmem [shape: f32[288,1], index: 7, kind: input, shape index: {}]   ;;  %s11631_s8 = inlined_call_operand.hbm [shape: f32[2,288,128], index: 8, kind: output, shape index: {}]  }
   0x1   :  { %15 = vsyncpa [#allocation4 + $0x1], 0  ;;  %s8944_s27 = smov 0   ;;  %s8946_s28 = smov 0  }
   0x2   :  { %s8948_s29 = smov 0   ;;  %s8950_s30 = smov 0  }
   0x3 LB: > { %s8965_s9 = sadd.s32 4294967295, %s8891_s30   ;;  %s6823_s10 = sadd.s32 4294967294, %s8891_s30   ;;  %s8891_s30 = sphi %s8950_s30, %s11749_s30   ;;  %s8887_s29 = sphi %s8948_s29, %s11748_s29   ;;  %s8883_s28 = sphi %s8946_s28, %s11747_s28   ;;  %s8879_s27 = sphi %s8944_s27, %s11746_s27  }
   0x4   : > { %s8969_s11 = sadd.s32 1, %s8891_s30   ;;  %s201_s12 = sadd.s32 1, %s8887_s29 }
   0x5   : > { %s198_s13 = ssub.s32 %s8891_s30, %s8969_s11  ;;  %p211_p0 = scmp.ne.s32.totalorder %s8887_s29, %s8883_s28 }
   0x6   : > { %p199_p1 = scmp.eq.s32.totalorder %s198_s13, 0  ;;  %p212_p2 = scmp.eq.s32.totalorder %s8965_s9, 1 }
   0x7   : > { %p217_p3 = scmp.ne.s32.totalorder %s8883_s28, %s8879_s27  ;;  %p218_p4 = scmp.eq.s32.totalorder %s6823_s10, 1 }
   0x8   : > { %s8980_s14 = scalar_select %p199_p1, %s8887_s29, %s201_s12  }
   0x9   : > { %p8982_p5 = por %p212_p2, %p211_p0  ;;  %p8986_p6 = por %p218_p4, %p217_p3 }
   0xa   : > { %p6826_p7 = scmp.ge.s32.totalorder %s8891_s30, 1  ;;  %p265_p8 = scmp.lt.s32.totalorder %s8891_s30, 3 }
   0xc   : > { %p266_p9 = pnand %p6826_p7, %p265_p8 }
   0xe   : > { %269 = sbr.rel (%p266_p9) target bundleno = 1137 (0x471), region = 52 }
  0x13   : > { %v8687_v0 = vld [vmem:[%s11624_s1 + $0x78] sm:$0xff]   ;;  %p299_p10 = scmp.lt.s32.totalorder %s8965_s9, 1  ;;  %v8689_v2 = vld [vmem:[%s11624_s1 + $0x70] sm:$0xff]   ;;  %v8691_v4 = vld [vmem:[%s11624_s1 + $0x68] sm:$0xff]   ;;  %s296_s26 = sand.u32 1, %s8883_s28  }
  0x14   : > { %v8688_v1 = vld [vmem:[%s11624_s1 + $0x38] sm:$0xff]   ;;  %7703 = vmatprep.subr.bf16.mxu0 %v8687_v0  ;;  %v8690_v3 = vld [vmem:[%s11624_s1 + $0x30] sm:$0xff]   ;;  %v8692_v5 = vld [vmem:[%s11624_s1 + $0x28] sm:$0xff]   ;;  %s8639_s17 = smul.u32 288, %s296_s26  ;;  %s8896_s24 = smov [#allocation3]  }
  0x15   : > { %7755 = vmatprep.subr.bf16.mxu1 %v8688_v1  ;;  %7704 = vmatpush3.bf16.msra.mxu0 %v8687_v0  ;;  %s300_s13 = scalar_select %p299_p10, %s8965_s9, 1  ;;  %v8693_v6 = vld [vmem:[%s11624_s1 + $0x60] sm:$0xff]   ;;  %v8695_v8 = vld [vmem:[%s11624_s1 + $0x58] sm:$0xff]   ;;  %v8697_v10 = vld [vmem:[%s11624_s1 + $0x50] sm:$0xff]  }
  0x16   : > { %7756 = vmatpush3.bf16.msra.mxu1 %v8688_v1  ;;  %7705 = vmatprep.subr.bf16.mxu0 %v8689_v2  ;;  %v8694_v7 = vld [vmem:[%s11624_s1 + $0x20] sm:$0xff]   ;;  %v8696_v9 = vld [vmem:[%s11624_s1 + $0x18] sm:$0xff]   ;;  %v8698_v14 = vld [vmem:[%s11624_s1 + $0x10] sm:$0xff]   ;;  %s11369_s18 = scalar_lea.vmem [#allocation3], %s8639_s17  ;;  %s8641_s19 = smul.u32 4608, %s8965_s9 }
  0x17   : > { %7757 = vmatprep.subr.bf16.mxu1 %v8690_v3  ;;  %s8640_s21 = smul.u32 344, %s300_s13  ;;  %v8699_v18 = vld [vmem:[%s11624_s1 + $0x48] sm:$0xff]   ;;  %v8701_v20 = vld [vmem:[%s11624_s1 + $0x40] sm:$0xff]   ;;  %v8703_v26 = vld [vmem:[%s11624_s1 + $0xb8] sm:$0xff]   ;;  %s6761_s20 = sshll.u32 %s11369_s18, 4  ;;  %s11577_s20 = int_to_ptr.vmem [resolvable:$true] %s6761_s20 }
  0x18   : > { %v8700_v19 = vld [vmem:[%s11624_s1 + $0x8] sm:$0xff]   ;;  %v8702_v21 = vld [vmem:[%s11624_s1] sm:$0xff]   ;;  %v8704_v35 = vld [vmem:[%s11624_s1 + $0xb0] sm:$0xff]   ;;  %s11575_s23 = scalar_lea.hbm %s11631_s8, %s8641_s19  ;;  %s11583_s9 = scalar_lea.sflag [#allocation4], %s296_s26 }
  0x19   : > { %7706 = vmatpush3.bf16.msra.mxu0 %v8689_v2  ;;  %s9027_s12 = scalar_lea.vmem %s11623_s0, %s8640_s21  ;;  %v8705_v44 = vld [vmem:[%s11624_s1 + $0xa8] sm:$0xff]   ;;  %v8708_v45 = vld [vmem:[%s11624_s1 + $0xf8] sm:$0xff]   ;;  %v8710_v49 = vld [vmem:[%s11624_s1 + $0xf0] sm:$0xff]   ;;  %s8835_s25 = sshll.u32 %s8896_s24, 4  ;;  %s8836_s25 = int_to_ptr.vmem [resolvable:$false] %s8835_s25 }
  0x1a   : > { %7758 = vmatpush3.bf16.msra.mxu1 %v8690_v3  ;;  %7707 = vmatprep.subr.bf16.mxu0 %v8691_v4  ;;  %v375_v11 = vld [vmem:[%s9027_s12 + $0x1] sm:$0xff]  ;;  %v376_v12 = vld [vmem:[%s9027_s12 + $0x9] sm:$0xff]  ;;  %v377_v22 = vld [vmem:[%s9027_s12 + $0x11] sm:$0xff]  ;;  %s8837_s10 = scalar_lea.vmem %s8836_s25, 9216  ;;  %p8838_p0 = scmp.lt.s32.totalorder %s11577_s20, %s8836_s25 }
  0x1b   : > { %7759 = vmatprep.subr.bf16.mxu1 %v8692_v5  ;;  %v305_v13 = vld [vmem:[%s9027_s12] sm:$0xff]  ;;  %v411_v15 = vpack.c.bf16 %v376_v12, %v375_v11  ;;  %v306_v16 = vld [vmem:[%s9027_s12 + $0x8] sm:$0xff]  ;;  %v307_v24 = vld [vmem:[%s9027_s12 + $0x10] sm:$0xff] }
  0x1c   : > { %v341_v17 = vpack.c.bf16 %v306_v16, %v305_v13  ;;  %v378_v23 = vld [vmem:[%s9027_s12 + $0x19] sm:$0xff]  ;;  %v379_v27 = vld [vmem:[%s9027_s12 + $0x21] sm:$0xff]  ;;  %v380_v28 = vld [vmem:[%s9027_s12 + $0x29] sm:$0xff] }
  0x1d   : > { %7708 = vmatpush3.bf16.msra.mxu0 %v8691_v4  ;;  %7719 = vmatprep.mubr.bf16.mxu0 %v411_v15  ;;  %v308_v25 = vld [vmem:[%s9027_s12 + $0x18] sm:$0xff]  ;;  %v309_v29 = vld [vmem:[%s9027_s12 + $0x20] sm:$0xff]  ;;  %v310_v30 = vld [vmem:[%s9027_s12 + $0x28] sm:$0xff]  ;;  %v412_v31 = vpack.c.bf16 %v378_v23, %v377_v22  ;;  %v413_v33 = vpack.c.bf16 %v380_v28, %v379_v27 }
  0x1e   : > { %7760 = vmatpush3.bf16.msra.mxu1 %v8692_v5  ;;  %7709 = vmatprep.subr.bf16.mxu0 %v8693_v6  ;;  %v342_v32 = vpack.c.bf16 %v308_v25, %v307_v24  ;;  %v343_v34 = vpack.c.bf16 %v310_v30, %v309_v29  ;;  %v381_v36 = vld [vmem:[%s9027_s12 + $0x31] sm:$0xff]  ;;  %v382_v37 = vld [vmem:[%s9027_s12 + $0x39] sm:$0xff]  ;;  %v383_v40 = vld [vmem:[%s9027_s12 + $0x41] sm:$0xff] }
  0x1f   : > { %7761 = vmatprep.subr.bf16.mxu1 %v8694_v7  ;;  %7771 = vmatprep.mubr.bf16.mxu1 %v341_v17  ;;  %v311_v38 = vld [vmem:[%s9027_s12 + $0x30] sm:$0xff]  ;;  %v312_v39 = vld [vmem:[%s9027_s12 + $0x38] sm:$0xff]  ;;  %v313_v42 = vld [vmem:[%s9027_s12 + $0x40] sm:$0xff]  ;;  %v414_v46 = vpack.c.bf16 %v382_v37, %v381_v36 }
  0x20   : > { %v384_v41 = vld [vmem:[%s9027_s12 + $0x49] sm:$0xff]  ;;  %v344_v47 = vpack.c.bf16 %v312_v39, %v311_v38  ;;  %v385_v51 = vld [vmem:[%s9027_s12 + $0x51] sm:$0xff]  ;;  %v386_v52 = vld [vmem:[%s9027_s12 + $0x59] sm:$0xff] }
  0x21   : > { %7710 = vmatpush3.bf16.msra.mxu0 %v8693_v6  ;;  %v314_v43 = vld [vmem:[%s9027_s12 + $0x48] sm:$0xff]  ;;  %v415_v48 = vpack.c.bf16 %v384_v41, %v383_v40  ;;  %v8706_v53 = vld [vmem:[%s11624_s1 + $0xa0] sm:$0xff]   ;;  %v315_v54 = vld [vmem:[%s9027_s12 + $0x50] sm:$0xff]  ;;  %v416_v62 = vpack.c.bf16 %v386_v52, %v385_v51 }
  0x22   : > { %7762 = vmatpush3.bf16.msra.mxu1 %v8694_v7  ;;  %7711 = vmatprep.subr.bf16.mxu0 %v8695_v8  ;;  %v345_v50 = vpack.c.bf16 %v314_v43, %v313_v42  ;;  %v316_v55 = vld [vmem:[%s9027_s12 + $0x58] sm:$0xff]  ;;  %v387_v56 = vld [vmem:[%s9027_s12 + $0x61] sm:$0xff]  ;;  %v388_v57 = vld [vmem:[%s9027_s12 + $0x69] sm:$0xff] }
  0x23   : > { %7763 = vmatprep.subr.bf16.mxu1 %v8696_v9  ;;  %v8711_v58 = vld [vmem:[%s11624_s1 + $0xe8] sm:$0xff]   ;;  %v317_v59 = vld [vmem:[%s9027_s12 + $0x60] sm:$0xff]  ;;  %v8707_v61 = vld [vmem:[%s11624_s1 + $0x98] sm:$0xff]   ;;  %v346_v0 = vpack.c.bf16 %v316_v55, %v315_v54  ;;  %v417_v1 = vpack.c.bf16 %v388_v57, %v387_v56 }
  0x24   : > { %v318_v60 = vld [vmem:[%s9027_s12 + $0x68] sm:$0xff]  ;;  %v8713_v63 = vld [vmem:[%s11624_s1 + $0xe0] sm:$0xff]   ;;  %v8709_v3 = vld [vmem:[%s11624_s1 + $0x90] sm:$0xff]  }
  0x25   : > { %7712 = vmatpush3.bf16.msra.mxu0 %v8695_v8  ;;  %v347_v2 = vpack.c.bf16 %v318_v60, %v317_v59  ;;  %v389_v4 = vld [vmem:[%s9027_s12 + $0x71] sm:$0xff]  ;;  %v390_v5 = vld [vmem:[%s9027_s12 + $0x79] sm:$0xff]  ;;  %v322_v12 = vld [vmem:[%s9027_s12 + $0x88] sm:$0xff] }
  0x26   : > { %7764 = vmatpush3.bf16.msra.mxu1 %v8696_v9  ;;  %7713 = vmatprep.subr.bf16.mxu0 %v8697_v10  ;;  %v8714_v6 = vld [vmem:[%s11624_s1 + $0xd8] sm:$0xff]   ;;  %v319_v7 = vld [vmem:[%s9027_s12 + $0x70] sm:$0xff]  ;;  %v391_v9 = vld [vmem:[%s9027_s12 + $0x81] sm:$0xff] }
  0x27   : > { %7765 = vmatprep.subr.bf16.mxu1 %v8698_v14  ;;  %v320_v8 = vld [vmem:[%s9027_s12 + $0x78] sm:$0xff]  ;;  %v321_v11 = vld [vmem:[%s9027_s12 + $0x80] sm:$0xff]  ;;  %v8712_v13 = vld [vmem:[%s11624_s1 + $0x88] sm:$0xff]  }
  0x28   : > { %v8715_v15 = vld [vmem:[%s11624_s1 + $0xd0] sm:$0xff]   ;;  %v348_v16 = vpack.c.bf16 %v320_v8, %v319_v7  ;;  %v8717_v22 = vld [vmem:[%s11624_s1 + $0xc8] sm:$0xff]   ;;  %v324_v24 = vld [vmem:[%s9027_s12 + $0x98] sm:$0xff] }
  0x29   : > { %7714 = vmatpush3.bf16.msra.mxu0 %v8697_v10  ;;  %v392_v10 = vld [vmem:[%s9027_s12 + $0x89] sm:$0xff]  ;;  %v395_v25 = vld [vmem:[%s9027_s12 + $0xa1] sm:$0xff]  ;;  %v9139_v29 = vld [vmem:[%s11624_s1 + $0x138] sm:$0xff]  }
  0x2a   : > { %7766 = vmatpush3.bf16.msra.mxu1 %v8698_v14  ;;  %7715 = vmatprep.subr.bf16.mxu0 %v8699_v18  ;;  %v418_v14 = vpack.c.bf16 %v390_v5, %v389_v4  ;;  %v419_v17 = vpack.c.bf16 %v392_v10, %v391_v9  ;;  %v323_v23 = vld [vmem:[%s9027_s12 + $0x90] sm:$0xff]  ;;  %v325_v27 = vld [vmem:[%s9027_s12 + $0xa0] sm:$0xff]  ;;  %v326_v28 = vld [vmem:[%s9027_s12 + $0xa8] sm:$0xff] }
  0x2b   : > { %7767 = vmatprep.subr.bf16.mxu1 %v8700_v19  ;;  %v398_v36 = vld [vmem:[%s9027_s12 + $0xb9] sm:$0xff]  ;;  %v327_v37 = vld [vmem:[%s9027_s12 + $0xb0] sm:$0xff]  ;;  %v399_v39 = vld [vmem:[%s9027_s12 + $0xc1] sm:$0xff] }
  0x2c   : > { %v328_v38 = vld [vmem:[%s9027_s12 + $0xb8] sm:$0xff]  ;;  %v400_v40 = vld [vmem:[%s9027_s12 + $0xc9] sm:$0xff]  ;;  %v329_v41 = vld [vmem:[%s9027_s12 + $0xc0] sm:$0xff] }
  0x2d   : > { %7716 = vmatpush3.bf16.msra.mxu0 %v8699_v18  ;;  %v349_v18 = vpack.c.bf16 %v322_v12, %v321_v11  ;;  %v330_v42 = vld [vmem:[%s9027_s12 + $0xc8] sm:$0xff]  ;;  %v332_v51 = vld [vmem:[%s9027_s12 + $0xd8] sm:$0xff]  ;;  %v333_v54 = vld [vmem:[%s9027_s12 + $0xe0] sm:$0xff] }
  0x2e   : > { %7768 = vmatpush3.bf16.msra.mxu1 %v8700_v19  ;;  %7717 = vmatprep.subr.bf16.mxu0 %v8701_v20  ;;  %v8716_v19 = vld [vmem:[%s11624_s1 + $0x80] sm:$0xff]   ;;  %v334_v55 = vld [vmem:[%s9027_s12 + $0xe8] sm:$0xff]  ;;  %v405_v60 = vld [vmem:[%s9027_s12 + $0xf1] sm:$0xff] }
  0x2f   : > { %7769 = vmatprep.subr.bf16.mxu1 %v8702_v21  ;;  %v403_v52 = vld [vmem:[%s9027_s12 + $0xe1] sm:$0xff]  ;;  %v355_v59 = vpack.c.bf16 %v334_v55, %v333_v54  ;;  %v409_v8 = vld [vmem:[%s9027_s12 + $0x111] sm:$0xff]  ;;  %v410_v9 = vld [vmem:[%s9027_s12 + $0x119] sm:$0xff] }
  0x30   : > { %v339_v10 = vld [vmem:[%s9027_s12 + $0x110] sm:$0xff]  ;;  %v340_v11 = vld [vmem:[%s9027_s12 + $0x118] sm:$0xff]  ;;  %v896_v12 = vld [vmem:[%s9027_s12 + $0x2] sm:$0xff] }
  0x31   : > { %7718 = vmatpush3.bf16.msra.mxu0 %v8701_v20  ;;  %v393_v20 = vld [vmem:[%s9027_s12 + $0x91] sm:$0xff] }
  0x32   : > { %7770 = vmatpush3.bf16.msra.mxu1 %v8702_v21  ;;  %7807 = vmatprep.subr.bf16.mxu0 %v8703_v26  ;;  %v394_v21 = vld [vmem:[%s9027_s12 + $0x99] sm:$0xff] }
  0x33   : > { %7859 = vmatprep.subr.bf16.mxu1 %v8708_v45  ;;  %v420_v30 = vpack.c.bf16 %v394_v21, %v393_v20  ;;  %v1230_v20 = vld [vmem:[%s9027_s12 + $0x22] sm:$0xff]  ;;  %v1231_v21 = vld [vmem:[%s9027_s12 + $0x2a] sm:$0xff] }
  0x34   : > { %7720 = vmatmul.mubr.bf16.vlgmr.msra.gmra.mxu0 %v412_v31  ;;  %v8718_v31 = vld [vmem:[%s11624_s1 + $0xc0] sm:$0xff]  }
  0x35   : > { %7772 = vmatmul.mubr.bf16.vlgmr.msra.gmra.mxu1 %v342_v32  ;;  %7808 = vmatpush3.bf16.msra.mxu0 %v8703_v26  ;;  %v396_v26 = vld [vmem:[%s9027_s12 + $0xa9] sm:$0xff]  ;;  %v350_v32 = vpack.c.bf16 %v324_v24, %v323_v23  ;;  %v903_v23 = vld [vmem:[%s9027_s12 + $0x3a] sm:$0xff]  ;;  %v1265_v24 = vpack.c.bf16 %v1231_v21, %v1230_v20 }
  0x36   : > { %7723 = vmatprep.mubr.bf16.mxu0 %v413_v33  ;;  %7775 = vmatprep.mubr.bf16.mxu1 %v343_v34  ;;  %v421_v33 = vpack.c.bf16 %v396_v26, %v395_v25  ;;  %v351_v34 = vpack.c.bf16 %v326_v28, %v325_v27  ;;  %v8720_v26 = vld [vmem:[%s11624_s1 + $0x130] sm:$0xff]   ;;  %v1234_v28 = vld [vmem:[%s9027_s12 + $0x42] sm:$0xff] }
  0x37   : > { %7809 = vmatprep.subr.bf16.mxu0 %v8704_v35  ;;  %7860 = vmatpush3.bf16.msra.mxu1 %v8708_v45  ;;  %v352_v45 = vpack.c.bf16 %v328_v38, %v327_v37  ;;  %v8726_v27 = vld [vmem:[%s11624_s1 + $0x170] sm:$0xff]   ;;  %v8729_v37 = vld [vmem:[%s11624_s1 + $0x160] sm:$0xff]  }
  0x38   : > { %7861 = vmatprep.subr.bf16.mxu1 %v8710_v49  ;;  %v1238_v38 = vld [vmem:[%s9027_s12 + $0x62] sm:$0xff]  ;;  %v1263_v21 = vld [vmem:[%s9027_s12 + $0x12a] sm:$0xff] }
  0x39   : > { %7810 = vmatpush3.bf16.msra.mxu0 %v8704_v35  ;;  %v397_v35 = vld [vmem:[%s9027_s12 + $0xb1] sm:$0xff]  ;;  %v1262_v20 = vld [vmem:[%s9027_s12 + $0x122] sm:$0xff] }
  0x3a   : > { %7811 = vmatprep.subr.bf16.mxu0 %v8705_v44  ;;  %v422_v43 = vpack.c.bf16 %v398_v36, %v397_v35  ;;  %v8722_v36 = vld [vmem:[%s11624_s1 + $0x120] sm:$0xff]  }
  0x3b   : > { %7862 = vmatpush3.bf16.msra.mxu1 %v8710_v49  ;;  %v402_v49 = vld [vmem:[%s9027_s12 + $0xd9] sm:$0xff] }
  0x3c   : > { %7724 = vmatmul.mubr.bf16.gmra.mxu0 %v414_v46  ;;  %7863 = vmatprep.subr.bf16.mxu1 %v8711_v58  ;;  %v423_v46 = vpack.c.bf16 %v400_v40, %v399_v39  ;;  %v1239_v39 = vld [vmem:[%s9027_s12 + $0x6a] sm:$0xff]  ;;  %v910_v40 = vld [vmem:[%s9027_s12 + $0x72] sm:$0xff] }
  0x3d   : > { %7776 = vmatmul.mubr.bf16.gmra.mxu1 %v344_v47  ;;  %7727 = vmatprep.mubr.bf16.mxu0 %v415_v48  ;;  %v353_v47 = vpack.c.bf16 %v330_v42, %v329_v41  ;;  %v401_v48 = vld [vmem:[%s9027_s12 + $0xd1] sm:$0xff]  ;;  %v911_v41 = vld [vmem:[%s9027_s12 + $0x7a] sm:$0xff] }
  0x3e   : > { %7779 = vmatprep.mubr.bf16.mxu1 %v345_v50  ;;  %7812 = vmatpush3.bf16.msra.mxu0 %v8705_v44  ;;  %v9156_v44 = vld [vmem:[%s11624_s1 + $0x178] sm:$0xff]   ;;  %v331_v50 = vld [vmem:[%s9027_s12 + $0xd0] sm:$0xff]  ;;  %v424_v56 = vpack.c.bf16 %v402_v49, %v401_v48 }
  0x3f   : > { %7813 = vmatprep.subr.bf16.mxu0 %v8706_v53  ;;  %7864 = vmatpush3.bf16.msra.mxu1 %v8711_v58  ;;  %v354_v57 = vpack.c.bf16 %v332_v51, %v331_v50  ;;  %v8723_v42 = vld [vmem:[%s11624_s1 + $0x118] sm:$0xff]   ;;  %v8731_v48 = vld [vmem:[%s11624_s1 + $0x150] sm:$0xff]  }
  0x40   : > { %7865 = vmatprep.subr.bf16.mxu1 %v8713_v63  ;;  %v1243_v49 = vld [vmem:[%s9027_s12 + $0x8a] sm:$0xff]  ;;  %v914_v50 = vld [vmem:[%s9027_s12 + $0x92] sm:$0xff]  ;;  %v915_v51 = vld [vmem:[%s9027_s12 + $0x9a] sm:$0xff] }
  0x41   : > { %v941_v55 = vpack.c.bf16 %v915_v51, %v914_v50  ;;  %v1900_v50 = vld [vmem:[%s9027_s12 + $0x54] sm:$0xff]  ;;  %v1901_v51 = vld [vmem:[%s9027_s12 + $0x5c] sm:$0xff] }
  0x42   : > { %7814 = vmatpush3.bf16.msra.mxu0 %v8706_v53  ;;  %v404_v53 = vld [vmem:[%s9027_s12 + $0xe9] sm:$0xff] }
  0x43   : > { %7815 = vmatprep.subr.bf16.mxu0 %v8707_v61  ;;  %7866 = vmatpush3.bf16.msra.mxu1 %v8713_v63  ;;  %v425_v58 = vpack.c.bf16 %v404_v53, %v403_v52  ;;  %v336_v63 = vld [vmem:[%s9027_s12 + $0xf8] sm:$0xff]  ;;  %v8728_v52 = vld [vmem:[%s11624_s1 + $0x108] sm:$0xff]  }
  0x44   : > { %7728 = vmatmul.mubr.bf16.gmra.mxu0 %v416_v62  ;;  %7867 = vmatprep.subr.bf16.mxu1 %v8714_v6  ;;  %v335_v62 = vld [vmem:[%s9027_s12 + $0xf0] sm:$0xff]  ;;  %v8733_v53 = vld [vmem:[%s11624_s1 + $0x148] sm:$0xff]  }
  0x45   : > { %7780 = vmatmul.mubr.bf16.gmra.mxu1 %v346_v0  ;;  %7731 = vmatprep.mubr.bf16.mxu0 %v417_v1  ;;  %v407_v0 = vld [vmem:[%s9027_s12 + $0x101] sm:$0xff]  ;;  %v408_v1 = vld [vmem:[%s9027_s12 + $0x109] sm:$0xff]  ;;  %v356_v5 = vpack.c.bf16 %v336_v63, %v335_v62  ;;  %v9250_v62 = vld [vmem:[%s11624_s1 + $0x1b8] sm:$0xff]  }
  0x46   : > { %7783 = vmatprep.mubr.bf16.mxu1 %v347_v2  ;;  %7816 = vmatpush3.bf16.msra.mxu0 %v8707_v61  ;;  %v406_v61 = vld [vmem:[%s9027_s12 + $0xf9] sm:$0xff] }
  0x47   : > { %7817 = vmatprep.subr.bf16.mxu0 %v8709_v3  ;;  %7868 = vmatpush3.bf16.msra.mxu1 %v8714_v6  ;;  %v337_v2 = vld [vmem:[%s9027_s12 + $0x100] sm:$0xff]  ;;  %v426_v4 = vpack.c.bf16 %v406_v61, %v405_v60  ;;  %v427_v6 = vpack.c.bf16 %v408_v1, %v407_v0  ;;  %v918_v60 = vld [vmem:[%s9027_s12 + $0xb2] sm:$0xff] }
  0x48   : > { %7869 = vmatprep.subr.bf16.mxu1 %v8715_v15  ;;  %v919_v61 = vld [vmem:[%s9027_s12 + $0xba] sm:$0xff] }
  0x49   : > { %v9255_v63 = vld [vmem:[%s11624_s1 + $0x1f8] sm:$0xff]   ;;  %v943_v1 = vpack.c.bf16 %v919_v61, %v918_v60  ;;  %v1902_v60 = vld [vmem:[%s9027_s12 + $0x64] sm:$0xff]  ;;  %v1903_v61 = vld [vmem:[%s9027_s12 + $0x6c] sm:$0xff] }
  0x4a   : > { %7818 = vmatpush3.bf16.msra.mxu0 %v8709_v3  ;;  %v338_v3 = vld [vmem:[%s9027_s12 + $0x108] sm:$0xff] }
  0x4b   : > { %7819 = vmatprep.subr.bf16.mxu0 %v8712_v13  ;;  %7870 = vmatpush3.bf16.msra.mxu1 %v8715_v15  ;;  %v357_v7 = vpack.c.bf16 %v338_v3, %v337_v2  ;;  %v899_v15 = vld [vmem:[%s9027_s12 + $0x1a] sm:$0xff]  ;;  %v1250_v2 = vld [vmem:[%s9027_s12 + $0xc2] sm:$0xff]  ;;  %v1251_v3 = vld [vmem:[%s9027_s12 + $0xca] sm:$0xff] }
  0x4c   : > { %7732 = vmatmul.mubr.bf16.gmra.mxu0 %v418_v14  ;;  %7871 = vmatprep.subr.bf16.mxu1 %v8717_v22  ;;  %v898_v14 = vld [vmem:[%s9027_s12 + $0x12] sm:$0xff] }
  0x4d   : > { %7784 = vmatmul.mubr.bf16.gmra.mxu1 %v348_v16  ;;  %7735 = vmatprep.mubr.bf16.mxu0 %v419_v17  ;;  %v428_v16 = vpack.c.bf16 %v410_v9, %v409_v8  ;;  %v358_v17 = vpack.c.bf16 %v340_v11, %v339_v10  ;;  %v1254_v8 = vld [vmem:[%s9027_s12 + $0xe2] sm:$0xff]  ;;  %v1255_v9 = vld [vmem:[%s9027_s12 + $0xea] sm:$0xff]  ;;  %v926_v10 = vld [vmem:[%s9027_s12 + $0xf2] sm:$0xff] }
  0x4e   : > { %7787 = vmatprep.mubr.bf16.mxu1 %v349_v18  ;;  %7820 = vmatpush3.bf16.msra.mxu0 %v8712_v13  ;;  %v897_v13 = vld [vmem:[%s9027_s12 + $0xa] sm:$0xff]  ;;  %v927_v11 = vld [vmem:[%s9027_s12 + $0xfa] sm:$0xff] }
  0x4f   : > { %7821 = vmatprep.subr.bf16.mxu0 %v8716_v19  ;;  %7872 = vmatpush3.bf16.msra.mxu1 %v8717_v22  ;;  %v932_v18 = vpack.c.bf16 %v897_v13, %v896_v12  ;;  %v902_v22 = vld [vmem:[%s9027_s12 + $0x32] sm:$0xff]  ;;  %v1277_v12 = vpack.c.bf16 %v1255_v9, %v1254_v8  ;;  %v947_v13 = vpack.c.bf16 %v927_v11, %v926_v10  ;;  %v1574_v11 = vld [vmem:[%s9027_s12 + $0x83] sm:$0xff] }
  0x50   : > { %7873 = vmatprep.subr.bf16.mxu1 %v8718_v31  ;;  %v935_v25 = vpack.c.bf16 %v903_v23, %v902_v22  ;;  %v1560_v22 = vld [vmem:[%s9027_s12 + $0x13] sm:$0xff]  ;;  %v1561_v23 = vld [vmem:[%s9027_s12 + $0x1b] sm:$0xff] }
  0x51   : > { %v8741_v9 = vld [vmem:[%s11624_s1 + $0x190] sm:$0xff]  }
  0x52   : > { %7822 = vmatpush3.bf16.msra.mxu0 %v8716_v19  ;;  %v933_v19 = vpack.c.bf16 %v899_v15, %v898_v14  ;;  %v1258_v14 = vld [vmem:[%s9027_s12 + $0x102] sm:$0xff]  ;;  %v1259_v15 = vld [vmem:[%s9027_s12 + $0x10a] sm:$0xff] }
  0x53   : > { %7911 = vmatprep.subr.bf16.mxu0 %v9139_v29  ;;  %7874 = vmatpush3.bf16.msra.mxu1 %v8718_v31  ;;  %v8721_v31 = vld [vmem:[%s11624_s1 + $0x128] sm:$0xff]   ;;  %v8747_v10 = vld [vmem:[%s11624_s1 + $0x1d0] sm:$0xff]  }
  0x54   : > { %7736 = vmatmul.mubr.bf16.gmra.mxu0 %v420_v30  ;;  %7963 = vmatprep.subr.bf16.mxu1 %v9156_v44  ;;  %v1235_v30 = vld [vmem:[%s9027_s12 + $0x4a] sm:$0xff] }
  0x55   : > { %7788 = vmatmul.mubr.bf16.gmra.mxu1 %v350_v32  ;;  %7739 = vmatprep.mubr.bf16.mxu0 %v421_v33  ;;  %v906_v32 = vld [vmem:[%s9027_s12 + $0x52] sm:$0xff]  ;;  %v907_v33 = vld [vmem:[%s9027_s12 + $0x5a] sm:$0xff] }
  0x56   : > { %7791 = vmatprep.mubr.bf16.mxu1 %v351_v34  ;;  %v1267_v34 = vpack.c.bf16 %v1235_v30, %v1234_v28  ;;  %v937_v35 = vpack.c.bf16 %v907_v33, %v906_v32  ;;  %v1562_v30 = vld [vmem:[%s9027_s12 + $0x23] sm:$0xff]  ;;  %v1895_v33 = vld [vmem:[%s9027_s12 + $0x2c] sm:$0xff] }
  0x57   : > { %v1894_v32 = vld [vmem:[%s9027_s12 + $0x24] sm:$0xff] }
  0x5c   : > { %7740 = vmatmul.mubr.bf16.gmra.mxu0 %v422_v43  ;;  %v8730_v43 = vld [vmem:[%s11624_s1 + $0x158] sm:$0xff]  }
  0x5d   : > { %7792 = vmatmul.mubr.bf16.gmra.mxu1 %v352_v45  ;;  %7743 = vmatprep.mubr.bf16.mxu0 %v423_v46  ;;  %v939_v45 = vpack.c.bf16 %v911_v41, %v910_v40  ;;  %v8725_v46 = vld [vmem:[%s11624_s1 + $0x110] sm:$0xff]   ;;  %v1566_v41 = vld [vmem:[%s9027_s12 + $0x43] sm:$0xff] }
  0x5e   : > { %7795 = vmatprep.mubr.bf16.mxu1 %v353_v47  ;;  %v1242_v47 = vld [vmem:[%s9027_s12 + $0x82] sm:$0xff] }
  0x5f   : > { %v1271_v54 = vpack.c.bf16 %v1243_v49, %v1242_v47  ;;  %v1569_v47 = vld [vmem:[%s9027_s12 + $0x5b] sm:$0xff]  ;;  %v8742_v49 = vld [vmem:[%s11624_s1 + $0x1f0] sm:$0xff]  }
  0x64   : > { %7744 = vmatmul.mubr.bf16.gmra.mxu0 %v424_v56  ;;  %v8732_v56 = vld [vmem:[%s11624_s1 + $0x100] sm:$0xff]  }
  0x65   : > { %7796 = vmatmul.mubr.bf16.gmra.mxu1 %v354_v57  ;;  %7747 = vmatprep.mubr.bf16.mxu0 %v425_v58  ;;  %v1246_v57 = vld [vmem:[%s9027_s12 + $0xa2] sm:$0xff]  ;;  %v1247_v58 = vld [vmem:[%s9027_s12 + $0xaa] sm:$0xff] }
  0x66   : > { %7799 = vmatprep.mubr.bf16.mxu1 %v355_v59  ;;  %v8734_v59 = vld [vmem:[%s11624_s1 + $0x140] sm:$0xff]   ;;  %v1273_v0 = vpack.c.bf16 %v1247_v58, %v1246_v57  ;;  %v1571_v58 = vld [vmem:[%s9027_s12 + $0x6b] sm:$0xff] }
  0x67   : > { %v1570_v57 = vld [vmem:[%s9027_s12 + $0x63] sm:$0xff] }
  0x6c   : > { %7748 = vmatmul.mubr.bf16.gmra.mxu0 %v426_v4  ;;  %v922_v4 = vld [vmem:[%s9027_s12 + $0xd2] sm:$0xff] }
  0x6d   : > { %7800 = vmatmul.mubr.bf16.gmra.mxu1 %v356_v5  ;;  %7751 = vmatprep.mubr.bf16.mxu0 %v427_v6  ;;  %v923_v5 = vld [vmem:[%s9027_s12 + $0xda] sm:$0xff]  ;;  %v1275_v6 = vpack.c.bf16 %v1251_v3, %v1250_v2 }
  0x6e   : > { %7803 = vmatprep.mubr.bf16.mxu1 %v357_v7  ;;  %v945_v7 = vpack.c.bf16 %v923_v5, %v922_v4  ;;  %v1905_v2 = vld [vmem:[%s9027_s12 + $0x7c] sm:$0xff]  ;;  %v1601_v5 = vpack.c.bf16 %v1571_v58, %v1570_v57 }
  0x6f   : > { %v8739_v3 = vld [vmem:[%s11624_s1 + $0x198] sm:$0xff]   ;;  %v3346_v57 = vld [vmem:[%s11630_s7 + $0x20] sm:$0xff] }
  0x70   : > { %v8746_v4 = vld [vmem:[%s11624_s1 + $0x1d8] sm:$0xff]  }
  0x74   : > { %7752 = vmatmul.mubr.bf16.gmra.mxu0 %v428_v16  ;;  %v930_v16 = vld [vmem:[%s9027_s12 + $0x112] sm:$0xff] }
  0x75   : > { %7804 = vmatmul.mubr.bf16.gmra.mxu1 %v358_v17  ;;  %7823 = vmatprep.mubr.bf16.mxu0 %v932_v18  ;;  %v931_v17 = vld [vmem:[%s9027_s12 + $0x11a] sm:$0xff]  ;;  %v1279_v18 = vpack.c.bf16 %v1259_v15, %v1258_v14  ;;  %v1907_v14 = vld [vmem:[%s9027_s12 + $0x8c] sm:$0xff] }
  0x76   : > { %7875 = vmatprep.mubr.bf16.mxu1 %v933_v19  ;;  %v1576_v15 = vld [vmem:[%s9027_s12 + $0x93] sm:$0xff] }
  0x7c   : > { %7824 = vmatmul.mubr.bf16.vlgmr.msra.gmra.mxu0 %v933_v19  ;;  %v949_v19 = vpack.c.bf16 %v931_v17, %v930_v16  ;;  %v1577_v16 = vld [vmem:[%s9027_s12 + $0x9b] sm:$0xff] }
  0x7d   : > { %7912 = vmatpush3.bf16.msra.mxu0 %v9139_v29  ;;  %7876 = vmatmul.mubr.bf16.vlgmr.msra.gmra.mxu1 %v1265_v24  ;;  %v8727_v29 = vld [vmem:[%s11624_s1 + $0x168] sm:$0xff]   ;;  %v1908_v17 = vld [vmem:[%s9027_s12 + $0x94] sm:$0xff] }
  0x7e   : > { %7827 = vmatprep.mubr.bf16.mxu0 %v1265_v24  ;;  %7879 = vmatprep.mubr.bf16.mxu1 %v935_v25  ;;  %v1892_v24 = vld [vmem:[%s9027_s12 + $0x14] sm:$0xff] }
  0x7f   : > { %7913 = vmatprep.subr.bf16.mxu0 %v8720_v26  ;;  %7964 = vmatpush3.bf16.msra.mxu1 %v9156_v44  ;;  %v1269_v44 = vpack.c.bf16 %v1239_v39, %v1238_v38  ;;  %v9285_v38 = vpack.c.bf16 %v1895_v33, %v1894_v32  ;;  %v1580_v32 = vld [vmem:[%s9027_s12 + $0xb3] sm:$0xff]  ;;  %v1581_v33 = vld [vmem:[%s9027_s12 + $0xbb] sm:$0xff] }
  0x80   : > { %7965 = vmatprep.subr.bf16.mxu1 %v8726_v27 }
  0x81   : > { %7914 = vmatpush3.bf16.msra.mxu0 %v8720_v26  ;;  %v1281_v26 = vpack.c.bf16 %v1263_v21, %v1262_v20  ;;  %v8749_v21 = vld [vmem:[%s11624_s1 + $0x1c8] sm:$0xff]  }
  0x82   : > { %7915 = vmatprep.subr.bf16.mxu0 %v8721_v31 }
  0x83   : > { %7966 = vmatpush3.bf16.msra.mxu1 %v8726_v27  ;;  %v1596_v27 = vpack.c.bf16 %v1561_v23, %v1560_v22  ;;  %v1604_v23 = vpack.c.bf16 %v1577_v16, %v1576_v15  ;;  %v3351_v16 = vld [vmem:[%s11630_s7 + $0x48] sm:$0xff] }
  0x84   : > { %7828 = vmatmul.mubr.bf16.gmra.mxu0 %v935_v25  ;;  %7967 = vmatprep.subr.bf16.mxu1 %v8727_v29  ;;  %v1893_v25 = vld [vmem:[%s9027_s12 + $0x1c] sm:$0xff] }
  0x85   : > { %7880 = vmatmul.mubr.bf16.gmra.mxu1 %v1267_v34  ;;  %7831 = vmatprep.mubr.bf16.mxu0 %v1267_v34  ;;  %v1928_v28 = vpack.c.bf16 %v1893_v25, %v1892_v24  ;;  %v1565_v34 = vld [vmem:[%s9027_s12 + $0x3b] sm:$0xff] }
  0x86   : > { %7883 = vmatprep.mubr.bf16.mxu1 %v937_v35  ;;  %7916 = vmatpush3.bf16.msra.mxu0 %v8721_v31  ;;  %v1563_v31 = vld [vmem:[%s9027_s12 + $0x2b] sm:$0xff]  ;;  %v8748_v25 = vld [vmem:[%s11624_s1 + $0x180] sm:$0xff]  }
  0x87   : > { %7917 = vmatprep.subr.bf16.mxu0 %v8722_v36  ;;  %7968 = vmatpush3.bf16.msra.mxu1 %v8727_v29  ;;  %v1564_v29 = vld [vmem:[%s9027_s12 + $0x33] sm:$0xff] }
  0x88   : > { %7969 = vmatprep.subr.bf16.mxu1 %v8729_v37  ;;  %v1598_v39 = vpack.c.bf16 %v1565_v34, %v1564_v29  ;;  %v1912_v29 = vld [vmem:[%s9027_s12 + $0xb4] sm:$0xff]  ;;  %v1913_v34 = vld [vmem:[%s9027_s12 + $0xbc] sm:$0xff] }
  0x8a   : > { %7918 = vmatpush3.bf16.msra.mxu0 %v8722_v36  ;;  %v1897_v36 = vld [vmem:[%s9027_s12 + $0x3c] sm:$0xff] }
  0x8b   : > { %7919 = vmatprep.subr.bf16.mxu0 %v8723_v42  ;;  %7970 = vmatpush3.bf16.msra.mxu1 %v8729_v37  ;;  %v1597_v37 = vpack.c.bf16 %v1563_v31, %v1562_v30  ;;  %v1910_v30 = vld [vmem:[%s9027_s12 + $0xa4] sm:$0xff]  ;;  %v1911_v31 = vld [vmem:[%s9027_s12 + $0xac] sm:$0xff] }
  0x8c   : > { %7832 = vmatmul.mubr.bf16.gmra.mxu0 %v937_v35  ;;  %7971 = vmatprep.subr.bf16.mxu1 %v8730_v43  ;;  %v1896_v35 = vld [vmem:[%s9027_s12 + $0x34] sm:$0xff] }
  0x8d   : > { %7884 = vmatmul.mubr.bf16.gmra.mxu1 %v1269_v44  ;;  %7835 = vmatprep.mubr.bf16.mxu0 %v1269_v44  ;;  %v9287_v40 = vpack.c.bf16 %v1897_v36, %v1896_v35  ;;  %v1898_v44 = vld [vmem:[%s9027_s12 + $0x44] sm:$0xff]  ;;  %v9388_v35 = vld [vmem:[%s11624_s1 + $0x238] sm:$0xff]  }
  0x8e   : > { %7887 = vmatprep.mubr.bf16.mxu1 %v939_v45  ;;  %7920 = vmatpush3.bf16.msra.mxu0 %v8723_v42  ;;  %v1567_v42 = vld [vmem:[%s9027_s12 + $0x4b] sm:$0xff]  ;;  %v3342_v36 = vld [vmem:[%s11630_s7] sm:$0xff] }
  0x8f   : > { %7921 = vmatprep.subr.bf16.mxu0 %v8725_v46  ;;  %7972 = vmatpush3.bf16.msra.mxu1 %v8730_v43  ;;  %v8736_v43 = vld [vmem:[%s11624_s1 + $0x1b0] sm:$0xff]  }
  0x90   : > { %7973 = vmatprep.subr.bf16.mxu1 %v8731_v48 }
  0x92   : > { %7922 = vmatpush3.bf16.msra.mxu0 %v8725_v46  ;;  %v1568_v46 = vld [vmem:[%s9027_s12 + $0x53] sm:$0xff] }
  0x93   : > { %7923 = vmatprep.subr.bf16.mxu0 %v8728_v52  ;;  %7974 = vmatpush3.bf16.msra.mxu1 %v8731_v48  ;;  %v8737_v48 = vld [vmem:[%s11624_s1 + $0x1a8] sm:$0xff]  }
  0x94   : > { %7836 = vmatmul.mubr.bf16.gmra.mxu0 %v939_v45  ;;  %7975 = vmatprep.subr.bf16.mxu1 %v8733_v53  ;;  %v1899_v45 = vld [vmem:[%s9027_s12 + $0x4c] sm:$0xff] }
  0x95   : > { %7888 = vmatmul.mubr.bf16.gmra.mxu1 %v1271_v54  ;;  %7839 = vmatprep.mubr.bf16.mxu0 %v1271_v54  ;;  %v9313_v54 = vpack.c.bf16 %v1899_v45, %v1898_v44  ;;  %v3344_v44 = vld [vmem:[%s11630_s7 + $0x10] sm:$0xff]  ;;  %v3343_v45 = vld [vmem:[%s11630_s7 + $0x8] sm:$0xff] }
  0x96   : > { %7891 = vmatprep.mubr.bf16.mxu1 %v941_v55  ;;  %7924 = vmatpush3.bf16.msra.mxu0 %v8728_v52  ;;  %v8743_v52 = vld [vmem:[%s11624_s1 + $0x1e8] sm:$0xff]  }
  0x97   : > { %7925 = vmatprep.subr.bf16.mxu0 %v8732_v56  ;;  %7976 = vmatpush3.bf16.msra.mxu1 %v8733_v53  ;;  %v1599_v53 = vpack.c.bf16 %v1567_v42, %v1566_v41  ;;  %v9393_v41 = vpack.c.bf16 %v1911_v31, %v1910_v30  ;;  %v1606_v42 = vpack.c.bf16 %v1581_v33, %v1580_v32  ;;  %v1593_v30 = vld [vmem:[%s9027_s12 + $0x11b] sm:$0xff] }
  0x98   : > { %7977 = vmatprep.subr.bf16.mxu1 %v8734_v59  ;;  %v1924_v31 = vld [vmem:[%s9027_s12 + $0x114] sm:$0xff]  ;;  %v1925_v33 = vld [vmem:[%s9027_s12 + $0x11c] sm:$0xff] }
  0x9a   : > { %7926 = vmatpush3.bf16.msra.mxu0 %v8732_v56  ;;  %v9315_v56 = vpack.c.bf16 %v1901_v51, %v1900_v50  ;;  %v1584_v50 = vld [vmem:[%s9027_s12 + $0xd3] sm:$0xff]  ;;  %v1585_v51 = vld [vmem:[%s9027_s12 + $0xdb] sm:$0xff] }
  0x9b   : > { %7978 = vmatpush3.bf16.msra.mxu1 %v8734_v59  ;;  %8015 = vmatprep.subr.bf16.mxu0 %v9250_v62  ;;  %v8738_v59 = vld [vmem:[%s11624_s1 + $0x1a0] sm:$0xff]  }
  0x9c   : > { %7840 = vmatmul.mubr.bf16.gmra.mxu0 %v941_v55  ;;  %8067 = vmatprep.subr.bf16.mxu1 %v9255_v63  ;;  %v1600_v55 = vpack.c.bf16 %v1569_v47, %v1568_v46  ;;  %v1582_v46 = vld [vmem:[%s9027_s12 + $0xc3] sm:$0xff]  ;;  %v1583_v47 = vld [vmem:[%s9027_s12 + $0xcb] sm:$0xff] }
  0x9d   : > { %7892 = vmatmul.mubr.bf16.gmra.mxu1 %v1273_v0  ;;  %7843 = vmatprep.mubr.bf16.mxu0 %v1273_v0  ;;  %v8745_v0 = vld [vmem:[%s11624_s1 + $0x1e0] sm:$0xff]   ;;  %v1607_v58 = vpack.c.bf16 %v1583_v47, %v1582_v46 }
  0x9e   : > { %7895 = vmatprep.mubr.bf16.mxu1 %v943_v1 }
  0xa4   : > { %7844 = vmatmul.mubr.bf16.gmra.mxu0 %v943_v1  ;;  %v1904_v1 = vld [vmem:[%s9027_s12 + $0x74] sm:$0xff] }
  0xa5   : > { %7896 = vmatmul.mubr.bf16.gmra.mxu1 %v1275_v6  ;;  %7847 = vmatprep.mubr.bf16.mxu0 %v1275_v6  ;;  %v9339_v6 = vpack.c.bf16 %v1903_v61, %v1902_v60  ;;  %v9341_v8 = vpack.c.bf16 %v1905_v2, %v1904_v1  ;;  %v1608_v60 = vpack.c.bf16 %v1585_v51, %v1584_v50  ;;  %v1587_v1 = vld [vmem:[%s9027_s12 + $0xeb] sm:$0xff] }
  0xa6   : > { %7899 = vmatprep.mubr.bf16.mxu1 %v945_v7  ;;  %v1918_v2 = vld [vmem:[%s9027_s12 + $0xe4] sm:$0xff]  ;;  %v3356_v51 = vld [vmem:[%s11630_s7 + $0x70] sm:$0xff] }
  0xa7   : > { %v3355_v50 = vld [vmem:[%s11630_s7 + $0x68] sm:$0xff] }
  0xac   : > { %7848 = vmatmul.mubr.bf16.gmra.mxu0 %v945_v7 }
  0xad   : > { %7900 = vmatmul.mubr.bf16.gmra.mxu1 %v1277_v12  ;;  %7851 = vmatprep.mubr.bf16.mxu0 %v1277_v12  ;;  %v1575_v12 = vld [vmem:[%s9027_s12 + $0x8b] sm:$0xff] }
  0xae   : > { %7903 = vmatprep.mubr.bf16.mxu1 %v947_v13  ;;  %v1603_v20 = vpack.c.bf16 %v1575_v12, %v1574_v11  ;;  %v3350_v11 = vld [vmem:[%s11630_s7 + $0x40] sm:$0xff] }
  0xb4   : > { %7852 = vmatmul.mubr.bf16.gmra.mxu0 %v947_v13  ;;  %v1906_v13 = vld [vmem:[%s9027_s12 + $0x84] sm:$0xff] }
  0xb5   : > { %7904 = vmatmul.mubr.bf16.gmra.mxu1 %v1279_v18  ;;  %7855 = vmatprep.mubr.bf16.mxu0 %v1279_v18  ;;  %v1909_v18 = vld [vmem:[%s9027_s12 + $0x9c] sm:$0xff]  ;;  %v9365_v22 = vpack.c.bf16 %v1907_v14, %v1906_v13 }
  0xb6   : > { %7907 = vmatprep.mubr.bf16.mxu1 %v949_v19  ;;  %v9367_v24 = vpack.c.bf16 %v1909_v18, %v1908_v17  ;;  %v3352_v17 = vld [vmem:[%s11630_s7 + $0x50] sm:$0xff] }
  0xbc   : > { %7856 = vmatmul.mubr.bf16.gmra.mxu0 %v949_v19  ;;  %v8744_v19 = vld [vmem:[%s11624_s1 + $0x188] sm:$0xff]  }
  0xbd   : > { %7908 = vmatmul.mubr.bf16.gmra.mxu1 %v1281_v26  ;;  %7927 = vmatprep.mubr.bf16.mxu0 %v1596_v27  ;;  %v1578_v26 = vld [vmem:[%s9027_s12 + $0xa3] sm:$0xff] }
  0xbe   : > { %7979 = vmatprep.mubr.bf16.mxu1 %v1928_v28  ;;  %v8750_v27 = vld [vmem:[%s11624_s1 + $0x1c0] sm:$0xff]   ;;  %v1579_v28 = vld [vmem:[%s9027_s12 + $0xab] sm:$0xff] }
  0xc4   : > { %7928 = vmatmul.mubr.bf16.vlgmr.msra.gmra.mxu0 %v1597_v37  ;;  %v1605_v37 = vpack.c.bf16 %v1579_v28, %v1578_v26  ;;  %v1592_v28 = vld [vmem:[%s9027_s12 + $0x113] sm:$0xff] }
  0xc5   : > { %8016 = vmatpush3.bf16.msra.mxu0 %v9250_v62  ;;  %7980 = vmatmul.mubr.bf16.vlgmr.msra.gmra.mxu1 %v9285_v38  ;;  %v1572_v62 = vld [vmem:[%s9027_s12 + $0x73] sm:$0xff] }
  0xc6   : > { %7931 = vmatprep.mubr.bf16.mxu0 %v1598_v39  ;;  %7983 = vmatprep.mubr.bf16.mxu1 %v9287_v40  ;;  %v8893_v39 = vmov 0  }
  0xc7   : > { %8017 = vmatprep.subr.bf16.mxu0 %v8736_v43  ;;  %8068 = vmatpush3.bf16.msra.mxu1 %v9255_v63  ;;  %v1573_v63 = vld [vmem:[%s9027_s12 + $0x7b] sm:$0xff] }
  0xc8   : > { %8069 = vmatprep.subr.bf16.mxu1 %v8742_v49  ;;  %v1602_v7 = vpack.c.bf16 %v1573_v63, %v1572_v62  ;;  %8685 = vset.pattern.permute.xlu0 %v8893_v39  ;;  %v3347_v62 = vld [vmem:[%s11630_s7 + $0x28] sm:$0xff]  ;;  %v3348_v63 = vld [vmem:[%s11630_s7 + $0x30] sm:$0xff] }
  0xc9   : > { %8018 = vmatpush3.bf16.msra.mxu0 %v8736_v43  ;;  %3380 = vperm.xlu0 %8685, %v3342_v36   ;;  %v9395_v43 = vpack.c.bf16 %v1913_v34, %v1912_v29  ;;  %v3353_v29 = vld [vmem:[%s11630_s7 + $0x58] sm:$0xff]  ;;  %v3354_v34 = vld [vmem:[%s11630_s7 + $0x60] sm:$0xff] }
  0xca   : > { %8019 = vmatprep.subr.bf16.mxu0 %v8737_v48  ;;  %8686 = vset.pattern.permute.xlu1 %v8893_v39 }
  0xcb   : > { %8070 = vmatpush3.bf16.msra.mxu1 %v8742_v49  ;;  %3390 = vperm.xlu1 %8686, %v3344_v44   ;;  %v1915_v49 = vld [vmem:[%s9027_s12 + $0xcc] sm:$0xff] }
  0xcc   : > { %7932 = vmatmul.mubr.bf16.gmra.mxu0 %v1599_v53  ;;  %8071 = vmatprep.subr.bf16.mxu1 %v8743_v52  ;;  %v1917_v53 = vld [vmem:[%s9027_s12 + $0xdc] sm:$0xff] }
  0xcd   : > { %7984 = vmatmul.mubr.bf16.gmra.mxu1 %v9313_v54  ;;  %7935 = vmatprep.mubr.bf16.mxu0 %v1600_v55  ;;  %v3345_v55 = vld [vmem:[%s11630_s7 + $0x18] sm:$0xff] }
  0xce   : > { %7987 = vmatprep.mubr.bf16.mxu1 %v9315_v56  ;;  %8020 = vmatpush3.bf16.msra.mxu0 %v8737_v48  ;;  %v1914_v48 = vld [vmem:[%s9027_s12 + $0xc4] sm:$0xff] }
  0xcf   : > { %8021 = vmatprep.subr.bf16.mxu0 %v8738_v59  ;;  %8072 = vmatpush3.bf16.msra.mxu1 %v8743_v52  ;;  %v1916_v52 = vld [vmem:[%s9027_s12 + $0xd4] sm:$0xff] }
  0xd0   : > { %8073 = vmatprep.subr.bf16.mxu1 %v8745_v0  ;;  %3385 = vperm.xlu0 %8685, %v3343_v45   ;;  %v9422_v61 = vpack.c.bf16 %v1917_v53, %v1916_v52  ;;  %v1612_v45 = vpack.c.bf16 %v1593_v30, %v1592_v28  ;;  %v2558_v30 = vld [vmem:[%s9027_s12 + $0x35] sm:$0xff] }
  0xd1   : > { %3395 = vperm.xlu1 %8686, %v3345_v55  }
  0xd2   : > { %8022 = vmatpush3.bf16.msra.mxu0 %v8738_v59  ;;  %v9420_v59 = vpack.c.bf16 %v1915_v49, %v1914_v48  ;;  %v9480_v48 = vpack.c.bf16 %v1925_v33, %v1924_v31  ;;  %v2559_v31 = vld [vmem:[%s9027_s12 + $0x3d] sm:$0xff] }
  0xd3   : > { %8023 = vmatprep.subr.bf16.mxu0 %v8739_v3  ;;  %8074 = vmatpush3.bf16.msra.mxu1 %v8745_v0  ;;  %v1586_v0 = vld [vmem:[%s9027_s12 + $0xe3] sm:$0xff] }
  0xd4   : > { %7936 = vmatmul.mubr.bf16.gmra.mxu0 %v1601_v5  ;;  %8075 = vmatprep.subr.bf16.mxu1 %v8746_v4  ;;  %v1589_v5 = vld [vmem:[%s9027_s12 + $0xfb] sm:$0xff]  ;;  %v1609_v12 = vpack.c.bf16 %v1587_v1, %v1586_v0  ;;  %v1927_v0 = vld [vmem:[%s9027_s12 + $0x12c] sm:$0xff] }
  0xd5   : > { %7988 = vmatmul.mubr.bf16.gmra.mxu1 %v9339_v6  ;;  %7939 = vmatprep.mubr.bf16.mxu0 %v1602_v7  ;;  %v1920_v7 = vld [vmem:[%s9027_s12 + $0xf4] sm:$0xff]  ;;  %v2556_v1 = vld [vmem:[%s9027_s12 + $0x25] sm:$0xff] }
  0xd6   : > { %7991 = vmatprep.mubr.bf16.mxu1 %v9341_v8  ;;  %8024 = vmatpush3.bf16.msra.mxu0 %v8739_v3  ;;  %v1919_v3 = vld [vmem:[%s9027_s12 + $0xec] sm:$0xff] }
  0xd7   : > { %8025 = vmatprep.subr.bf16.mxu0 %v8741_v9  ;;  %8076 = vmatpush3.bf16.msra.mxu1 %v8746_v4  ;;  %v1588_v4 = vld [vmem:[%s9027_s12 + $0xf3] sm:$0xff]  ;;  %v9446_v13 = vpack.c.bf16 %v1919_v3, %v1918_v2 }
  0xd8   : > { %8077 = vmatprep.subr.bf16.mxu1 %v8747_v10  ;;  %3400 = vperm.xlu0 %8685, %v3346_v57   ;;  %v1610_v14 = vpack.c.bf16 %v1589_v5, %v1588_v4  ;;  %v1594_v57 = vld [vmem:[%s9027_s12 + $0x123] sm:$0xff]  ;;  %v2557_v3 = vld [vmem:[%s9027_s12 + $0x2d] sm:$0xff]  ;;  %v3357_v4 = vld [vmem:[%s11630_s7 + $0x78] sm:$0xff] }
  0xd9   : > { %3405 = vperm.xlu1 %8686, %v3347_v62   ;;  %v3358_v5 = vld [vmem:[%s11630_s7 + $0x80] sm:$0xff] }
  0xda   : > { %8026 = vmatpush3.bf16.msra.mxu0 %v8741_v9  ;;  %v1921_v9 = vld [vmem:[%s9027_s12 + $0xfc] sm:$0xff] }
  0xdb   : > { %8027 = vmatprep.subr.bf16.mxu0 %v8744_v19  ;;  %8078 = vmatpush3.bf16.msra.mxu1 %v8747_v10  ;;  %v3349_v10 = vld [vmem:[%s11630_s7 + $0x38] sm:$0xff]  ;;  %v9448_v15 = vpack.c.bf16 %v1921_v9, %v1920_v7 }
  0xdc   : > { %7940 = vmatmul.mubr.bf16.gmra.mxu0 %v1603_v20  ;;  %8079 = vmatprep.subr.bf16.mxu1 %v8749_v21 }
  0xdd   : > { %7992 = vmatmul.mubr.bf16.gmra.mxu1 %v9365_v22  ;;  %7943 = vmatprep.mubr.bf16.mxu0 %v1604_v23  ;;  %v1922_v23 = vld [vmem:[%s9027_s12 + $0x104] sm:$0xff] }
  0xde   : > { %7995 = vmatprep.mubr.bf16.mxu1 %v9367_v24  ;;  %8028 = vmatpush3.bf16.msra.mxu0 %v8744_v19  ;;  %v1590_v19 = vld [vmem:[%s9027_s12 + $0x103] sm:$0xff] }
  0xdf   : > { %8029 = vmatprep.subr.bf16.mxu0 %v8748_v25  ;;  %8080 = vmatpush3.bf16.msra.mxu1 %v8749_v21  ;;  %v1591_v21 = vld [vmem:[%s9027_s12 + $0x10b] sm:$0xff] }
  0xe0   : > { %8081 = vmatprep.subr.bf16.mxu1 %v8750_v27  ;;  %3410 = vperm.xlu0 %8685, %v3348_v63   ;;  %v1611_v39 = vpack.c.bf16 %v1591_v21, %v1590_v19  ;;  %v1926_v63 = vld [vmem:[%s9027_s12 + $0x124] sm:$0xff] }
  0xe1   : > { %3415 = vperm.xlu1 %8686, %v3349_v10   ;;  %v3359_v19 = vld [vmem:[%s11630_s7 + $0x88] sm:$0xff] }
  0xe2   : > { %8030 = vmatpush3.bf16.msra.mxu0 %v8748_v25  ;;  %v1923_v25 = vld [vmem:[%s9027_s12 + $0x10c] sm:$0xff] }
  0xe3   : > { %8082 = vmatpush3.bf16.msra.mxu1 %v8750_v27  ;;  %8119 = vmatprep.subr.bf16.mxu0 %v9388_v35  ;;  %v9476_v44 = vpack.c.bf16 %v1923_v25, %v1922_v23 }
  0xe4   : > { %7944 = vmatmul.mubr.bf16.gmra.mxu0 %v1605_v37  ;;  %3420 = vperm.xlu0 %8685, %v3350_v11  }
  0xe5   : > { %7996 = vmatmul.mubr.bf16.gmra.mxu1 %v9393_v41  ;;  %7947 = vmatprep.mubr.bf16.mxu0 %v1606_v42 }
  0xe6   : > { %7999 = vmatprep.mubr.bf16.mxu1 %v9395_v43  ;;  %3425 = vperm.xlu1 %8686, %v3351_v16  }
  0xe8   : > { %3430 = vperm.xlu0 %8685, %v3352_v17   ;;  %v2592_v17 = vpack.c.bf16 %v2557_v3, %v2556_v1  ;;  %v2563_v3 = vld [vmem:[%s9027_s12 + $0x5d] sm:$0xff] }
  0xea   : > { %3435 = vperm.xlu1 %8686, %v3353_v29   ;;  %v2561_v29 = vld [vmem:[%s9027_s12 + $0x4d] sm:$0xff] }
  0xec   : > { %7948 = vmatmul.mubr.bf16.gmra.mxu0 %v1607_v58  ;;  %3440 = vperm.xlu0 %8685, %v3354_v34   ;;  %v1595_v58 = vld [vmem:[%s9027_s12 + $0x12b] sm:$0xff]  ;;  %v3361_v34 = vld [vmem:[%s11630_s7 + $0x98] sm:$0xff] }
  0xed   : > { %8000 = vmatmul.mubr.bf16.gmra.mxu1 %v9420_v59  ;;  %7951 = vmatprep.mubr.bf16.mxu0 %v1608_v60  ;;  %v1613_v10 = vpack.c.bf16 %v1595_v58, %v1594_v57 }
  0xee   : > { %8003 = vmatprep.mubr.bf16.mxu1 %v9422_v61  ;;  %3445 = vperm.xlu1 %8686, %v3355_v50  }
  0xf0   : > { %3450 = vperm.xlu0 %8685, %v3356_v51  }
  0xf2   : > { %3455 = vperm.xlu1 %8686, %v3357_v4  }
  0xf4   : > { %v7721_v18 = vpop.f32.mrf.mxu0  ;;  %7952 = vmatmul.mubr.bf16.gmra.mxu0 %v1609_v12  ;;  %v9508_v12 = vpack.c.bf16 %v1927_v0, %v1926_v63  ;;  %3460 = vperm.xlu0 %8685, %v3358_v5   ;;  %v2564_v5 = vld [vmem:[%s9027_s12 + $0x65] sm:$0xff] }
  0xf5   : > { %v7773_v20 = vpop.f32.mrf.mxu1  ;;  %8004 = vmatmul.mubr.bf16.gmra.mxu1 %v9446_v13  ;;  %7955 = vmatprep.mubr.bf16.mxu0 %v1610_v14 }
  0xf6   : > { %v9461_v26 = vadd.f32 %v7773_v20, %v7721_v18  ;;  %v528_v27 = vpop.f32.mrf.mxu0  ;;  %8007 = vmatprep.mubr.bf16.mxu1 %v9448_v15  ;;  %v3360_v20 = vld [vmem:[%s11630_s7 + $0x90] sm:$0xff]  ;;  %3465 = vperm.xlu1 %8686, %v3359_v19  }
  0xf7   : > { %v753_v32 = vpop.f32.mrf.mxu1 }
  0xf8   : > { %v9474_v36 = vadd.f32 %v753_v32, %v528_v27  ;;  %v7722_v37 = vpop.f32.mrf.mxu0  ;;  %v2560_v32 = vld [vmem:[%s9027_s12 + $0x45] sm:$0xff]  ;;  %3470 = vperm.xlu0 %8685, %v3360_v20  }
  0xf9   : > { %v7774_v42 = vpop.f32.mrf.mxu1  ;;  %v2594_v50 = vpack.c.bf16 %v2561_v29, %v2560_v32  ;;  %v3368_v32 = vld [vmem:[%s11630_s7 + $0xd0] sm:$0xff] }
  0xfa   : > { %v9478_v46 = vadd.f32 %v7774_v42, %v7722_v37  ;;  %v531_v47 = vpop.f32.mrf.mxu0  ;;  %v3362_v37 = vld [vmem:[%s11630_s7 + $0xa0] sm:$0xff]  ;;  %3475 = vperm.xlu1 %8686, %v3361_v34  }
  0xfb   : > { %v756_v49 = vpop.f32.mrf.mxu1 }
  0xfc   : > { %v9488_v52 = vadd.f32 %v756_v49, %v531_v47  ;;  %v7725_v53 = vpop.f32.mrf.mxu0  ;;  %7956 = vmatmul.mubr.bf16.gmra.mxu0 %v1611_v39  ;;  %3480 = vperm.xlu0 %8685, %v3362_v37   ;;  %v2566_v37 = vld [vmem:[%s9027_s12 + $0x75] sm:$0xff] }
  0xfd   : > { %v7777_v55 = vpop.f32.mrf.mxu1  ;;  %8008 = vmatmul.mubr.bf16.gmra.mxu1 %v9476_v44  ;;  %7959 = vmatprep.mubr.bf16.mxu0 %v1612_v45  ;;  %v2593_v45 = vpack.c.bf16 %v2559_v31, %v2558_v30 }
  0xfe   : > { %v9493_v60 = vadd.f32 %v7777_v55, %v7725_v53  ;;  %v544_v62 = vpop.f32.mrf.mxu0  ;;  %8011 = vmatprep.mubr.bf16.mxu1 %v9480_v48  ;;  %v8752_v53 = vld [vmem:[%s11624_s1 + $0x230] sm:$0xff]   ;;  %v3363_v55 = vld [vmem:[%s11630_s7 + $0xa8] sm:$0xff] }
  0xff   : > { %v769_v2 = vpop.f32.mrf.mxu1  ;;  %3485 = vperm.xlu1 %8686, %v3363_v55  }
 0x100   : > { %v9506_v7 = vadd.f32 %v769_v2, %v544_v62  ;;  %v7726_v9 = vpop.f32.mrf.mxu0  ;;  %v3364_v62 = vld [vmem:[%s11630_s7 + $0xb0] sm:$0xff] }
 0x101   : > { %v7778_v11 = vpop.f32.mrf.mxu1  ;;  %v2562_v2 = vld [vmem:[%s9027_s12 + $0x55] sm:$0xff]  ;;  %3490 = vperm.xlu0 %8685, %v3364_v62  }
 0x102   : > { %v9510_v14 = vadd.f32 %v7778_v11, %v7726_v9  ;;  %v547_v16 = vpop.f32.mrf.mxu0  ;;  %v2565_v9 = vld [vmem:[%s9027_s12 + $0x6d] sm:$0xff] }
 0x103   : > { %v772_v18 = vpop.f32.mrf.mxu1  ;;  %v2596_v20 = vpack.c.bf16 %v2565_v9, %v2564_v5  ;;  %v3372_v9 = vld [vmem:[%s11630_s7 + $0xf0] sm:$0xff] }
 0x104   : > { %v9518_v21 = vadd.f32 %v772_v18, %v547_v16  ;;  %v7729_v23 = vpop.f32.mrf.mxu0  ;;  %7960 = vmatmul.mubr.bf16.gmra.mxu0 %v1613_v10 }
 0x105   : > { %v7781_v25 = vpop.f32.mrf.mxu1  ;;  %8012 = vmatmul.mubr.bf16.gmra.mxu1 %v9508_v12  ;;  %8031 = vmatprep.mubr.bf16.mxu0 %v9285_v38 }
 0x106   : > { %v9522_v27 = vadd.f32 %v7781_v25, %v7729_v23  ;;  %v560_v28 = vpop.f32.mrf.mxu0  ;;  %8083 = vmatprep.mubr.bf16.mxu1 %v2592_v17  ;;  %v2595_v17 = vpack.c.bf16 %v2563_v3, %v2562_v2  ;;  %v8754_v25 = vld [vmem:[%s11624_s1 + $0x220] sm:$0xff]   ;;  %v8756_v3 = vld [vmem:[%s11624_s1 + $0x210] sm:$0xff]  }
 0x107   : > { %v785_v33 = vpop.f32.mrf.mxu1 }
 0x108   : > { %v9534_v39 = vadd.f32 %v785_v33, %v560_v28  ;;  %v7730_v38 = vpop.f32.mrf.mxu0  ;;  %v3367_v28 = vld [vmem:[%s11630_s7 + $0xc8] sm:$0xff] }
 0x109   : > { %v7782_v42 = vpop.f32.mrf.mxu1 }
 0x10a   : > { %v9536_v47 = vadd.f32 %v7782_v42, %v7730_v38  ;;  %v563_v49 = vpop.f32.mrf.mxu0  ;;  %v2567_v38 = vld [vmem:[%s9027_s12 + $0x7d] sm:$0xff]  ;;  %v2568_v42 = vld [vmem:[%s9027_s12 + $0x85] sm:$0xff] }
 0x10b   : > { %v788_v51 = vpop.f32.mrf.mxu1 }
 0x10c   : > { %v9544_v57 = vadd.f32 %v788_v51, %v563_v49  ;;  %v7733_v58 = vpop.f32.mrf.mxu0  ;;  %8032 = vmatmul.mubr.bf16.vlgmr.msra.gmra.mxu0 %v9287_v40  ;;  %v8753_v40 = vld [vmem:[%s11624_s1 + $0x228] sm:$0xff]  }
 0x10d   : > { %v7785_v63 = vpop.f32.mrf.mxu1  ;;  %8120 = vmatpush3.bf16.msra.mxu0 %v9388_v35  ;;  %8084 = vmatmul.mubr.bf16.vlgmr.msra.gmra.mxu1 %v2593_v45  ;;  %v3365_v35 = vld [vmem:[%s11630_s7 + $0xb8] sm:$0xff]  ;;  %v2569_v49 = vld [vmem:[%s9027_s12 + $0x8d] sm:$0xff] }
 0x10e   : > { %v9551_v0 = vadd.f32 %v7785_v63, %v7733_v58  ;;  %v576_v1 = vpop.f32.mrf.mxu0  ;;  %8035 = vmatprep.mubr.bf16.mxu0 %v9313_v54  ;;  %8087 = vmatprep.mubr.bf16.mxu1 %v2594_v50  ;;  %v3366_v54 = vld [vmem:[%s11630_s7 + $0xc0] sm:$0xff]  ;;  %v2597_v58 = vpack.c.bf16 %v2567_v38, %v2566_v37 }
 0x10f   : > { %v801_v4 = vpop.f32.mrf.mxu1  ;;  %8121 = vmatprep.subr.bf16.mxu0 %v8752_v53  ;;  %3495 = vperm.xlu1 %8686, %v3365_v35  }
 0x110   : > { %v9564_v10 = vadd.f32 %v801_v4, %v576_v1  ;;  %v7734_v11 = vpop.f32.mrf.mxu0  ;;  %3500 = vperm.xlu0 %8685, %v3366_v54   ;;  %v2598_v1 = vpack.c.bf16 %v2569_v49, %v2568_v42  ;;  %v3375_v49 = vld [vmem:[%s11630_s7 + $0x108] sm:$0xff] }
 0x111   : > { %v7786_v16 = vpop.f32.mrf.mxu1  ;;  %8122 = vmatpush3.bf16.msra.mxu0 %v8752_v53  ;;  %v3370_v53 = vld [vmem:[%s11630_s7 + $0xe0] sm:$0xff] }
 0x112   : > { %v9569_v18 = vadd.f32 %v7786_v16, %v7734_v11  ;;  %v579_v19 = vpop.f32.mrf.mxu0  ;;  %8123 = vmatprep.subr.bf16.mxu0 %v8753_v40  ;;  %v2570_v16 = vld [vmem:[%s9027_s12 + $0x95] sm:$0xff] }
 0x113   : > { %v804_v23 = vpop.f32.mrf.mxu1  ;;  %3505 = vperm.xlu1 %8686, %v3367_v28  }
 0x114   : > { %v9577_v30 = vadd.f32 %v804_v23, %v579_v19  ;;  %v7737_v31 = vpop.f32.mrf.mxu0  ;;  %8036 = vmatmul.mubr.bf16.gmra.mxu0 %v9315_v56  ;;  %v8755_v56 = vld [vmem:[%s11624_s1 + $0x218] sm:$0xff]   ;;  %3510 = vperm.xlu0 %8685, %v3368_v32   ;;  %v2572_v19 = vld [vmem:[%s9027_s12 + $0xa5] sm:$0xff]  ;;  %v2573_v23 = vld [vmem:[%s9027_s12 + $0xad] sm:$0xff] }
 0x115   : > { %v7789_v33 = vpop.f32.mrf.mxu1  ;;  %8088 = vmatmul.mubr.bf16.gmra.mxu1 %v2595_v17  ;;  %8039 = vmatprep.mubr.bf16.mxu0 %v9339_v6  ;;  %v3369_v6 = vld [vmem:[%s11630_s7 + $0xd8] sm:$0xff]  ;;  %v2600_v38 = vpack.c.bf16 %v2573_v23, %v2572_v19 }
 0x116   : > { %v9584_v29 = vadd.f32 %v7789_v33, %v7737_v31  ;;  %v592_v34 = vpop.f32.mrf.mxu0  ;;  %8091 = vmatprep.mubr.bf16.mxu1 %v2596_v20  ;;  %8124 = vmatpush3.bf16.msra.mxu0 %v8753_v40  ;;  %v3371_v40 = vld [vmem:[%s11630_s7 + $0xe8] sm:$0xff]  ;;  %v2571_v17 = vld [vmem:[%s9027_s12 + $0x9d] sm:$0xff] }
 0x117   : > { %v817_v45 = vpop.f32.mrf.mxu1  ;;  %8125 = vmatprep.subr.bf16.mxu0 %v8754_v25  ;;  %3515 = vperm.xlu1 %8686, %v3369_v6   ;;  %v3374_v31 = vld [vmem:[%s11630_s7 + $0x100] sm:$0xff]  ;;  %v2599_v33 = vpack.c.bf16 %v2571_v17, %v2570_v16 }
 0x118   : > { %v9596_v50 = vadd.f32 %v817_v45, %v592_v34  ;;  %v7738_v51 = vpop.f32.mrf.mxu0  ;;  %3520 = vperm.xlu0 %8685, %v3370_v53   ;;  %v8758_v45 = vld [vmem:[%s11624_s1 + $0x200] sm:$0xff]  }
 0x119   : > { %v7790_v55 = vpop.f32.mrf.mxu1 }
 0x11a   : > { %v9601_v62 = vadd.f32 %v7790_v55, %v7738_v51  ;;  %v595_v63 = vpop.f32.mrf.mxu0  ;;  %8126 = vmatpush3.bf16.msra.mxu0 %v8754_v25  ;;  %v3376_v51 = vld [vmem:[%s11630_s7 + $0x110] sm:$0xff] }
 0x11b   : > { %v820_v2 = vpop.f32.mrf.mxu1  ;;  %8127 = vmatprep.subr.bf16.mxu0 %v8755_v56  ;;  %3525 = vperm.xlu1 %8686, %v3371_v40   ;;  %v2577_v40 = vld [vmem:[%s9027_s12 + $0xcd] sm:$0xff] }
 0x11c   : > { %v9609_v4 = vadd.f32 %v820_v2, %v595_v63  ;;  %v7741_v5 = vpop.f32.mrf.mxu0  ;;  %8040 = vmatmul.mubr.bf16.gmra.mxu0 %v9341_v8  ;;  %v8757_v8 = vld [vmem:[%s11624_s1 + $0x208] sm:$0xff]   ;;  %3530 = vperm.xlu0 %8685, %v3372_v9   ;;  %v2574_v63 = vld [vmem:[%s9027_s12 + $0xb5] sm:$0xff] }
 0x11d   : > { %v7793_v35 = vpop.f32.mrf.mxu1  ;;  %8092 = vmatmul.mubr.bf16.gmra.mxu1 %v2597_v58  ;;  %8043 = vmatprep.mubr.bf16.mxu0 %v9365_v22  ;;  %v3373_v22 = vld [vmem:[%s11630_s7 + $0xf8] sm:$0xff] }
 0x11e   : > { %v9616_v11 = vadd.f32 %v7793_v35, %v7741_v5  ;;  %v608_v54 = vpop.f32.mrf.mxu0  ;;  %8095 = vmatprep.mubr.bf16.mxu1 %v2598_v1  ;;  %8128 = vmatpush3.bf16.msra.mxu0 %v8755_v56  ;;  %v2575_v1 = vld [vmem:[%s9027_s12 + $0xbd] sm:$0xff] }
 0x11f   : > { %v833_v20 = vpop.f32.mrf.mxu1  ;;  %8129 = vmatprep.subr.bf16.mxu0 %v8756_v3  ;;  %3535 = vperm.xlu1 %8686, %v3373_v22   ;;  %v2601_v35 = vpack.c.bf16 %v2575_v1, %v2574_v63 }
 0x120   : > { %v9628_v25 = vadd.f32 %v833_v20, %v608_v54  ;;  %v7742_v28 = vpop.f32.mrf.mxu0  ;;  %3540 = vperm.xlu0 %8685, %v3374_v31   ;;  %v2578_v31 = vld [vmem:[%s9027_s12 + $0xd5] sm:$0xff] }
 0x121   : > { %v7794_v32 = vpop.f32.mrf.mxu1 }
 0x122   : > { %v9633_v34 = vadd.f32 %v7794_v32, %v7742_v28  ;;  %v611_v37 = vpop.f32.mrf.mxu0  ;;  %8130 = vmatpush3.bf16.msra.mxu0 %v8756_v3  ;;  %v2576_v3 = vld [vmem:[%s9027_s12 + $0xc5] sm:$0xff]  ;;  %v2579_v32 = vld [vmem:[%s9027_s12 + $0xdd] sm:$0xff] }
 0x123   : > { %v836_v42 = vpop.f32.mrf.mxu1  ;;  %8131 = vmatprep.subr.bf16.mxu0 %v8757_v8  ;;  %3545 = vperm.xlu1 %8686, %v3375_v49   ;;  %v2602_v17 = vpack.c.bf16 %v2577_v40, %v2576_v3  ;;  %v2582_v40 = vld [vmem:[%s9027_s12 + $0xf5] sm:$0xff] }
 0x124   : > { %v9641_v56 = vadd.f32 %v836_v42, %v611_v37  ;;  %v7745_v6 = vpop.f32.mrf.mxu0  ;;  %8044 = vmatmul.mubr.bf16.gmra.mxu0 %v9367_v24  ;;  %3550 = vperm.xlu0 %8685, %v3376_v51   ;;  %v3377_v24 = vld [vmem:[%s11630_s7 + $0x118] sm:$0xff]  ;;  %v2580_v37 = vld [vmem:[%s9027_s12 + $0xe5] sm:$0xff] }
 0x125   : > { %v7797_v53 = vpop.f32.mrf.mxu1  ;;  %8096 = vmatmul.mubr.bf16.gmra.mxu1 %v2599_v33  ;;  %8047 = vmatprep.mubr.bf16.mxu0 %v9393_v41 }
 0x126   : > { %v9648_v55 = vadd.f32 %v7797_v53, %v7745_v6  ;;  %v624_v58 = vpop.f32.mrf.mxu0  ;;  %8099 = vmatprep.mubr.bf16.mxu1 %v2600_v38  ;;  %8132 = vmatpush3.bf16.msra.mxu0 %v8757_v8  ;;  %v2581_v38 = vld [vmem:[%s9027_s12 + $0xed] sm:$0xff] }
 0x127   : > { %v849_v2 = vpop.f32.mrf.mxu1  ;;  %8133 = vmatprep.subr.bf16.mxu0 %v8758_v45  ;;  %3555 = vperm.xlu1 %8686, %v3377_v24   ;;  %v2604_v51 = vpack.c.bf16 %v2581_v38, %v2580_v37  ;;  %v2583_v24 = vld [vmem:[%s9027_s12 + $0xfd] sm:$0xff]  ;;  %v2586_v38 = vld [vmem:[%s9027_s12 + $0x115] sm:$0xff] }
 0x128   : > { %v9657_v5 = vadd.f32 %v849_v2, %v624_v58  ;;  %v7746_v9 = vpop.f32.mrf.mxu0 }
 0x129   : > { %v7798_v41 = vpop.f32.mrf.mxu1 }
 0x12a   : > { %v9659_v54 = vadd.f32 %v7798_v41, %v7746_v9  ;;  %v627_v16 = vpop.f32.mrf.mxu0  ;;  %8134 = vmatpush3.bf16.msra.mxu0 %v8758_v45  ;;  %v2584_v41 = vld [vmem:[%s9027_s12 + $0x105] sm:$0xff] }
 0x12b   : > { %v852_v19 = vpop.f32.mrf.mxu1 }
 0x12c   : > { %v9661_v20 = vadd.f32 %v852_v19, %v627_v16  ;;  %v7749_v23 = vpop.f32.mrf.mxu0  ;;  %8048 = vmatmul.mubr.bf16.gmra.mxu0 %v9395_v43  ;;  %v2603_v43 = vpack.c.bf16 %v2579_v32, %v2578_v31 }
 0x12d   : > { %v7801_v8 = vpop.f32.mrf.mxu1  ;;  %8100 = vmatmul.mubr.bf16.gmra.mxu1 %v2601_v35  ;;  %8051 = vmatprep.mubr.bf16.mxu0 %v9420_v59  ;;  %v2585_v35 = vld [vmem:[%s9027_s12 + $0x10d] sm:$0xff] }
 0x12e   : > { %v9665_v22 = vadd.f32 %v7801_v8, %v7749_v23  ;;  %v640_v28 = vpop.f32.mrf.mxu0  ;;  %8103 = vmatprep.mubr.bf16.mxu1 %v2602_v17 }
 0x12f   : > { %v865_v33 = vpop.f32.mrf.mxu1 }
 0x130   : > { %v9671_v42 = vadd.f32 %v865_v33, %v640_v28  ;;  %v7750_v45 = vpop.f32.mrf.mxu0 }
 0x131   : > { %v7802_v49 = vpop.f32.mrf.mxu1 }
 0x132   : > { %v9673_v6 = vadd.f32 %v7802_v49, %v7750_v45  ;;  %v643_v59 = vpop.f32.mrf.mxu0  ;;  %v2587_v45 = vld [vmem:[%s9027_s12 + $0x11d] sm:$0xff] }
 0x133   : > { %v868_v53 = vpop.f32.mrf.mxu1 }
 0x134   : > { %v9675_v58 = vadd.f32 %v868_v53, %v643_v59  ;;  %v7753_v63 = vpop.f32.mrf.mxu0  ;;  %8052 = vmatmul.mubr.bf16.gmra.mxu0 %v9422_v61  ;;  %v2605_v61 = vpack.c.bf16 %v2583_v24, %v2582_v40  ;;  %v2589_v53 = vld [vmem:[%s9027_s12 + $0x12d] sm:$0xff] }
 0x135   : > { %v7805_v1 = vpop.f32.mrf.mxu1  ;;  %8104 = vmatmul.mubr.bf16.gmra.mxu1 %v2603_v43  ;;  %8055 = vmatprep.mubr.bf16.mxu0 %v9446_v13  ;;  %v2606_v13 = vpack.c.bf16 %v2585_v35, %v2584_v41 }
 0x136   : > { %v9679_v2 = vadd.f32 %v7805_v1, %v7753_v63  ;;  %v656_v3 = vpop.f32.mrf.mxu0  ;;  %8107 = vmatprep.mubr.bf16.mxu1 %v2604_v51  ;;  %v2588_v51 = vld [vmem:[%s9027_s12 + $0x125] sm:$0xff]  ;;  %v2607_v1 = vpack.c.bf16 %v2587_v45, %v2586_v38 }
 0x137   : > { %v881_v9 = vpop.f32.mrf.mxu1  ;;  %v2608_v40 = vpack.c.bf16 %v2589_v53, %v2588_v51 }
 0x138   : > { %v9685_v16 = vadd.f32 %v881_v9, %v656_v3  ;;  %v7754_v17 = vpop.f32.mrf.mxu0 }
 0x139   : > { %v7806_v19 = vpop.f32.mrf.mxu1 }
 0x13a   : > { %v9687_v23 = vadd.f32 %v7806_v19, %v7754_v17  ;;  %v9689_v8 = vpop.f32.mrf.mxu0  ;;  %v2258_v17 = vld [vmem:[%s9027_s12 + $0x134] sm:$0xff]  ;;  %v2259_v19 = vld [vmem:[%s9027_s12 + $0x13c] sm:$0xff] }
 0x13b   : > { %v9691_v28 = vpop.f32.mrf.mxu1  ;;  %v2277_v45 = vpack.c.bf16 %v2259_v19, %v2258_v17 }
 0x13c   : > { %v7825_v31 = vpop.f32.mrf.mxu0  ;;  %8056 = vmatmul.mubr.bf16.gmra.mxu0 %v9448_v15 }
 0x13d   : > { %v1194_v32 = vadd.f32 %v7825_v31, %v9461_v26  ;;  %v7877_v33 = vpop.f32.mrf.mxu1  ;;  %8108 = vmatmul.mubr.bf16.gmra.mxu1 %v2605_v61  ;;  %8059 = vmatprep.mubr.bf16.mxu0 %v9476_v44  ;;  %v2590_v61 = vld [vmem:[%s9027_s12 + $0x135] sm:$0xff]  ;;  %v2888_v31 = vld [vmem:[%s9027_s12 + $0x26] sm:$0xff] }
 0x13e   : > { %v1049_v37 = vpop.f32.mrf.mxu0  ;;  %8111 = vmatprep.mubr.bf16.mxu1 %v2606_v13 }
 0x13f   : > { %v1192_v49 = vadd.f32 %v1049_v37, %v9474_v36  ;;  %v9699_v43 = vadd.f32 %v7877_v33, %v1194_v32  ;;  %v1381_v59 = vpop.f32.mrf.mxu1  ;;  %v2889_v32 = vld [vmem:[%s9027_s12 + $0x2e] sm:$0xff] }
 0x140   : > { %v7826_v63 = vpop.f32.mrf.mxu0  ;;  %v2924_v51 = vpack.c.bf16 %v2889_v32, %v2888_v31 }
 0x141   : > { %v1195_v15 = vadd.f32 %v7826_v63, %v9478_v46  ;;  %v9704_v26 = vadd.f32 %v1381_v59, %v1192_v49  ;;  %v7878_v44 = vpop.f32.mrf.mxu1 }
 0x142   : > { %v1052_v3 = vpop.f32.mrf.mxu0 }
 0x143   : > { %v9707_v36 = vadd.f32 %v1052_v3, %v9488_v52  ;;  %v9709_v24 = vadd.f32 %v7878_v44, %v1195_v15  ;;  %v9711_v9 = vpop.f32.mrf.mxu1  ;;  %v2591_v52 = vld [vmem:[%s9027_s12 + $0x13d] sm:$0xff] }
 0x144   : > { %v7829_v41 = vpop.f32.mrf.mxu0  ;;  %8060 = vmatmul.mubr.bf16.gmra.mxu0 %v9480_v48  ;;  %v2609_v59 = vpack.c.bf16 %v2591_v52, %v2590_v61  ;;  %v2890_v3 = vld [vmem:[%s9027_s12 + $0x36] sm:$0xff] }
 0x145   : > { %v1198_v46 = vadd.f32 %v7829_v41, %v9493_v60  ;;  %v7881_v35 = vpop.f32.mrf.mxu1  ;;  %8112 = vmatmul.mubr.bf16.gmra.mxu1 %v2607_v1  ;;  %8063 = vmatprep.mubr.bf16.mxu0 %v9508_v12 }
 0x146   : > { %v1065_v13 = vpop.f32.mrf.mxu0  ;;  %8115 = vmatprep.mubr.bf16.mxu1 %v2608_v40  ;;  %v2891_v40 = vld [vmem:[%s9027_s12 + $0x3e] sm:$0xff] }
 0x147   : > { %v1196_v33 = vadd.f32 %v1065_v13, %v9506_v7  ;;  %v9723_v37 = vadd.f32 %v7881_v35, %v1198_v46  ;;  %v1397_v38 = vpop.f32.mrf.mxu1  ;;  %v2892_v46 = vld [vmem:[%s9027_s12 + $0x46] sm:$0xff]  ;;  %v2893_v35 = vld [vmem:[%s9027_s12 + $0x4e] sm:$0xff]  ;;  %v2925_v13 = vpack.c.bf16 %v2891_v40, %v2890_v3 }
 0x148   : > { %v7830_v48 = vpop.f32.mrf.mxu0  ;;  %v2926_v32 = vpack.c.bf16 %v2893_v35, %v2892_v46 }
 0x149   : > { %v1199_v60 = vadd.f32 %v7830_v48, %v9510_v14  ;;  %v9726_v12 = vadd.f32 %v1397_v38, %v1196_v33  ;;  %v7882_v49 = vpop.f32.mrf.mxu1 }
 0x14a   : > { %v1068_v53 = vpop.f32.mrf.mxu0 }
 0x14b   : > { %v9729_v63 = vadd.f32 %v1068_v53, %v9518_v21  ;;  %v9731_v7 = vadd.f32 %v7882_v49, %v1199_v60  ;;  %v9733_v15 = vpop.f32.mrf.mxu1  ;;  %v2896_v53 = vld [vmem:[%s9027_s12 + $0x66] sm:$0xff] }
 0x14c   : > { %v7833_v44 = vpop.f32.mrf.mxu0  ;;  %8064 = vmatmul.mubr.bf16.gmra.mxu0 %v2277_v45 }
 0x14d   : > { %v1202_v14 = vadd.f32 %v7833_v44, %v9522_v27  ;;  %v7885_v1 = vpop.f32.mrf.mxu1  ;;  %8116 = vmatmul.mubr.bf16.gmra.mxu1 %v2609_v59  ;;  %8135 = vmatprep.mubr.bf16.mxu0 %v2924_v51  ;;  %v2895_v59 = vld [vmem:[%s9027_s12 + $0x5e] sm:$0xff]  ;;  %v2897_v44 = vld [vmem:[%s9027_s12 + $0x6e] sm:$0xff] }
 0x14e   : > { %v1081_v41 = vpop.f32.mrf.mxu0  ;;  %v2928_v35 = vpack.c.bf16 %v2897_v44, %v2896_v53 }
 0x14f   : > { %v1200_v17 = vadd.f32 %v1081_v41, %v9534_v39  ;;  %v9741_v21 = vadd.f32 %v7885_v1, %v1202_v14  ;;  %v1413_v19 = vpop.f32.mrf.mxu1 }
 0x150   : > { %v7834_v61 = vpop.f32.mrf.mxu0 }
 0x151   : > { %v1203_v52 = vadd.f32 %v7834_v61, %v9536_v47  ;;  %v9744_v27 = vadd.f32 %v1413_v19, %v1200_v17  ;;  %v7886_v31 = vpop.f32.mrf.mxu1  ;;  %v2894_v47 = vld [vmem:[%s9027_s12 + $0x56] sm:$0xff] }
 0x152   : > { %v1084_v33 = vpop.f32.mrf.mxu0  ;;  %v2927_v40 = vpack.c.bf16 %v2895_v59, %v2894_v47 }
 0x153   : > { %v9747_v38 = vadd.f32 %v1084_v33, %v9544_v57  ;;  %v9749_v39 = vadd.f32 %v7886_v31, %v1203_v52  ;;  %v9751_v48 = vpop.f32.mrf.mxu1 }
 0x154   : > { %v7837_v45 = vpop.f32.mrf.mxu0  ;;  %8136 = vmatmul.mubr.bf16.vlgmr.msra.gmra.mxu0 %v2925_v13 }
 0x155   : > { %v1206_v60 = vadd.f32 %v7837_v45, %v9551_v0  ;;  %v7889_v49 = vpop.f32.mrf.mxu1  ;;  %8139 = vmatprep.mubr.bf16.mxu0 %v2926_v32  ;;  %v2899_v32 = vld [vmem:[%s9027_s12 + $0x7e] sm:$0xff]  ;;  %v2900_v45 = vld [vmem:[%s9027_s12 + $0x86] sm:$0xff] }
 0x156   : > { %v1097_v51 = vpop.f32.mrf.mxu0 }
 0x157   : > { %v1204_v14 = vadd.f32 %v1097_v51, %v9564_v10  ;;  %v9759_v1 = vadd.f32 %v7889_v49, %v1206_v60  ;;  %v1429_v57 = vpop.f32.mrf.mxu1  ;;  %v2901_v60 = vld [vmem:[%s9027_s12 + $0x8e] sm:$0xff] }
 0x158   : > { %v7838_v3 = vpop.f32.mrf.mxu0 }
 0x159   : > { %v1207_v41 = vadd.f32 %v7838_v3, %v9569_v18  ;;  %v9762_v0 = vadd.f32 %v1429_v57, %v1204_v14  ;;  %v7890_v46 = vpop.f32.mrf.mxu1  ;;  %v2898_v18 = vld [vmem:[%s9027_s12 + $0x76] sm:$0xff]  ;;  %v2930_v14 = vpack.c.bf16 %v2901_v60, %v2900_v45 }
 0x15a   : > { %v1100_v17 = vpop.f32.mrf.mxu0  ;;  %v2929_v51 = vpack.c.bf16 %v2899_v32, %v2898_v18 }
 0x15b   : > { %v9765_v19 = vadd.f32 %v1100_v17, %v9577_v30  ;;  %v9767_v10 = vadd.f32 %v7890_v46, %v1207_v41  ;;  %v9769_v61 = vpop.f32.mrf.mxu1  ;;  %v2903_v17 = vld [vmem:[%s9027_s12 + $0x9e] sm:$0xff] }
 0x15c   : > { %v7841_v13 = vpop.f32.mrf.mxu0  ;;  %8140 = vmatmul.mubr.bf16.gmra.mxu0 %v2927_v40 }
 0x15d   : > { %v1210_v52 = vadd.f32 %v7841_v13, %v9584_v29  ;;  %v7893_v31 = vpop.f32.mrf.mxu1  ;;  %8143 = vmatprep.mubr.bf16.mxu0 %v2928_v35 }
 0x15e   : > { %v1113_v33 = vpop.f32.mrf.mxu0 }
 0x15f   : > { %v1208_v49 = vadd.f32 %v1113_v33, %v9596_v50  ;;  %v9777_v47 = vadd.f32 %v7893_v31, %v1210_v52  ;;  %v1445_v30 = vpop.f32.mrf.mxu1  ;;  %v2904_v52 = vld [vmem:[%s9027_s12 + $0xa6] sm:$0xff]  ;;  %v2905_v31 = vld [vmem:[%s9027_s12 + $0xae] sm:$0xff]  ;;  %v8759_v33 = vld [vmem:[%s11627_s4 + $0x38] sm:$0xff]  }
 0x160   : > { %v7842_v59 = vpop.f32.mrf.mxu0  ;;  %8171 = vmatprep.subr.bf16.mxu1 %v8759_v33 }
 0x161   : > { %v1211_v53 = vadd.f32 %v7842_v59, %v9601_v62  ;;  %v9780_v29 = vadd.f32 %v1445_v30, %v1208_v49  ;;  %v7894_v44 = vpop.f32.mrf.mxu1  ;;  %v2902_v62 = vld [vmem:[%s9027_s12 + $0x96] sm:$0xff]  ;;  %v2932_v59 = vpack.c.bf16 %v2905_v31, %v2904_v52  ;;  %8172 = vmatpush3.bf16.msra.mxu1 %v8759_v33 }
 0x162   : > { %v1116_v57 = vpop.f32.mrf.mxu0  ;;  %v2931_v60 = vpack.c.bf16 %v2903_v17, %v2902_v62  ;;  %v2908_v62 = vld [vmem:[%s9027_s12 + $0xc6] sm:$0xff]  ;;  %v2909_v17 = vld [vmem:[%s9027_s12 + $0xce] sm:$0xff] }
 0x163   : > { %v9783_v3 = vadd.f32 %v1116_v57, %v9609_v4  ;;  %v9785_v50 = vadd.f32 %v7894_v44, %v1211_v53  ;;  %v9787_v40 = vpop.f32.mrf.mxu1 }
 0x164   : > { %v7845_v41 = vpop.f32.mrf.mxu0  ;;  %8144 = vmatmul.mubr.bf16.gmra.mxu0 %v2929_v51 }
 0x165   : > { %v1214_v46 = vadd.f32 %v7845_v41, %v9616_v11  ;;  %v7897_v35 = vpop.f32.mrf.mxu1  ;;  %8147 = vmatprep.mubr.bf16.mxu0 %v2930_v14  ;;  %v2906_v41 = vld [vmem:[%s9027_s12 + $0xb6] sm:$0xff] }
 0x166   : > { %v1129_v13 = vpop.f32.mrf.mxu0 }
 0x167   : > { %v1212_v18 = vadd.f32 %v1129_v13, %v9628_v25  ;;  %v9795_v32 = vadd.f32 %v7897_v35, %v1214_v46  ;;  %v1461_v4 = vpop.f32.mrf.mxu1  ;;  %v2907_v46 = vld [vmem:[%s9027_s12 + $0xbe] sm:$0xff] }
 0x168   : > { %v7846_v45 = vpop.f32.mrf.mxu0 }
 0x169   : > { %v1215_v11 = vadd.f32 %v7846_v45, %v9633_v34  ;;  %v9801_v49 = vadd.f32 %v1461_v4, %v1212_v18  ;;  %v7898_v30 = vpop.f32.mrf.mxu1  ;;  %v2933_v18 = vpack.c.bf16 %v2907_v46, %v2906_v41  ;;  %v2934_v45 = vpack.c.bf16 %v2909_v17, %v2908_v62  ;;  %v2912_v46 = vld [vmem:[%s9027_s12 + $0xe6] sm:$0xff] }
 0x16a   : > { %v1132_v25 = vpop.f32.mrf.mxu0 }
 0x16b   : > { %v9804_v51 = vadd.f32 %v1132_v25, %v9641_v56  ;;  %v9806_v53 = vadd.f32 %v7898_v30, %v1215_v11  ;;  %v9808_v44 = vpop.f32.mrf.mxu1 }
 0x16c   : > { %v7849_v14 = vpop.f32.mrf.mxu0  ;;  %8148 = vmatmul.mubr.bf16.gmra.mxu0 %v2931_v60  ;;  %v8760_v60 = vld [vmem:[%s11627_s4 + $0x30] sm:$0xff]  }
 0x16d   : > { %v1218_v34 = vadd.f32 %v7849_v14, %v9648_v55  ;;  %v7901_v57 = vpop.f32.mrf.mxu1  ;;  %8151 = vmatprep.mubr.bf16.mxu0 %v2932_v59  ;;  %8173 = vmatprep.subr.bf16.mxu1 %v8760_v60 }
 0x16e   : > { %v1145_v35 = vpop.f32.mrf.mxu0  ;;  %8174 = vmatpush3.bf16.msra.mxu1 %v8760_v60 }
 0x16f   : > { %v1216_v13 = vadd.f32 %v1145_v35, %v9657_v5  ;;  %v9816_v52 = vadd.f32 %v7901_v57, %v1218_v34  ;;  %v1477_v56 = vpop.f32.mrf.mxu1  ;;  %v2910_v34 = vld [vmem:[%s9027_s12 + $0xd6] sm:$0xff]  ;;  %v2911_v57 = vld [vmem:[%s9027_s12 + $0xde] sm:$0xff]  ;;  %v2913_v35 = vld [vmem:[%s9027_s12 + $0xee] sm:$0xff] }
 0x170   : > { %v7850_v31 = vpop.f32.mrf.mxu0 }
 0x171   : > { %v1219_v4 = vadd.f32 %v7850_v31, %v9659_v54  ;;  %v9819_v33 = vadd.f32 %v1477_v56, %v1216_v13  ;;  %v7902_v55 = vpop.f32.mrf.mxu1  ;;  %v2935_v56 = vpack.c.bf16 %v2911_v57, %v2910_v34  ;;  %v2915_v34 = vld [vmem:[%s9027_s12 + $0xfe] sm:$0xff] }
 0x172   : > { %v1148_v5 = vpop.f32.mrf.mxu0 }
 0x173   : > { %v9825_v11 = vadd.f32 %v1148_v5, %v9661_v20  ;;  %v9827_v30 = vadd.f32 %v7902_v55, %v1219_v4  ;;  %v9829_v59 = vpop.f32.mrf.mxu1  ;;  %v2936_v4 = vpack.c.bf16 %v2913_v35, %v2912_v46  ;;  %v8761_v55 = vld [vmem:[%s11627_s4 + $0x28] sm:$0xff]  }
 0x174   : > { %11637 = vst [vmem:[#allocation7_spill] sm:$0xff] %v9829_v59  ;;  %v7853_v54 = vpop.f32.mrf.mxu0  ;;  %8152 = vmatmul.mubr.bf16.gmra.mxu0 %v2933_v18  ;;  %8175 = vmatprep.subr.bf16.mxu1 %v8761_v55  ;;  %v2917_v46 = vld [vmem:[%s9027_s12 + $0x10e] sm:$0xff] }
 0x175   : > { %11636 = vst [vmem:[#allocation6_spill] sm:$0xff] %v9825_v11  ;;  %v1222_v25 = vadd.f32 %v7853_v54, %v9665_v22  ;;  %v7905_v14 = vpop.f32.mrf.mxu1  ;;  %8155 = vmatprep.mubr.bf16.mxu0 %v2934_v45  ;;  %8176 = vmatpush3.bf16.msra.mxu1 %v8761_v55 }
 0x176   : > { %v1161_v41 = vpop.f32.mrf.mxu0 }
 0x177   : > { %v1220_v20 = vadd.f32 %v1161_v41, %v9671_v42  ;;  %v9837_v62 = vadd.f32 %v7905_v14, %v1222_v25  ;;  %v1493_v17 = vpop.f32.mrf.mxu1  ;;  %v2914_v14 = vld [vmem:[%s9027_s12 + $0xf6] sm:$0xff]  ;;  %v2916_v41 = vld [vmem:[%s9027_s12 + $0x106] sm:$0xff] }
 0x178   : > { %v7854_v13 = vpop.f32.mrf.mxu0 }
 0x179   : > { %v1223_v31 = vadd.f32 %v7854_v13, %v9673_v6  ;;  %v9840_v18 = vadd.f32 %v1493_v17, %v1220_v20  ;;  %v7906_v22 = vpop.f32.mrf.mxu1  ;;  %v2937_v13 = vpack.c.bf16 %v2915_v34, %v2914_v14  ;;  %v2919_v14 = vld [vmem:[%s9027_s12 + $0x11e] sm:$0xff] }
 0x17a   : > { %v1164_v42 = vpop.f32.mrf.mxu0 }
 0x17b   : > { %v9846_v45 = vadd.f32 %v1164_v42, %v9675_v58  ;;  %v9848_v60 = vadd.f32 %v7906_v22, %v1223_v31  ;;  %v9850_v5 = vpop.f32.mrf.mxu1  ;;  %v2938_v22 = vpack.c.bf16 %v2917_v46, %v2916_v41  ;;  %v8762_v42 = vld [vmem:[%s11627_s4 + $0x20] sm:$0xff]   ;;  %v2921_v41 = vld [vmem:[%s9027_s12 + $0x12e] sm:$0xff] }
 0x17c   : > { %11639 = vst [vmem:[#allocation9_spill] sm:$0xff] %v9850_v5  ;;  %v7857_v6 = vpop.f32.mrf.mxu0  ;;  %8156 = vmatmul.mubr.bf16.gmra.mxu0 %v2935_v56  ;;  %8177 = vmatprep.subr.bf16.mxu1 %v8762_v42 }
 0x17d   : > { %11638 = vst [vmem:[#allocation8_spill] sm:$0xff] %v9846_v45  ;;  %v1226_v54 = vadd.f32 %v7857_v6, %v9679_v2  ;;  %v7909_v25 = vpop.f32.mrf.mxu1  ;;  %8159 = vmatprep.mubr.bf16.mxu0 %v2936_v4  ;;  %8178 = vmatpush3.bf16.msra.mxu1 %v8762_v42 }
 0x17e   : > { %v1177_v57 = vpop.f32.mrf.mxu0 }
 0x17f   : > { %v1224_v58 = vadd.f32 %v1177_v57, %v9685_v16  ;;  %v9858_v35 = vadd.f32 %v7909_v25, %v1226_v54  ;;  %v1509_v20 = vpop.f32.mrf.mxu1  ;;  %v2918_v25 = vld [vmem:[%s9027_s12 + $0x116] sm:$0xff]  ;;  %v2920_v57 = vld [vmem:[%s9027_s12 + $0x126] sm:$0xff] }
 0x180   : > { %v7858_v17 = vpop.f32.mrf.mxu0 }
 0x181   : > { %v1227_v56 = vadd.f32 %v7858_v17, %v9687_v23  ;;  %v9861_v31 = vadd.f32 %v1509_v20, %v1224_v58  ;;  %v7910_v2 = vpop.f32.mrf.mxu1  ;;  %v8763_v17 = vld [vmem:[%s11627_s4 + $0x138] sm:$0xff]  }
 0x182   : > { %v9863_v4 = vpop.f32.mrf.mxu0  ;;  %8223 = vmatprep.subr.bf16.mxu0 %v8763_v17 }
 0x183   : > { %11640 = vst [vmem:[#allocation10_spill] sm:$0xff] %v9863_v4  ;;  %v9865_v55 = vadd.f32 %v7910_v2, %v1227_v56  ;;  %v9867_v16 = vpop.f32.mrf.mxu1  ;;  %8224 = vmatpush3.bf16.msra.mxu0 %v8763_v17 }
 0x184   : > { %11641 = vst [vmem:[#allocation11_spill] sm:$0xff] %v9867_v16  ;;  %v7929_v6 = vpop.f32.mrf.mxu0  ;;  %8160 = vmatmul.mubr.bf16.gmra.mxu0 %v2937_v13 }
 0x185   : > { %v1858_v23 = vadd.f32 %v7929_v6, %v9699_v43  ;;  %v7981_v54 = vpop.f32.mrf.mxu1  ;;  %8163 = vmatprep.mubr.bf16.mxu0 %v2938_v22  ;;  %v2939_v43 = vpack.c.bf16 %v2919_v14, %v2918_v25  ;;  %v2940_v6 = vpack.c.bf16 %v2921_v41, %v2920_v57  ;;  %v2922_v57 = vld [vmem:[%s9027_s12 + $0x136] sm:$0xff]  ;;  %v2923_v41 = vld [vmem:[%s9027_s12 + $0x13e] sm:$0xff] }
 0x186   : > { %v1713_v34 = vpop.f32.mrf.mxu0 }
 0x187   : > { %v1856_v46 = vadd.f32 %v1713_v34, %v9704_v26  ;;  %v9878_v58 = vadd.f32 %v7981_v54, %v1858_v23  ;;  %v2045_v20 = vpop.f32.mrf.mxu1  ;;  %v8764_v54 = vld [vmem:[%s11627_s4 + $0x18] sm:$0xff]  }
 0x188   : > { %v7930_v13 = vpop.f32.mrf.mxu0  ;;  %8179 = vmatprep.subr.bf16.mxu1 %v8764_v54 }
 0x189   : > { %v1859_v56 = vadd.f32 %v7930_v13, %v9709_v24  ;;  %v9884_v2 = vadd.f32 %v2045_v20, %v1856_v46  ;;  %v7982_v22 = vpop.f32.mrf.mxu1  ;;  %v8765_v24 = vld [vmem:[%s11627_s4 + $0x130] sm:$0xff]   ;;  %8180 = vmatpush3.bf16.msra.mxu1 %v8764_v54 }
 0x18a   : > { %v9886_v42 = vpop.f32.mrf.mxu0  ;;  %8225 = vmatprep.subr.bf16.mxu0 %v8765_v24 }
 0x18b   : > { %v9888_v26 = vadd.f32 %v7982_v22, %v1859_v56  ;;  %v9890_v23 = vpop.f32.mrf.mxu1  ;;  %8226 = vmatpush3.bf16.msra.mxu0 %v8765_v24  ;;  %v8768_v24 = vld [vmem:[%s11627_s4 + $0x120] sm:$0xff]  }
 0x18c   : > { %v7933_v25 = vpop.f32.mrf.mxu0  ;;  %8164 = vmatmul.mubr.bf16.gmra.mxu0 %v2939_v43  ;;  %v8766_v43 = vld [vmem:[%s11627_s4 + $0x128] sm:$0xff]  }
 0x18d   : > { %v1862_v14 = vadd.f32 %v7933_v25, %v9723_v37  ;;  %v7985_v34 = vpop.f32.mrf.mxu1  ;;  %8167 = vmatprep.mubr.bf16.mxu0 %v2940_v6  ;;  %v2941_v37 = vpack.c.bf16 %v2923_v41, %v2922_v57  ;;  %8227 = vmatprep.subr.bf16.mxu0 %v8766_v43 }
 0x18e   : > { %v1729_v46 = vpop.f32.mrf.mxu0 }
 0x18f   : > { %v1860_v20 = vadd.f32 %v1729_v46, %v9726_v12  ;;  %v9902_v17 = vadd.f32 %v7985_v34, %v1862_v14  ;;  %v2061_v13 = vpop.f32.mrf.mxu1  ;;  %8228 = vmatpush3.bf16.msra.mxu0 %v8766_v43 }
 0x190   : > { %v7934_v56 = vpop.f32.mrf.mxu0  ;;  %8229 = vmatprep.subr.bf16.mxu0 %v8768_v24 }
 0x191   : > { %v1863_v22 = vadd.f32 %v7934_v56, %v9731_v7  ;;  %v9908_v6 = vadd.f32 %v2061_v13, %v1860_v20  ;;  %v7986_v25 = vpop.f32.mrf.mxu1  ;;  %v8769_v13 = vld [vmem:[%s11627_s4 + $0x118] sm:$0xff]  }
 0x192   : > { %v9910_v54 = vpop.f32.mrf.mxu0 }
 0x193   : > { %v9912_v16 = vadd.f32 %v7986_v25, %v1863_v22  ;;  %v9914_v12 = vpop.f32.mrf.mxu1  ;;  %8230 = vmatpush3.bf16.msra.mxu0 %v8768_v24  ;;  %v8770_v24 = vld [vmem:[%s11627_s4 + $0x110] sm:$0xff]  }
 0x194   : > { %v7937_v14 = vpop.f32.mrf.mxu0  ;;  %8168 = vmatmul.mubr.bf16.gmra.mxu0 %v2941_v37  ;;  %8231 = vmatprep.subr.bf16.mxu0 %v8769_v13 }
 0x195   : > { %v1866_v34 = vadd.f32 %v7937_v14, %v9741_v21  ;;  %v7989_v7 = vpop.f32.mrf.mxu1 }
 0x196   : > { %v1745_v57 = vpop.f32.mrf.mxu0 }
 0x197   : > { %v1864_v41 = vadd.f32 %v1745_v57, %v9744_v27  ;;  %v9921_v46 = vadd.f32 %v7989_v7, %v1866_v34  ;;  %v2077_v20 = vpop.f32.mrf.mxu1  ;;  %8232 = vmatpush3.bf16.msra.mxu0 %v8769_v13  ;;  %v8772_v13 = vld [vmem:[%s11627_s4 + $0x108] sm:$0xff]  }
 0x198   : > { %v7938_v43 = vpop.f32.mrf.mxu0  ;;  %8233 = vmatprep.subr.bf16.mxu0 %v8770_v24 }
 0x199   : > { %v1867_v56 = vadd.f32 %v7938_v43, %v9749_v39  ;;  %v9927_v22 = vadd.f32 %v2077_v20, %v1864_v41  ;;  %v7990_v37 = vpop.f32.mrf.mxu1  ;;  %v8767_v43 = vld [vmem:[%s11627_s4 + $0x10] sm:$0xff]  }
 0x19a   : > { %v9929_v21 = vpop.f32.mrf.mxu0  ;;  %8181 = vmatprep.subr.bf16.mxu1 %v8767_v43 }
 0x19b   : > { %v9931_v25 = vadd.f32 %v7990_v37, %v1867_v56  ;;  %v9933_v27 = vpop.f32.mrf.mxu1  ;;  %8234 = vmatpush3.bf16.msra.mxu0 %v8770_v24  ;;  %8182 = vmatpush3.bf16.msra.mxu1 %v8767_v43 }
 0x19c   : > { %11642 = vst [vmem:[#allocation12_spill] sm:$0xff] %v9933_v27  ;;  %v7941_v14 = vpop.f32.mrf.mxu0  ;;  %8235 = vmatprep.subr.bf16.mxu0 %v8772_v13  ;;  %v8774_v27 = vld [vmem:[%s11627_s4] sm:$0xff]  }
 0x19d   : > { %v1870_v34 = vadd.f32 %v7941_v14, %v9759_v1  ;;  %v7993_v7 = vpop.f32.mrf.mxu1 }
 0x19e   : > { %v1761_v39 = vpop.f32.mrf.mxu0 }
 0x19f   : > { %v1868_v57 = vadd.f32 %v1761_v39, %v9762_v0  ;;  %v9940_v41 = vadd.f32 %v7993_v7, %v1870_v34  ;;  %v2093_v20 = vpop.f32.mrf.mxu1  ;;  %v8894_v34 = vmov 0.0   ;;  %8236 = vmatpush3.bf16.msra.mxu0 %v8772_v13 }
 0x1a0   : > { %v7942_v56 = vpop.f32.mrf.mxu0  ;;  %3594 = vst [vmem:[#allocation2] sm:$0xff] %v8894_v34  ;;  %3595 = vst [vmem:[#allocation2 + $0x8] sm:$0xff] %v8894_v34 }
 0x1a1   : > { %v1871_v1 = vadd.f32 %v7942_v56, %v9767_v10  ;;  %v9949_v37 = vadd.f32 %v2093_v20, %v1868_v57  ;;  %v7994_v14 = vpop.f32.mrf.mxu1  ;;  %3596 = vst [vmem:[#allocation2 + $0x10] sm:$0x7] %v8894_v34  ;;  %3597 = vst [vmem:[#allocation2 + $0x133] sm:$0xff] %v8894_v34  ;;  %v8773_v10 = vld [vmem:[%s11627_s4 + $0x100] sm:$0xff]   ;;  %v8771_v56 = vld [vmem:[%s11627_s4 + $0x8] sm:$0xff]  }
 0x1a2   : > { %v9951_v0 = vpop.f32.mrf.mxu0  ;;  %3598 = vst [vmem:[#allocation2 + $0x13b] sm:$0xff] %v8894_v34  ;;  %3599 = vst [vmem:[#allocation2 + $0x143] sm:$0xff] %v8894_v34  ;;  %8237 = vmatprep.subr.bf16.mxu0 %v8773_v10  ;;  %8183 = vmatprep.subr.bf16.mxu1 %v8771_v56 }
 0x1a3   : > { %11643 = vst [vmem:[#allocation13_spill] sm:$0xff] %v9951_v0  ;;  %v9953_v24 = vadd.f32 %v7994_v14, %v1871_v1  ;;  %v9955_v7 = vpop.f32.mrf.mxu1  ;;  %8238 = vmatpush3.bf16.msra.mxu0 %v8773_v10  ;;  %8184 = vmatpush3.bf16.msra.mxu1 %v8771_v56 }
 0x1a4   : > { %11644 = vst [vmem:[#allocation14_spill] sm:$0xff] %v9955_v7  ;;  %v7945_v39 = vpop.f32.mrf.mxu0  ;;  %8185 = vmatprep.subr.bf16.mxu1 %v8774_v27 }
 0x1a5   : > { %v1874_v57 = vadd.f32 %v7945_v39, %v9777_v47  ;;  %v7997_v20 = vpop.f32.mrf.mxu1 }
 0x1a6   : > { %v1777_v43 = vpop.f32.mrf.mxu0 }
 0x1a7   : > { %v1872_v1 = vadd.f32 %v1777_v43, %v9780_v29  ;;  %v9965_v14 = vadd.f32 %v7997_v20, %v1874_v57  ;;  %v2109_v34 = vpop.f32.mrf.mxu1  ;;  %8186 = vmatpush3.bf16.msra.mxu1 %v8774_v27 }
 0x1a8   : > { %v7946_v13 = vpop.f32.mrf.mxu0 }
 0x1a9   : > { %v1875_v7 = vadd.f32 %v7946_v13, %v9785_v50  ;;  %v9968_v0 = vadd.f32 %v2109_v34, %v1872_v1  ;;  %v7998_v47 = vpop.f32.mrf.mxu1  ;;  %v8895_v34 = vmov 0.0|0.0  }
 0x1aa   : > { %v9970_v39 = vpop.f32.mrf.mxu0  ;;  %8187 = vmatprep.mubr.bf16.mxu1 %v8895_v34 }
 0x1ab   : > { %11645 = vst [vmem:[#allocation15_spill] sm:$0xff] %v9970_v39  ;;  %v9975_v4 = vadd.f32 %v7998_v47, %v1875_v7  ;;  %v9977_v29 = vpop.f32.mrf.mxu1 }
 0x1ac   : > { %11646 = vst [vmem:[#allocation16_spill] sm:$0xff] %v9977_v29  ;;  %v7949_v57 = vpop.f32.mrf.mxu0 }
 0x1ad   : > { %v1878_v10 = vadd.f32 %v7949_v57, %v9795_v32  ;;  %v8001_v20 = vpop.f32.mrf.mxu1 }
 0x1ae   : > { %v1793_v50 = vpop.f32.mrf.mxu0 }
 0x1af   : > { %v1876_v43 = vadd.f32 %v1793_v50, %v9801_v49  ;;  %v9981_v56 = vadd.f32 %v8001_v20, %v1878_v10  ;;  %v2125_v1 = vpop.f32.mrf.mxu1 }
 0x1b0   : > { %v7950_v13 = vpop.f32.mrf.mxu0 }
 0x1b1   : > { %v1879_v7 = vadd.f32 %v7950_v13, %v9806_v53  ;;  %v9984_v47 = vadd.f32 %v2125_v1, %v1876_v43  ;;  %v8002_v29 = vpop.f32.mrf.mxu1  ;;  %v9999_v53 = vld [vmem:[%s11627_s4 + $0x78] sm:$0xff]  }
 0x1b2   : > { %v9986_v39 = vpop.f32.mrf.mxu0  ;;  %11649 = vst [vmem:[#allocation19_spill] sm:$0xff] %v9999_v53  ;;  %8275 = vmatprep.subr.bf16.mxu1 %v9999_v53 }
 0x1b3   : > { %11647 = vst [vmem:[#allocation17_spill] sm:$0xff] %v9986_v39  ;;  %v9988_v5 = vadd.f32 %v8002_v29, %v1879_v7  ;;  %v9990_v32 = vpop.f32.mrf.mxu1 }
 0x1b4   : > { %11648 = vst [vmem:[#allocation18_spill] sm:$0xff] %v9990_v32  ;;  %v7953_v27 = vpop.f32.mrf.mxu0 }
 0x1b5   : > { %v1882_v49 = vadd.f32 %v7953_v27, %v9816_v52  ;;  %v8005_v57 = vpop.f32.mrf.mxu1 }
 0x1b6   : > { %v1809_v10 = vpop.f32.mrf.mxu0 }
 0x1b7   : > { %v1880_v20 = vadd.f32 %v1809_v10, %v9819_v33  ;;  %v9994_v50 = vadd.f32 %v8005_v57, %v1882_v49  ;;  %v2141_v34 = vpop.f32.mrf.mxu1 }
 0x1b8   : > { %v7954_v43 = vpop.f32.mrf.mxu0 }
 0x1b9   : > { %v1883_v29 = vadd.f32 %v7954_v43, %v9827_v30  ;;  %v10002_v1 = vadd.f32 %v2141_v34, %v1880_v20  ;;  %v8006_v13 = vpop.f32.mrf.mxu1 }
 0x1ba   : > { %v10005_v52 = vpop.f32.mrf.mxu0 }
 0x1bb   : > { %11650 = vst [vmem:[#allocation20_spill] sm:$0xff] %v10005_v52  ;;  %v10007_v7 = vadd.f32 %v8006_v13, %v1883_v29  ;;  %v10009_v33 = vpop.f32.mrf.mxu1 }
 0x1bc   : > { %11651 = vst [vmem:[#allocation21_spill] sm:$0xff] %v10009_v33  ;;  %v7957_v27 = vpop.f32.mrf.mxu0 }
 0x1bd   : > { %v1886_v49 = vadd.f32 %v7957_v27, %v9837_v62  ;;  %v8009_v57 = vpop.f32.mrf.mxu1 }
 0x1be   : > { %v1825_v10 = vpop.f32.mrf.mxu0 }
 0x1bf   : > { %v1884_v32 = vadd.f32 %v1825_v10, %v9840_v18  ;;  %v10013_v39 = vadd.f32 %v8009_v57, %v1886_v49  ;;  %v2157_v30 = vpop.f32.mrf.mxu1 }
 0x1c0   : > { %v7958_v20 = vpop.f32.mrf.mxu0 }
 0x1c1   : > { %v1887_v34 = vadd.f32 %v7958_v20, %v9848_v60  ;;  %v10016_v43 = vadd.f32 %v2157_v30, %v1884_v32  ;;  %v8010_v53 = vpop.f32.mrf.mxu1 }
 0x1c2   : > { %v10018_v29 = vpop.f32.mrf.mxu0 }
 0x1c3   : > { %11652 = vst [vmem:[#allocation22_spill] sm:$0xff] %v10018_v29  ;;  %v10020_v13 = vadd.f32 %v8010_v53, %v1887_v34  ;;  %v10022_v33 = vpop.f32.mrf.mxu1 }
 0x1c4   : > { %11653 = vst [vmem:[#allocation23_spill] sm:$0xff] %v10022_v33  ;;  %v7961_v62 = vpop.f32.mrf.mxu0 }
 0x1c5   : > { %v1890_v27 = vadd.f32 %v7961_v62, %v9858_v35  ;;  %v8013_v52 = vpop.f32.mrf.mxu1 }
 0x1c6   : > { %v1841_v18 = vpop.f32.mrf.mxu0 }
 0x1c7   : > { %v1888_v49 = vadd.f32 %v1841_v18, %v9861_v31  ;;  %v10026_v57 = vadd.f32 %v8013_v52, %v1890_v27  ;;  %v2173_v10 = vpop.f32.mrf.mxu1  ;;  %v10050_v18 = vld [vmem:[%s11627_s4 + $0xb8] sm:$0xff]  }
 0x1c8   : > { %v7962_v60 = vpop.f32.mrf.mxu0  ;;  %11656 = vst [vmem:[#allocation26_spill] sm:$0xff] %v10050_v18  ;;  %8327 = vmatprep.subr.bf16.mxu0 %v10050_v18 }
 0x1c9   : > { %v1891_v32 = vadd.f32 %v7962_v60, %v9865_v55  ;;  %v10029_v30 = vadd.f32 %v2173_v10, %v1888_v49  ;;  %v8014_v20 = vpop.f32.mrf.mxu1 }
 0x1ca   : > { %v10031_v53 = vpop.f32.mrf.mxu0 }
 0x1cb   : > { %11654 = vst [vmem:[#allocation24_spill] sm:$0xff] %v10031_v53  ;;  %v10033_v34 = vadd.f32 %v8014_v20, %v1891_v32  ;;  %v10035_v33 = vpop.f32.mrf.mxu1 }
 0x1cc   : > { %11655 = vst [vmem:[#allocation25_spill] sm:$0xff] %v10035_v33  ;;  %v8033_v35 = vpop.f32.mrf.mxu0 }
 0x1cd   : > { %v10038_v62 = vadd.f32 %v8033_v35, %v9878_v58  ;;  %v10040_v31 = vpop.f32.mrf.mxu1 }
 0x1ce   : > { %v2377_v52 = vpop.f32.mrf.mxu0 }
 0x1cf   : > { %v10043_v27 = vadd.f32 %v2377_v52, %v9884_v2  ;;  %v10045_v55 = vpop.f32.mrf.mxu1 }
 0x1d0   : > { %v8034_v49 = vpop.f32.mrf.mxu0 }
 0x1d1   : > { %v10053_v10 = vadd.f32 %v8034_v49, %v9888_v26  ;;  %v10055_v60 = vpop.f32.mrf.mxu1 }
 0x1d2   : > { %v10058_v58 = vpop.f32.mrf.mxu0 }
 0x1d3   : > { %v10063_v20 = vpop.f32.mrf.mxu1 }
 0x1d4   : > { %v8037_v32 = vpop.f32.mrf.mxu0 }
 0x1d5   : > { %v10061_v2 = vadd.f32 %v8037_v32, %v9902_v17  ;;  %v10068_v53 = vpop.f32.mrf.mxu1 }
 0x1d6   : > { %v2393_v35 = vpop.f32.mrf.mxu0 }
 0x1d7   : > { %v10066_v52 = vadd.f32 %v2393_v35, %v9908_v6  ;;  %v10075_v18 = vpop.f32.mrf.mxu1 }
 0x1d8   : > { %v8038_v33 = vpop.f32.mrf.mxu0 }
 0x1d9   : > { %v10071_v26 = vadd.f32 %v8038_v33, %v9912_v16  ;;  %v10083_v35 = vpop.f32.mrf.mxu1 }
 0x1da   : > { %v10073_v49 = vpop.f32.mrf.mxu0 }
 0x1db   : > { %11657 = vst [vmem:[#allocation27_spill] sm:$0xff] %v10071_v26  ;;  %v10090_v26 = vpop.f32.mrf.mxu1 }
 0x1dc   : > { %v8041_v29 = vpop.f32.mrf.mxu0 }
 0x1dd   : > { %v10078_v17 = vadd.f32 %v8041_v29, %v9921_v46 }
 0x1de   : > { %v2409_v32 = vpop.f32.mrf.mxu0 }
 0x1df   : > { %v10081_v45 = vadd.f32 %v2409_v32, %v9927_v22  ;;  %v10098_v32 = vpop.f32.mrf.mxu1 }
 0x1e0   : > { %v8042_v6 = vpop.f32.mrf.mxu0 }
 0x1e1   : > { %11658 = vst [vmem:[#allocation28_spill] sm:$0xff] %v10081_v45  ;;  %v10086_v59 = vadd.f32 %v8042_v6, %v9931_v25 }
 0x1e2   : > { %v10088_v16 = vpop.f32.mrf.mxu0 }
 0x1e3   : > { %11659 = vst [vmem:[#allocation29_spill] sm:$0xff] %v10086_v59  ;;  %11660 = vst [vmem:[#allocation30_spill] sm:$0xff] %v10088_v16  ;;  %v10105_v59 = vpop.f32.mrf.mxu1 }
 0x1e4   : > { %v8045_v33 = vpop.f32.mrf.mxu0 }
 0x1e5   : > { %v10093_v11 = vadd.f32 %v8045_v33, %v9940_v41 }
 0x1e6   : > { %v2425_v46 = vpop.f32.mrf.mxu0 }
 0x1e7   : > { %v10096_v29 = vadd.f32 %v2425_v46, %v9949_v37  ;;  %v10113_v46 = vpop.f32.mrf.mxu1 }
 0x1e8   : > { %v8046_v22 = vpop.f32.mrf.mxu0 }
 0x1e9   : > { %11661 = vst [vmem:[#allocation31_spill] sm:$0xff] %v10096_v29  ;;  %v10101_v45 = vadd.f32 %v8046_v22, %v9953_v24 }
 0x1ea   : > { %v10103_v25 = vpop.f32.mrf.mxu0 }
 0x1eb   : > { %11662 = vst [vmem:[#allocation32_spill] sm:$0xff] %v10101_v45  ;;  %11663 = vst [vmem:[#allocation33_spill] sm:$0xff] %v10103_v25  ;;  %v10120_v45 = vpop.f32.mrf.mxu1 }
 0x1ec   : > { %v8049_v6 = vpop.f32.mrf.mxu0 }
 0x1ed   : > { %v10108_v16 = vadd.f32 %v8049_v6, %v9965_v14  ;;  %v10125_v14 = vpop.permute.xlu0 %3380 }
 0x1ee   : > { %v2441_v41 = vpop.f32.mrf.mxu0 }
 0x1ef   : > { %11664 = vst [vmem:[#allocation34_spill] sm:$0xff] %v10108_v16  ;;  %v10111_v33 = vadd.f32 %v2441_v41, %v9968_v0 }
 0x1f0   : > { %v8050_v37 = vpop.f32.mrf.mxu0 }
 0x1f1   : > { %11665 = vst [vmem:[#allocation35_spill] sm:$0xff] %v10111_v33  ;;  %v10116_v29 = vadd.f32 %v8050_v37, %v9975_v4  ;;  %v10130_v33 = vpop.f32.mrf.mxu1 }
 0x1f2   : > { %v10118_v24 = vpop.f32.mrf.mxu0  ;;  %11670 = vst [vmem:[#allocation40_spill] sm:$0xff] %v10130_v33 }
 0x1f3   : > { %11666 = vst [vmem:[#allocation36_spill] sm:$0xff] %v10116_v29  ;;  %11667 = vst [vmem:[#allocation37_spill] sm:$0xff] %v10118_v24  ;;  %v10137_v29 = vpop.permute.xlu1 %3390  ;;  %v10139_v24 = vpop.permute.xlu0 %3385 }
 0x1f4   : > { %v8053_v22 = vpop.f32.mrf.mxu0 }
 0x1f5   : > { %v10123_v25 = vadd.f32 %v8053_v22, %v9981_v56  ;;  %v10141_v22 = vpop.f32.mrf.mxu1 }
 0x1f6   : > { %v2457_v6 = vpop.f32.mrf.mxu0  ;;  %11673 = vst [vmem:[#allocation43_spill] sm:$0xff] %v10141_v22 }
 0x1f7   : > { %11668 = vst [vmem:[#allocation38_spill] sm:$0xff] %v10123_v25  ;;  %v10128_v0 = vadd.f32 %v2457_v6, %v9984_v47  ;;  %v10149_v16 = vpop.permute.xlu1 %3395 }
 0x1f8   : > { %v8054_v41 = vpop.f32.mrf.mxu0 }
 0x1f9   : > { %11669 = vst [vmem:[#allocation39_spill] sm:$0xff] %v10128_v0  ;;  %v10133_v4 = vadd.f32 %v8054_v41, %v9988_v5  ;;  %v10151_v5 = vpop.f32.mrf.mxu1 }
 0x1fa   : > { %v10135_v37 = vpop.f32.mrf.mxu0 }
 0x1fb   : > { %11671 = vst [vmem:[#allocation41_spill] sm:$0xff] %v10133_v4  ;;  %11672 = vst [vmem:[#allocation42_spill] sm:$0xff] %v10135_v37  ;;  %v10156_v4 = vpop.permute.xlu0 %3400  ;;  %v10160_v33 = vpop.f32.mrf.mxu1 }
 0x1fc   : > { %v8057_v56 = vpop.f32.mrf.mxu0 }
 0x1fd   : > { %v10144_v25 = vadd.f32 %v8057_v56, %v9994_v50  ;;  %v10165_v56 = vpop.permute.xlu1 %3405 }
 0x1fe   : > { %v2473_v47 = vpop.f32.mrf.mxu0 }
 0x1ff   : > { %11674 = vst [vmem:[#allocation44_spill] sm:$0xff] %v10144_v25  ;;  %v10147_v6 = vadd.f32 %v2473_v47, %v10002_v1 }
 0x200   : > { %v8058_v0 = vpop.f32.mrf.mxu0 }
 0x201   : > { %11675 = vst [vmem:[#allocation45_spill] sm:$0xff] %v10147_v6  ;;  %v10154_v41 = vadd.f32 %v8058_v0, %v10007_v7  ;;  %v10170_v6 = vpop.permute.xlu0 %3410  ;;  %v10172_v0 = vpop.f32.mrf.mxu1 }
 0x202   : > { %v10158_v37 = vpop.f32.mrf.mxu0  ;;  %11680 = vst [vmem:[#allocation50_spill] sm:$0xff] %v10172_v0 }
 0x203   : > { %11676 = vst [vmem:[#allocation46_spill] sm:$0xff] %v10154_v41  ;;  %11677 = vst [vmem:[#allocation47_spill] sm:$0xff] %v10158_v37 }
 0x204   : > { %v8061_v22 = vpop.f32.mrf.mxu0 }
 0x205   : > { %v10163_v50 = vadd.f32 %v8061_v22, %v10013_v39  ;;  %v1525_v39 = vadd.f32 %v9711_v9, %v9707_v36  ;;  %v10181_v22 = vpop.permute.xlu1 %3415 }
 0x206   : > { %v2489_v1 = vpop.f32.mrf.mxu0 }
 0x207   : > { %11678 = vst [vmem:[#allocation48_spill] sm:$0xff] %v10163_v50  ;;  %v10168_v47 = vadd.f32 %v2489_v1, %v10016_v43  ;;  %v10183_v50 = vpop.f32.mrf.mxu1  ;;  %v10188_v1 = vpop.permute.xlu0 %3420  ;;  %v1857_v0 = vadd.f32 %v9886_v42, %v1525_v39  ;;  %v1529_v42 = vadd.f32 %v9733_v15, %v9729_v63  ;;  %v2852_v39 = vadd.f32 %v10045_v55, %v10043_v27  ;;  %v10224_v63 = vld [vmem:[%s11626_s3] ss:$0 sm:$0xff] }
 0x208   : > { %v8062_v7 = vpop.f32.mrf.mxu0  ;;  %v885_v27 = vadd.f32 %v9691_v28, %v9689_v8  ;;  %v1533_v55 = vadd.f32 %v9751_v48, %v9747_v38  ;;  %v1541_v8 = vadd.f32 %v9787_v40, %v9783_v3  ;;  %v10246_v28 = vadd.f32 %v9808_v44, %v9804_v51 }
 0x209   : > { %11679 = vst [vmem:[#allocation49_spill] sm:$0xff] %v10168_v47  ;;  %v10175_v41 = vadd.f32 %v8062_v7, %v10020_v13  ;;  %v2856_v3 = vadd.f32 %v10075_v18, %v10066_v52  ;;  %v11689_v52 = vld [vmem:[#allocation27_spill] sm:$0xff] }
 0x20a   : > { %v10177_v37 = vpop.f32.mrf.mxu0 }
 0x20b   : > { %11681 = vst [vmem:[#allocation51_spill] sm:$0xff] %v10175_v41  ;;  %11682 = vst [vmem:[#allocation52_spill] sm:$0xff] %v10177_v37  ;;  %v10194_v41 = vpop.f32.mrf.mxu1  ;;  %v2189_v37 = vadd.f32 %v9890_v23, %v1857_v0 }
 0x20c   : > { %v8065_v25 = vpop.f32.mrf.mxu0 }
 0x20d   : > { %v10186_v43 = vadd.f32 %v8065_v25, %v10026_v57  ;;  %v2854_v57 = vadd.f32 %v10040_v31, %v10038_v62  ;;  %v10204_v25 = vpop.permute.xlu1 %3425  ;;  %v2521_v23 = vadd.f32 %v10058_v58, %v2189_v37  ;;  %v10218_v0 = vpop.f32.mrf.mxu1  ;;  %v1861_v31 = vadd.f32 %v9910_v54, %v1529_v42 }
 0x20e   : > { %v2505_v47 = vpop.f32.mrf.mxu0 }
 0x20f   : > { %v10192_v13 = vadd.f32 %v2505_v47, %v10029_v30  ;;  %v10208_v30 = vpop.permute.xlu0 %3430  ;;  %v2853_v54 = vadd.f32 %v10063_v20, %v2521_v23  ;;  %v2193_v38 = vadd.f32 %v9914_v12, %v1861_v31 }
 0x210   : > { %v8066_v7 = vpop.f32.mrf.mxu0 }
 0x211   : > { %v10197_v36 = vadd.f32 %v8066_v7, %v10033_v34  ;;  %v10213_v34 = vld [vmem:[%s11625_s2] ss:$0 sm:$0xff]  ;;  %v2855_v7 = vadd.f32 %v10055_v60, %v10053_v10  ;;  %v10234_v37 = vpop.permute.xlu1 %3435  ;;  %v2525_v40 = vadd.f32 %v10073_v49, %v2193_v38  ;;  %v2859_v49 = vadd.f32 %v10083_v35, %v11689_v52 }
 0x212   : > { %v10199_v9 = vpop.f32.mrf.mxu0 }
 0x213   : > { %11683 = vst [vmem:[#allocation53_spill] sm:$0xff] %v10197_v36  ;;  %11684 = vst [vmem:[#allocation54_spill] sm:$0xff] %v10199_v9  ;;  %v10249_v48 = vpop.permute.xlu0 %3440 }
 0x214   : > { %v8137_v47 = vpop.f32.mrf.mxu0 }
 0x215   : > { %v3186_v62 = vadd.f32 %v8137_v47, %v2854_v57  ;;  %v10236_v57 = vpop.f32.mrf.mxu1  ;;  %v1537_v47 = vadd.f32 %v9769_v61, %v9765_v19  ;;  %v1865_v19 = vadd.f32 %v9929_v21, %v1533_v55  ;;  %v2858_v61 = vadd.f32 %v10068_v53, %v10061_v2  ;;  %v11685_v21 = vld [vmem:[#allocation6_spill] sm:$0xff]  ;;  %v11687_v53 = vld [vmem:[#allocation8_spill] sm:$0xff]  ;;  %v11688_v2 = vld [vmem:[#allocation9_spill] sm:$0xff] }
 0x216   : > { %v3041_v15 = vpop.f32.mrf.mxu0  ;;  %v10272_v18 = vadd.f32 %v11688_v2, %v11687_v53 }
 0x217   : > { %v3229_v36 = vmul.f32 %v10213_v34, %v3186_v62  ;;  %v3184_v9 = vadd.f32 %v3041_v15, %v2852_v39  ;;  %v10259_v44 = vpop.f32.mrf.mxu1 }
 0x218   : > { %v8138_v58 = vpop.f32.mrf.mxu0 }
 0x219   : > { %v3272_v42 = vadd.f32 %v10224_v63, %v3229_v36  ;;  %v3227_v10 = vmul.f32 %v10213_v34, %v3184_v9  ;;  %v3187_v60 = vadd.f32 %v8138_v58, %v2855_v7  ;;  %v11686_v7 = vld [vmem:[#allocation7_spill] sm:$0xff] }
 0x21a   : > { %v3044_v20 = vpop.f32.mrf.mxu0  ;;  %v10268_v55 = vadd.f32 %v11686_v7, %v11685_v21  ;;  %v10284_v21 = vpop.permute.xlu0 %3450 }
 0x21b   : > { %v3308_v39 = vmax.f32 %v3272_v42, 0.0  ;;  %v3270_v36 = vadd.f32 %v10224_v63, %v3227_v10  ;;  %v3230_v9 = vmul.f32 %v10213_v34, %v3187_v60  ;;  %v3185_v23 = vadd.f32 %v3044_v20, %v2853_v54  ;;  %v11690_v20 = vld [vmem:[#allocation10_spill] sm:$0xff] }
 0x21c   : > { %v8141_v51 = vpop.f32.mrf.mxu0 }
 0x21d   : > { %v10262_v12 = vmul.f32 %v10137_v29, %v3308_v39  ;;  %v3306_v62 = vmax.f32 %v3270_v36, 0.0  ;;  %v3273_v31 = vadd.f32 %v10224_v63, %v3230_v9  ;;  %v3228_v15 = vmul.f32 %v10213_v34, %v3185_v23  ;;  %v10276_v29 = vpop.permute.xlu1 %3445  ;;  %v11691_v36 = vld [vmem:[#allocation12_spill] sm:$0xff] }
 0x21e   : > { %v3190_v58 = vadd.f32 %v8141_v51, %v2858_v61  ;;  %v3057_v54 = vpop.f32.mrf.mxu0  ;;  %v1225_v39 = vadd.f32 %v11690_v20, %v885_v27  ;;  %v2197_v9 = vadd.f32 %v11691_v36, %v1865_v19  ;;  %v2857_v23 = vadd.f32 %v10090_v26, %v2525_v40  ;;  %v10287_v51 = vpop.f32.mrf.mxu1 }
 0x21f   : > { %3604 = vst [vmem:[#allocation2 + $0x23] sm:$0xff] %v10262_v12  ;;  %v3309_v42 = vmax.f32 %v3273_v31, 0.0  ;;  %v3271_v10 = vadd.f32 %v10224_v63, %v3228_v15  ;;  %v3188_v60 = vadd.f32 %v3057_v54, %v2856_v3  ;;  %v3558_v38 = vmul.f32 %v10125_v14, %v3306_v62  ;;  %v11692_v14 = vld [vmem:[#allocation13_spill] sm:$0xff]  ;;  %v11693_v62 = vld [vmem:[#allocation15_spill] sm:$0xff] }
 0x220   : > { %v3233_v35 = vmul.f32 %v10213_v34, %v3190_v58  ;;  %v8142_v61 = vpop.f32.mrf.mxu0  ;;  %v1869_v27 = vadd.f32 %v11692_v14, %v1537_v47  ;;  %v1873_v19 = vadd.f32 %v11693_v62, %v1541_v8  ;;  %v2862_v26 = vadd.f32 %v10098_v32, %v10078_v17  ;;  %v11695_v47 = vld [vmem:[#allocation30_spill] sm:$0xff] }
 0x221   : > { %v3561_v31 = vmul.f32 %v10149_v16, %v3309_v42  ;;  %v3307_v7 = vmax.f32 %v3271_v10, 0.0  ;;  %v3231_v3 = vmul.f32 %v10213_v34, %v3188_v60  ;;  %v3191_v15 = vadd.f32 %v8142_v61, %v2859_v49  ;;  %3602 = vst [vmem:[#allocation2 + $0x13] sm:$0xff] %v3558_v38  ;;  %v11694_v49 = vld [vmem:[#allocation28_spill] sm:$0xff]  ;;  %v10303_v32 = vpop.permute.xlu1 %3455  ;;  %v10305_v60 = vpop.f32.mrf.mxu1 }
 0x222   : > { %v3276_v40 = vadd.f32 %v10224_v63, %v3233_v35  ;;  %v3060_v53 = vpop.f32.mrf.mxu0  ;;  %v2860_v54 = vadd.f32 %v10105_v59, %v11694_v49  ;;  %v2529_v42 = vadd.f32 %v11695_v47, %v2197_v9  ;;  %v11697_v59 = vld [vmem:[#allocation14_spill] sm:$0xff]  ;;  %v10313_v9 = vpop.permute.xlu0 %3460 }
 0x223   : > { %3605 = vst [vmem:[#allocation2 + $0x2b] sm:$0xff] %v3561_v31  ;;  %v3639_v2 = vpack.c.bf16 %v3561_v31, %v10262_v12  ;;  %v3274_v16 = vadd.f32 %v10224_v63, %v3231_v3  ;;  %v3234_v52 = vmul.f32 %v10213_v34, %v3191_v15  ;;  %v3189_v58 = vadd.f32 %v3060_v53, %v2857_v23  ;;  %v11696_v23 = vld [vmem:[#allocation11_spill] sm:$0xff]  ;;  %v11699_v53 = vld [vmem:[#allocation29_spill] sm:$0xff] }
 0x224   : > { %v3312_v8 = vmax.f32 %v3276_v40, 0.0  ;;  %v8145_v10 = vpop.f32.mrf.mxu0  ;;  %v3559_v17 = vmul.f32 %v10139_v24, %v3307_v7  ;;  %v10310_v61 = vadd.f32 %v11696_v23, %v1225_v39  ;;  %v2201_v31 = vadd.f32 %v11697_v59, %v1869_v27  ;;  %v8781_v39 = vld [vmem:[%s11627_s4 + $0xb0] sm:$0xff]  }
 0x225   : > { %v3310_v20 = vmax.f32 %v3274_v16, 0.0  ;;  %v3277_v12 = vadd.f32 %v10224_v63, %v3234_v52  ;;  %v3232_v36 = vmul.f32 %v10213_v34, %v3189_v58  ;;  %v3194_v35 = vadd.f32 %v8145_v10, %v2862_v26  ;;  %v11698_v26 = vld [vmem:[#allocation16_spill] sm:$0xff]  ;;  %v10331_v58 = vpop.f32.mrf.mxu1  ;;  %v11702_v10 = vld [vmem:[#allocation31_spill] sm:$0xff]  ;;  %v11705_v59 = vld [vmem:[#allocation33_spill] sm:$0xff] }
 0x226   : > { %v10316_v3 = vmul.f32 %v10170_v6, %v3312_v8  ;;  %v3073_v24 = vpop.f32.mrf.mxu0  ;;  %3603 = vst [vmem:[#allocation2 + $0x1b] sm:$0xff] %v3559_v17  ;;  %v3638_v7 = vpack.c.bf16 %v3559_v17, %v3558_v38  ;;  %v10324_v27 = vadd.f32 %v11698_v26, %v1873_v19  ;;  %v2863_v6 = vadd.f32 %v10113_v46, %v11699_v53  ;;  %v11700_v46 = vld [vmem:[#allocation17_spill] sm:$0xff]  ;;  %v11703_v17 = vld [vmem:[#allocation43_spill] sm:$0xff] }
 0x227   : > { %v3313_v15 = vmax.f32 %v3277_v12, 0.0  ;;  %v3275_v14 = vadd.f32 %v10224_v63, %v3232_v36  ;;  %v3237_v62 = vmul.f32 %v10213_v34, %v3194_v35  ;;  %v3192_v40 = vadd.f32 %v3073_v24, %v2860_v54  ;;  %v10345_v36 = vpop.permute.xlu1 %3465 }
 0x228   : > { %v2861_v16 = vadd.f32 %v10120_v45, %v2529_v42  ;;  %3608 = vst [vmem:[#allocation2 + $0x43] sm:$0xff] %v10316_v3  ;;  %8239 = vmatprep.mubr.bf16.mxu0 %v3638_v7  ;;  %v8146_v38 = vpop.f32.mrf.mxu0  ;;  %v3562_v52 = vmul.f32 %v10156_v4, %v3310_v20  ;;  %v1877_v45 = vadd.f32 %v11700_v46, %v10246_v28  ;;  %v11701_v42 = vld [vmem:[#allocation40_spill] sm:$0xff]  ;;  %v3675_v26 = vld [vmem:[#allocation2 + $0x10] sm:$0xff] }
 0x229   : > { %v10334_v49 = vmul.f32 %v10181_v22, %v3313_v15  ;;  %v3311_v54 = vmax.f32 %v3275_v14, 0.0  ;;  %v3280_v19 = vadd.f32 %v10224_v63, %v3237_v62  ;;  %v3235_v47 = vmul.f32 %v10213_v34, %v3192_v40  ;;  %8240 = vmatmul.mubr.bf16.vlgmr.msra.gmra.mxu0 %v3639_v2  ;;  %v11704_v22 = vld [vmem:[#allocation26_spill] sm:$0xff]  ;;  %v11706_v7 = vld [vmem:[#allocation32_spill] sm:$0xff]  ;;  %v10356_v14 = vpop.permute.xlu0 %3470 }
 0x22a   : > { %v2866_v8 = vadd.f32 %v11701_v42, %v10093_v11  ;;  %v2864_v4 = vadd.f32 %v11703_v17, %v11702_v10  ;;  %v3195_v20 = vadd.f32 %v8146_v38, %v2863_v6  ;;  %v3076_v12 = vpop.f32.mrf.mxu0  ;;  %3606 = vst [vmem:[#allocation2 + $0x33] sm:$0xff] %v3562_v52  ;;  %8328 = vmatpush3.bf16.msra.mxu0 %v11704_v22  ;;  %v8782_v11 = vld [vmem:[%s11627_s4 + $0xa8] sm:$0xff]  }
 0x22b   : > { %3609 = vst [vmem:[#allocation2 + $0x4b] sm:$0xff] %v10334_v49  ;;  %v3316_v35 = vmax.f32 %v3280_v19, 0.0  ;;  %v3278_v2 = vadd.f32 %v10224_v63, %v3235_v47  ;;  %v3193_v23 = vadd.f32 %v3076_v12, %v2861_v16  ;;  %v3563_v28 = vmul.f32 %v10165_v56, %v3311_v54  ;;  %8329 = vmatprep.subr.bf16.mxu0 %v8781_v39  ;;  %v10361_v56 = vpop.f32.mrf.mxu1  ;;  %v3678_v19 = vld [vmem:[#allocation2 + $0x28] sm:$0xff] }
 0x22c   : > { %v2533_v24 = vadd.f32 %v11705_v59, %v2201_v31  ;;  %v2867_v15 = vadd.f32 %v10151_v5, %v11706_v7  ;;  %v3238_v62 = vmul.f32 %v10213_v34, %v3195_v20  ;;  %v8149_v40 = vpop.f32.mrf.mxu0  ;;  %v3641_v53 = vpack.c.bf16 %v10334_v49, %v10316_v3  ;;  %v8776_v20 = vld [vmem:[%s11627_s4 + $0x70] sm:$0xff]   ;;  %v11708_v22 = vld [vmem:[#allocation20_spill] sm:$0xff] }
 0x22d   : > { %v10364_v6 = vmul.f32 %v10208_v30, %v3316_v35  ;;  %v3314_v16 = vmax.f32 %v3278_v2, 0.0  ;;  %v3236_v31 = vmul.f32 %v10213_v34, %v3193_v23  ;;  %v3198_v38 = vadd.f32 %v8149_v40, %v2866_v8  ;;  %v3676_v54 = vld [vmem:[#allocation2 + $0x18] sm:$0xff]  ;;  %3607 = vst [vmem:[#allocation2 + $0x3b] sm:$0xff] %v3563_v28  ;;  %v3677_v5 = vld [vmem:[#allocation2 + $0x20] sm:$0xff]  ;;  %v10386_v23 = vpop.f32.mrf.mxu1 }
 0x22e   : > { %v3281_v47 = vadd.f32 %v10224_v63, %v3238_v62  ;;  %v3089_v46 = vpop.f32.mrf.mxu0  ;;  %v3710_v42 = vpack.c.bf16 %v3676_v54, %v3675_v26  ;;  %v3640_v10 = vpack.c.bf16 %v3563_v28, %v3562_v52  ;;  %v3711_v17 = vpack.c.bf16 %v3678_v19, %v3677_v5  ;;  %8330 = vmatpush3.bf16.msra.mxu0 %v8781_v39  ;;  %v8784_v52 = vld [vmem:[%s11627_s4 + $0xa0] sm:$0xff]   ;;  %v11707_v39 = vld [vmem:[#allocation18_spill] sm:$0xff]  ;;  %v10388_v28 = vpop.permute.xlu1 %3475 }
 0x22f   : > { %3612 = vst [vmem:[#allocation2 + $0x63] sm:$0xff] %v10364_v6  ;;  %v3279_v30 = vadd.f32 %v10224_v63, %v3236_v31  ;;  %v3241_v3 = vmul.f32 %v10213_v34, %v3198_v38  ;;  %v3196_v49 = vadd.f32 %v3089_v46, %v2864_v4  ;;  %v10372_v8 = vmul.f32 %v10188_v1, %v3314_v16  ;;  %v11711_v40 = vld [vmem:[#allocation35_spill] sm:$0xff]  ;;  %v10397_v16 = vpop.permute.xlu0 %3480 }
 0x230   : > { %8331 = vmatprep.subr.bf16.mxu0 %v8782_v11  ;;  %v10381_v12 = vadd.f32 %v11707_v39, %v1877_v45  ;;  %v1881_v35 = vadd.f32 %v11708_v22, %v10268_v55  ;;  %v2865_v4 = vadd.f32 %v10160_v33, %v2533_v24  ;;  %v3317_v2 = vmax.f32 %v3281_v47, 0.0  ;;  %8188 = vmatmul.mubr.bf16.vlgmr.msra.gmra.mxu1 %v3710_v42  ;;  %v8150_v1 = vpop.f32.mrf.mxu0  ;;  %v11709_v55 = vld [vmem:[#allocation34_spill] sm:$0xff]  ;;  %v11712_v38 = vld [vmem:[#allocation19_spill] sm:$0xff]  ;;  %v8777_v47 = vld [vmem:[%s11627_s4 + $0x68] sm:$0xff]  }
 0x231   : > { %8243 = vmatprep.mubr.bf16.mxu0 %v3640_v10  ;;  %v3315_v59 = vmax.f32 %v3279_v30, 0.0  ;;  %v3284_v7 = vadd.f32 %v10224_v63, %v3241_v3  ;;  %v3239_v62 = vmul.f32 %v10213_v34, %v3196_v49  ;;  %v3199_v45 = vadd.f32 %v8150_v1, %v2867_v15  ;;  %8191 = vmatprep.mubr.bf16.mxu1 %v3711_v17  ;;  %v11710_v33 = vld [vmem:[#allocation50_spill] sm:$0xff]  ;;  %v10412_v49 = vpop.f32.mrf.mxu1 }
 0x232   : > { %8244 = vmatmul.mubr.bf16.gmra.mxu0 %v3641_v53  ;;  %3610 = vst [vmem:[#allocation2 + $0x53] sm:$0xff] %v10372_v8  ;;  %v2870_v24 = vadd.f32 %v11710_v33, %v11709_v55  ;;  %v2868_v26 = vadd.f32 %v10183_v50, %v11711_v40  ;;  %v3569_v31 = vmul.f32 %v10234_v37, %v3317_v2  ;;  %v3092_v54 = vpop.f32.mrf.mxu0  ;;  %v11713_v50 = vld [vmem:[#allocation37_spill] sm:$0xff]  ;;  %v11714_v37 = vld [vmem:[#allocation36_spill] sm:$0xff] }
 0x233   : > { %8276 = vmatpush3.bf16.msra.mxu1 %v11712_v38  ;;  %8332 = vmatpush3.bf16.msra.mxu0 %v8782_v11  ;;  %v3320_v5 = vmax.f32 %v3284_v7, 0.0  ;;  %v3282_v15 = vadd.f32 %v10224_v63, %v3239_v62  ;;  %v3242_v53 = vmul.f32 %v10213_v34, %v3199_v45  ;;  %v3197_v19 = vadd.f32 %v3092_v54, %v2865_v4  ;;  %v3679_v2 = vld [vmem:[#allocation2 + $0x30] sm:$0xff]  ;;  %v10437_v38 = vpop.permute.xlu0 %3490 }
 0x234   : > { %8277 = vmatprep.subr.bf16.mxu1 %v8776_v20  ;;  %8333 = vmatprep.subr.bf16.mxu0 %v8784_v52  ;;  %v2537_v46 = vadd.f32 %v11713_v50, %v10324_v27  ;;  %v2871_v42 = vadd.f32 %v10194_v41, %v11714_v37  ;;  %3613 = vst [vmem:[#allocation2 + $0x6b] sm:$0xff] %v3569_v31  ;;  %v8153_v11 = vpop.f32.mrf.mxu0  ;;  %v3680_v10 = vld [vmem:[#allocation2 + $0x38] sm:$0xff]  ;;  %v3681_v30 = vld [vmem:[#allocation2 + $0x40] sm:$0xff]  ;;  %v3682_v41 = vld [vmem:[#allocation2 + $0x48] sm:$0xff] }
 0x235   : > { %v3567_v17 = vmul.f32 %v10204_v25, %v3315_v59  ;;  %v3643_v3 = vpack.c.bf16 %v3569_v31, %v10364_v6  ;;  %v10415_v39 = vmul.f32 %v10284_v21, %v3320_v5  ;;  %v3318_v22 = vmax.f32 %v3282_v15, 0.0  ;;  %v8785_v21 = vld [vmem:[%s11627_s4 + $0x98] sm:$0xff]   ;;  %v10423_v6 = vpop.permute.xlu1 %3485 }
 0x236   : > { %v3285_v4 = vadd.f32 %v10224_v63, %v3242_v53  ;;  %v3240_v27 = vmul.f32 %v10213_v34, %v3197_v19  ;;  %v3202_v1 = vadd.f32 %v8153_v11, %v2870_v24  ;;  %v3105_v7 = vpop.f32.mrf.mxu0  ;;  %v3712_v62 = vpack.c.bf16 %v3680_v10, %v3679_v2  ;;  %v11717_v50 = vld [vmem:[#allocation38_spill] sm:$0xff] }
 0x237   : > { %3611 = vst [vmem:[#allocation2 + $0x5b] sm:$0xff] %v3567_v17  ;;  %v3642_v25 = vpack.c.bf16 %v3567_v17, %v10372_v8  ;;  %v3713_v59 = vpack.c.bf16 %v3682_v41, %v3681_v30  ;;  %8278 = vmatpush3.bf16.msra.mxu1 %v8776_v20  ;;  %3616 = vst [vmem:[#allocation2 + $0x83] sm:$0xff] %v10415_v39  ;;  %v3200_v33 = vadd.f32 %v3105_v7, %v2868_v26  ;;  %v8778_v8 = vld [vmem:[%s11627_s4 + $0x60] sm:$0xff]   ;;  %v11715_v20 = vld [vmem:[#allocation21_spill] sm:$0xff] }
 0x238   : > { %v3321_v45 = vmax.f32 %v3285_v4, 0.0  ;;  %v3283_v55 = vadd.f32 %v10224_v63, %v3240_v27  ;;  %v10428_v24 = vmul.f32 %v10249_v48, %v3318_v22  ;;  %8279 = vmatprep.subr.bf16.mxu1 %v8777_v47  ;;  %8334 = vmatpush3.bf16.msra.mxu0 %v8784_v52  ;;  %v10434_v40 = vadd.f32 %v11715_v20, %v1881_v35  ;;  %v8154_v26 = vpop.f32.mrf.mxu0  ;;  %v10440_v48 = vpop.f32.mrf.mxu1  ;;  %v11716_v35 = vld [vmem:[#allocation22_spill] sm:$0xff] }
 0x239   : > { %v2869_v31 = vadd.f32 %v10218_v0, %v2537_v46  ;;  %v3245_v54 = vmul.f32 %v10213_v34, %v3202_v1  ;;  %8192 = vmatmul.mubr.bf16.gmra.mxu1 %v3712_v62  ;;  %8247 = vmatprep.mubr.bf16.mxu0 %v3642_v25  ;;  %v3243_v52 = vmul.f32 %v10213_v34, %v3200_v33  ;;  %v10450_v0 = vld [vmem:[%s11627_s4 + $0x90] sm:$0xff]  }
 0x23a   : > { %v10443_v5 = vmul.f32 %v10303_v32, %v3321_v45  ;;  %v3319_v15 = vmax.f32 %v3283_v55, 0.0  ;;  %v3203_v53 = vadd.f32 %v8154_v26, %v2871_v42  ;;  %8195 = vmatprep.mubr.bf16.mxu1 %v3713_v59  ;;  %8248 = vmatmul.mubr.bf16.gmra.mxu0 %v3643_v3  ;;  %3614 = vst [vmem:[#allocation2 + $0x73] sm:$0xff] %v10428_v24  ;;  %v3108_v37 = vpop.f32.mrf.mxu0  ;;  %v3683_v27 = vld [vmem:[#allocation2 + $0x50] sm:$0xff]  ;;  %v10472_v41 = vpop.f32.mrf.mxu1 }
 0x23b   : > { %v10454_v19 = vadd.f32 %v11716_v35, %v10272_v18  ;;  %v2874_v32 = vadd.f32 %v10236_v57, %v11717_v50  ;;  %v3288_v46 = vadd.f32 %v10224_v63, %v3245_v54  ;;  %8280 = vmatpush3.bf16.msra.mxu1 %v8777_v47  ;;  %8335 = vmatprep.subr.bf16.mxu0 %v8785_v21  ;;  %v8780_v18 = vld [vmem:[%s11627_s4 + $0x58] sm:$0xff]   ;;  %v11718_v57 = vld [vmem:[#allocation39_spill] sm:$0xff]  ;;  %v3686_v59 = vld [vmem:[#allocation2 + $0x68] sm:$0xff]  ;;  %v10479_v45 = vpop.permute.xlu0 %3500 }
 0x23c   : > { %3617 = vst [vmem:[#allocation2 + $0x8b] sm:$0xff] %v10443_v5  ;;  %v3286_v42 = vadd.f32 %v10224_v63, %v3243_v52  ;;  %v3246_v11 = vmul.f32 %v10213_v34, %v3203_v53  ;;  %v3201_v10 = vadd.f32 %v3108_v37, %v2869_v31  ;;  %v3571_v17 = vmul.f32 %v10276_v29, %v3319_v15  ;;  %v11719_v47 = vld [vmem:[#allocation42_spill] sm:$0xff]  ;;  %v8157_v4 = vpop.f32.mrf.mxu0  ;;  %v10474_v29 = vpop.permute.xlu1 %3495  ;;  %v8783_v15 = vld [vmem:[%s11627_s4 + $0x50] sm:$0xff]  }
 0x23d   : > { %8281 = vmatprep.subr.bf16.mxu1 %v8778_v8  ;;  %v2872_v30 = vadd.f32 %v10259_v44, %v11718_v57  ;;  %v2541_v3 = vadd.f32 %v11719_v47, %v10381_v12  ;;  %v3324_v22 = vmax.f32 %v3288_v46, 0.0  ;;  %v3645_v2 = vpack.c.bf16 %v10443_v5, %v10415_v39  ;;  %8336 = vmatpush3.bf16.msra.mxu0 %v8785_v21  ;;  %v11720_v52 = vld [vmem:[#allocation41_spill] sm:$0xff]  ;;  %v10500_v50 = vpop.f32.mrf.mxu1 }
 0x23e   : > { %v3322_v1 = vmax.f32 %v3286_v42, 0.0  ;;  %v3289_v7 = vadd.f32 %v10224_v63, %v3246_v11  ;;  %v3244_v62 = vmul.f32 %v10213_v34, %v3201_v10  ;;  %v3206_v44 = vadd.f32 %v8157_v4, %v2874_v32  ;;  %v3684_v25 = vld [vmem:[#allocation2 + $0x58] sm:$0xff]  ;;  %3615 = vst [vmem:[#allocation2 + $0x7b] sm:$0xff] %v3571_v17  ;;  %v3685_v12 = vld [vmem:[#allocation2 + $0x60] sm:$0xff]  ;;  %8337 = vmatprep.subr.bf16.mxu0 %v10450_v0  ;;  %v3121_v21 = vpop.f32.mrf.mxu0  ;;  %v11722_v11 = vld [vmem:[#allocation45_spill] sm:$0xff] }
 0x23f   : > { %v10482_v39 = vmul.f32 %v10356_v14, %v3324_v22  ;;  %v3714_v55 = vpack.c.bf16 %v3684_v25, %v3683_v27  ;;  %v3644_v33 = vpack.c.bf16 %v3571_v17, %v10428_v24  ;;  %v3715_v20 = vpack.c.bf16 %v3686_v59, %v3685_v12  ;;  %8282 = vmatpush3.bf16.msra.mxu1 %v8778_v8  ;;  %v10493_v14 = vld [vmem:[%s11627_s4 + $0x88] sm:$0xff]   ;;  %v10525_v4 = vpop.permute.xlu0 %3510 }
 0x240   : > { %v3325_v31 = vmax.f32 %v3289_v7, 0.0  ;;  %v3287_v54 = vadd.f32 %v10224_v63, %v3244_v62  ;;  %v3249_v26 = vmul.f32 %v10213_v34, %v3206_v44  ;;  %v3204_v5 = vadd.f32 %v3121_v21, %v2872_v30  ;;  %8283 = vmatprep.subr.bf16.mxu1 %v8780_v18  ;;  %v8158_v53 = vpop.f32.mrf.mxu0  ;;  %v10530_v62 = vpop.f32.mrf.mxu1 }
 0x241   : > { %v2875_v24 = vadd.f32 %v10287_v51, %v11720_v52  ;;  %v2873_v8 = vadd.f32 %v10305_v60, %v2541_v3  ;;  %3620 = vst [vmem:[#allocation2 + $0xa3] sm:$0xff] %v10482_v39  ;;  %8196 = vmatmul.mubr.bf16.gmra.mxu1 %v3714_v55  ;;  %8251 = vmatprep.mubr.bf16.mxu0 %v3644_v33  ;;  %v11721_v51 = vld [vmem:[#allocation44_spill] sm:$0xff]  ;;  %v8790_v52 = vld [vmem:[%s11627_s4 + $0x40] sm:$0xff]  }
 0x242   : > { %v3574_v35 = vmul.f32 %v10313_v9, %v3322_v1  ;;  %v10503_v32 = vmul.f32 %v10388_v28, %v3325_v31  ;;  %v3323_v46 = vmax.f32 %v3287_v54, 0.0  ;;  %v3292_v37 = vadd.f32 %v10224_v63, %v3249_v26  ;;  %8199 = vmatprep.mubr.bf16.mxu1 %v3715_v20  ;;  %8252 = vmatmul.mubr.bf16.gmra.mxu0 %v3645_v2  ;;  %v3124_v9 = vpop.f32.mrf.mxu0  ;;  %v10512_v28 = vpop.permute.xlu1 %3505 }
 0x243   : > { %v3247_v42 = vmul.f32 %v10213_v34, %v3204_v5  ;;  %v2878_v60 = vadd.f32 %v10331_v58, %v11721_v51  ;;  %v2876_v10 = vadd.f32 %v10361_v56, %v11722_v11  ;;  %v3207_v17 = vadd.f32 %v8158_v53, %v2875_v24  ;;  %8284 = vmatpush3.bf16.msra.mxu1 %v8780_v18  ;;  %v8787_v58 = vld [vmem:[%s11627_s4 + $0x48] sm:$0xff]   ;;  %v11723_v56 = vld [vmem:[#allocation47_spill] sm:$0xff]  ;;  %v11724_v18 = vld [vmem:[#allocation46_spill] sm:$0xff] }
 0x244   : > { %3618 = vst [vmem:[#allocation2 + $0x93] sm:$0xff] %v3574_v35  ;;  %8338 = vmatpush3.bf16.msra.mxu0 %v10450_v0  ;;  %3621 = vst [vmem:[#allocation2 + $0xab] sm:$0xff] %v10503_v32  ;;  %v3328_v57 = vmax.f32 %v3292_v37, 0.0  ;;  %v3205_v47 = vadd.f32 %v3124_v9, %v2873_v8  ;;  %v3575_v3 = vmul.f32 %v10345_v36, %v3323_v46  ;;  %8285 = vmatprep.subr.bf16.mxu1 %v8783_v15  ;;  %v8161_v2 = vpop.f32.mrf.mxu0  ;;  %v3690_v59 = vld [vmem:[#allocation2 + $0x88] sm:$0xff]  ;;  %v8789_v5 = vld [vmem:[%s11627_s4 + $0x80] sm:$0xff]   ;;  %v10556_v46 = vpop.f32.mrf.mxu1 }
 0x245   : > { %v3290_v30 = vadd.f32 %v10224_v63, %v3247_v42  ;;  %8339 = vmatprep.subr.bf16.mxu0 %v10493_v14  ;;  %v2545_v0 = vadd.f32 %v11723_v56, %v10434_v40  ;;  %v2879_v22 = vadd.f32 %v10386_v23, %v11724_v18  ;;  %v3250_v27 = vmul.f32 %v10213_v34, %v3207_v17  ;;  %v3688_v1 = vld [vmem:[#allocation2 + $0x78] sm:$0xff]  ;;  %v3689_v36 = vld [vmem:[#allocation2 + $0x80] sm:$0xff]  ;;  %v3687_v23 = vld [vmem:[#allocation2 + $0x70] sm:$0xff]  ;;  %v10565_v17 = vpop.permute.xlu0 %3520 }
 0x246   : > { %v3647_v7 = vpack.c.bf16 %v10503_v32, %v10482_v39  ;;  %v10533_v44 = vmul.f32 %v10437_v38, %v3328_v57  ;;  %v3248_v40 = vmul.f32 %v10213_v34, %v3205_v47  ;;  %v3210_v12 = vadd.f32 %v8161_v2, %v2878_v60  ;;  %3619 = vst [vmem:[#allocation2 + $0x9b] sm:$0xff] %v3575_v3  ;;  %v3137_v55 = vpop.f32.mrf.mxu0  ;;  %v11726_v8 = vld [vmem:[#allocation24_spill] sm:$0xff]  ;;  %v3516_v37 = vpop.permute.xlu1 %3515 }
 0x247   : > { %v3326_v25 = vmax.f32 %v3290_v30, 0.0  ;;  %v3293_v21 = vadd.f32 %v10224_v63, %v3250_v27  ;;  %v3716_v33 = vpack.c.bf16 %v3688_v1, %v3687_v23  ;;  %v3646_v20 = vpack.c.bf16 %v3575_v3, %v3574_v35  ;;  %8286 = vmatpush3.bf16.msra.mxu1 %v8783_v15  ;;  %v11725_v15 = vld [vmem:[#allocation23_spill] sm:$0xff]  ;;  %v2837_v1 = vpop.f32.mrf.mxu1 }
 0x248   : > { %v3717_v31 = vpack.c.bf16 %v3690_v59, %v3689_v36  ;;  %3624 = vst [vmem:[#allocation2 + $0xc3] sm:$0xff] %v10533_v44  ;;  %v3291_v39 = vadd.f32 %v10224_v63, %v3248_v40  ;;  %v3253_v38 = vmul.f32 %v10213_v34, %v3210_v12  ;;  %v3208_v54 = vadd.f32 %v3137_v55, %v2876_v10  ;;  %v8162_v32 = vpop.f32.mrf.mxu0 }
 0x249   : > { %v10541_v26 = vmul.f32 %v10397_v16, %v3326_v25  ;;  %8287 = vmatprep.subr.bf16.mxu1 %v8787_v58  ;;  %v2217_v24 = vadd.f32 %v11725_v15, %v10454_v19  ;;  %v10553_v53 = vadd.f32 %v11726_v8, %v10310_v61  ;;  %v2877_v35 = vadd.f32 %v10412_v49, %v2545_v0  ;;  %v11727_v61 = vld [vmem:[#allocation48_spill] sm:$0xff]  ;;  %v11728_v19 = vld [vmem:[#allocation49_spill] sm:$0xff]  ;;  %v8118_v15 = vpop.f32.mrf.mxu1 }
 0x24a   : > { %v3329_v16 = vmax.f32 %v3293_v21, 0.0  ;;  %8200 = vmatmul.mubr.bf16.gmra.mxu1 %v3716_v33  ;;  %8255 = vmatprep.mubr.bf16.mxu0 %v3646_v20  ;;  %v3327_v42 = vmax.f32 %v3291_v39, 0.0  ;;  %v3296_v51 = vadd.f32 %v10224_v63, %v3253_v38  ;;  %v3251_v60 = vmul.f32 %v10213_v34, %v3208_v54  ;;  %v3140_v57 = vpop.f32.mrf.mxu0  ;;  %v3531_v54 = vpop.permute.xlu0 %3530 }
 0x24b   : > { %v3211_v11 = vadd.f32 %v8162_v32, %v2879_v22  ;;  %8203 = vmatprep.mubr.bf16.mxu1 %v3717_v31  ;;  %8256 = vmatmul.mubr.bf16.gmra.mxu0 %v3647_v7  ;;  %3622 = vst [vmem:[#allocation2 + $0xb3] sm:$0xff] %v10541_v26  ;;  %v2882_v49 = vadd.f32 %v10440_v48, %v11727_v61  ;;  %v10574_v48 = vld [vmem:[%s11627_s4 + $0x178] sm:$0xff]   ;;  %v3691_v12 = vld [vmem:[#allocation2 + $0x90] sm:$0xff]  ;;  %v3694_v23 = vld [vmem:[#allocation2 + $0xa8] sm:$0xff] }
 0x24c   : > { %v2880_v10 = vadd.f32 %v10472_v41, %v11728_v19  ;;  %v3581_v9 = vmul.f32 %v10474_v29, %v3329_v16  ;;  %8288 = vmatpush3.bf16.msra.mxu1 %v8787_v58  ;;  %8340 = vmatpush3.bf16.msra.mxu0 %v10493_v14  ;;  %v3332_v30 = vmax.f32 %v3296_v51, 0.0  ;;  %v3294_v47 = vadd.f32 %v10224_v63, %v3251_v60  ;;  %v11729_v41 = vld [vmem:[#allocation52_spill] sm:$0xff]  ;;  %v11730_v29 = vld [vmem:[#allocation51_spill] sm:$0xff]  ;;  %v8165_v14 = vpop.f32.mrf.mxu0 }
 0x24d   : > { %v3254_v3 = vmul.f32 %v10213_v34, %v3211_v11  ;;  %v3209_v56 = vadd.f32 %v3140_v57, %v2877_v35  ;;  %8341 = vmatprep.subr.bf16.mxu0 %v8789_v5  ;;  %8289 = vmatprep.subr.bf16.mxu1 %v8790_v52  ;;  %v2549_v0 = vadd.f32 %v11729_v41, %v2217_v24  ;;  %v3692_v18 = vld [vmem:[#allocation2 + $0x98] sm:$0xff]  ;;  %v3693_v27 = vld [vmem:[#allocation2 + $0xa0] sm:$0xff] }
 0x24e   : > { %v2883_v58 = vadd.f32 %v10500_v50, %v11730_v29  ;;  %3625 = vst [vmem:[#allocation2 + $0xcb] sm:$0xff] %v3581_v9  ;;  %v3579_v22 = vmul.f32 %v10423_v6, %v3327_v42  ;;  %v3649_v2 = vpack.c.bf16 %v3581_v9, %v10533_v44  ;;  %v10582_v36 = vmul.f32 %v10525_v4, %v3332_v30  ;;  %v3153_v59 = vpop.f32.mrf.mxu0  ;;  %v10590_v4 = vld [vmem:[%s11627_s4 + $0xf8] sm:$0xff]   ;;  %v10592_v44 = vpop.permute.xlu1 %3525 }
 0x24f   : > { %v3330_v7 = vmax.f32 %v3294_v47, 0.0  ;;  %v3297_v25 = vadd.f32 %v10224_v63, %v3254_v3  ;;  %v3252_v40 = vmul.f32 %v10213_v34, %v3209_v56  ;;  %v3214_v50 = vadd.f32 %v8165_v14, %v2882_v49  ;;  %v11732_v49 = vld [vmem:[#allocation54_spill] sm:$0xff]  ;;  %v2840_v9 = vpop.f32.mrf.mxu1 }
 0x250   : > { %v3718_v21 = vpack.c.bf16 %v3692_v18, %v3691_v12  ;;  %3623 = vst [vmem:[#allocation2 + $0xbb] sm:$0xff] %v3579_v22  ;;  %v3648_v6 = vpack.c.bf16 %v3579_v22, %v10541_v26  ;;  %v3719_v55 = vpack.c.bf16 %v3694_v23, %v3693_v27  ;;  %8342 = vmatpush3.bf16.msra.mxu0 %v8789_v5  ;;  %3628 = vst [vmem:[#allocation2 + $0xe3] sm:$0xff] %v10582_v36  ;;  %v8166_v5 = vpop.f32.mrf.mxu0 }
 0x251   : > { %v3333_v33 = vmax.f32 %v3297_v25, 0.0  ;;  %v3295_v20 = vadd.f32 %v10224_v63, %v3252_v40  ;;  %v3212_v31 = vadd.f32 %v3153_v59, %v2880_v10  ;;  %v3582_v39 = vmul.f32 %v10479_v45, %v3330_v7  ;;  %8290 = vmatpush3.bf16.msra.mxu1 %v8790_v52  ;;  %8431 = vmatprep.subr.bf16.mxu0 %v10574_v48  ;;  %v11731_v45 = vld [vmem:[#allocation25_spill] sm:$0xff] }
 0x252   : > { %v2881_v38 = vadd.f32 %v10530_v62, %v2549_v0  ;;  %v3257_v26 = vmul.f32 %v10213_v34, %v3214_v50  ;;  %8204 = vmatmul.mubr.bf16.gmra.mxu1 %v3718_v21  ;;  %8259 = vmatprep.mubr.bf16.mxu0 %v3648_v6  ;;  %v3215_v16 = vadd.f32 %v8166_v5, %v2883_v58  ;;  %v3156_v42 = vpop.f32.mrf.mxu0  ;;  %v3536_v57 = vpop.permute.xlu1 %3535  ;;  %v11733_v7 = vld [vmem:[#allocation53_spill] sm:$0xff] }
 0x253   : > { %v3585_v24 = vmul.f32 %v3516_v37, %v3333_v33  ;;  %v3331_v8 = vmax.f32 %v3295_v20, 0.0  ;;  %v3255_v35 = vmul.f32 %v10213_v34, %v3212_v31  ;;  %8207 = vmatprep.mubr.bf16.mxu1 %v3719_v55  ;;  %8260 = vmatmul.mubr.bf16.gmra.mxu0 %v3649_v2  ;;  %3626 = vst [vmem:[#allocation2 + $0xd3] sm:$0xff] %v3582_v39 }
 0x254   : > { %v2221_v52 = vadd.f32 %v11731_v45, %v10553_v53  ;;  %v2886_v62 = vadd.f32 %v10556_v46, %v10186_v43  ;;  %v3300_v32 = vadd.f32 %v10224_v63, %v3257_v26  ;;  %8379 = vmatprep.subr.bf16.mxu1 %v10590_v4  ;;  %v3258_v51 = vmul.f32 %v10213_v34, %v3215_v16  ;;  %v8169_v10 = vpop.f32.mrf.mxu0  ;;  %v3695_v43 = vld [vmem:[#allocation2 + $0xb0] sm:$0xff] }
 0x255   : > { %3629 = vst [vmem:[#allocation2 + $0xeb] sm:$0xff] %v3585_v24  ;;  %v3298_v37 = vadd.f32 %v10224_v63, %v3255_v35  ;;  %v3213_v60 = vadd.f32 %v3156_v42, %v2881_v38  ;;  %v3583_v11 = vmul.f32 %v10512_v28, %v3331_v8  ;;  %v2884_v61 = vadd.f32 %v2837_v1, %v10192_v13  ;;  %v3698_v0 = vld [vmem:[#allocation2 + $0xc8] sm:$0xff]  ;;  %v3541_v13 = vpop.permute.xlu0 %3540 }
 0x256   : > { %v2553_v53 = vadd.f32 %v11732_v49, %v2221_v52  ;;  %v3336_v19 = vmax.f32 %v3300_v32, 0.0  ;;  %v3651_v46 = vpack.c.bf16 %v3585_v24, %v10582_v36  ;;  %v3301_v47 = vadd.f32 %v10224_v63, %v3258_v51  ;;  %v3169_v58 = vpop.f32.mrf.mxu0  ;;  %v3546_v20 = vpop.permute.xlu1 %3545 }
 0x257   : > { %v3334_v30 = vmax.f32 %v3298_v37, 0.0  ;;  %v3256_v3 = vmul.f32 %v10213_v34, %v3213_v60  ;;  %v3218_v56 = vadd.f32 %v8169_v10, %v2886_v62  ;;  %v3696_v41 = vld [vmem:[#allocation2 + $0xb8] sm:$0xff]  ;;  %3627 = vst [vmem:[#allocation2 + $0xdb] sm:$0xff] %v3583_v11  ;;  %v3697_v28 = vld [vmem:[#allocation2 + $0xc0] sm:$0xff]  ;;  %v3650_v18 = vpack.c.bf16 %v3583_v11, %v3582_v39  ;;  %v4526_v10 = vld [vmem:[#allocation2 + $0xa] sm:$0xff] }
 0x258   : > { %v3588_v29 = vmul.f32 %v3531_v54, %v3336_v19  ;;  %v3720_v14 = vpack.c.bf16 %v3696_v41, %v3695_v43  ;;  %v3721_v22 = vpack.c.bf16 %v3698_v0, %v3697_v28  ;;  %v3337_v27 = vmax.f32 %v3301_v47, 0.0  ;;  %v8170_v12 = vpop.f32.mrf.mxu0  ;;  %v4525_v19 = vld [vmem:[#allocation2 + $0x2] sm:$0xff] }
 0x259   : > { %v3299_v2 = vadd.f32 %v10224_v63, %v3256_v3  ;;  %v3261_v1 = vmul.f32 %v10213_v34, %v3218_v56  ;;  %v3216_v36 = vadd.f32 %v3169_v58, %v2884_v61  ;;  %v2887_v25 = vadd.f32 %v8118_v15, %v11733_v7  ;;  %8263 = vmatprep.mubr.bf16.mxu0 %v3650_v18  ;;  %v4193_v56 = vld [vmem:[#allocation2 + $0x1] sm:$0xff]  ;;  %v4194_v41 = vld [vmem:[#allocation2 + $0x9] sm:$0xff]  ;;  %v4527_v18 = vld [vmem:[#allocation2 + $0x12] sm:$0xff] }
 0x25a   : > { %v2885_v40 = vadd.f32 %v2840_v9, %v2553_v53  ;;  %3632 = vst [vmem:[#allocation2 + $0x103] sm:$0xff] %v3588_v29  ;;  %8208 = vmatmul.mubr.bf16.gmra.mxu1 %v3720_v14  ;;  %v3586_v23 = vmul.f32 %v10565_v17, %v3334_v30  ;;  %v3589_v50 = vmul.f32 %v3536_v57, %v3337_v27  ;;  %v3172_v33 = vpop.f32.mrf.mxu0  ;;  %v3551_v17 = vpop.permute.xlu0 %3550  ;;  %v3699_v5 = vld [vmem:[#allocation2 + $0xd0] sm:$0xff]  ;;  %v4529_v58 = vld [vmem:[#allocation2 + $0x22] sm:$0xff] }
 0x25b   : > { %v3335_v59 = vmax.f32 %v3299_v2, 0.0  ;;  %v3304_v21 = vadd.f32 %v10224_v63, %v3261_v1  ;;  %v3259_v6 = vmul.f32 %v10213_v34, %v3216_v36  ;;  %8211 = vmatprep.mubr.bf16.mxu1 %v3721_v22  ;;  %8264 = vmatmul.mubr.bf16.gmra.mxu0 %v3651_v46  ;;  %v3219_v55 = vadd.f32 %v8170_v12, %v2887_v25  ;;  %v3556_v11 = vpop.permute.xlu1 %3555  ;;  %v4530_v27 = vld [vmem:[#allocation2 + $0x2a] sm:$0xff]  ;;  %v4196_v36 = vld [vmem:[#allocation2 + $0x19] sm:$0xff]  ;;  %v4197_v25 = vld [vmem:[#allocation2 + $0x21] sm:$0xff] }
 0x25c   : > { %3630 = vst [vmem:[#allocation2 + $0xf3] sm:$0xff] %v3586_v23  ;;  %3633 = vst [vmem:[#allocation2 + $0x10b] sm:$0xff] %v3589_v50  ;;  %v3217_v38 = vadd.f32 %v3172_v33, %v2885_v40  ;;  %v3653_v8 = vpack.c.bf16 %v3589_v50, %v3588_v29  ;;  %v3702_v62 = vld [vmem:[#allocation2 + $0xe8] sm:$0xff]  ;;  %v4561_v3 = vpack.c.bf16 %v4526_v10, %v4525_v19  ;;  %v8797_v2 = vld [vmem:[%s11627_s4 + $0x170] sm:$0xff]  }
 0x25d   : > { %v3340_v31 = vmax.f32 %v3304_v21, 0.0  ;;  %v3302_v39 = vadd.f32 %v10224_v63, %v3259_v6  ;;  %v3587_v54 = vmul.f32 %v10592_v44, %v3335_v59  ;;  %v3262_v26 = vmul.f32 %v10213_v34, %v3219_v55  ;;  %v8798_v7 = vld [vmem:[%s11627_s4 + $0x168] sm:$0xff]   ;;  %v4532_v40 = vld [vmem:[#allocation2 + $0x3a] sm:$0xff]  ;;  %v4195_v12 = vld [vmem:[#allocation2 + $0x11] sm:$0xff] }
 0x25e   : > { %v3700_v15 = vld [vmem:[#allocation2 + $0xd8] sm:$0xff]  ;;  %v3701_v24 = vld [vmem:[#allocation2 + $0xe0] sm:$0xff]  ;;  %v3260_v45 = vmul.f32 %v10213_v34, %v3217_v38  ;;  %v4229_v14 = vpack.c.bf16 %v4194_v41, %v4193_v56  ;;  %v10632_v1 = vpack.c.bf16 %v4530_v27, %v4529_v58  ;;  %v4230_v50 = vpack.c.bf16 %v4196_v36, %v4195_v12  ;;  %v4198_v59 = vld [vmem:[#allocation2 + $0x29] sm:$0xff] }
 0x25f   : > { %v3592_v35 = vmul.f32 %v3551_v17, %v3340_v31  ;;  %v3338_v16 = vmax.f32 %v3302_v39, 0.0  ;;  %v3722_v52 = vpack.c.bf16 %v3700_v15, %v3699_v5  ;;  %3631 = vst [vmem:[#allocation2 + $0xfb] sm:$0xff] %v3587_v54  ;;  %v3305_v32 = vadd.f32 %v10224_v63, %v3262_v26  ;;  %v4531_v21 = vld [vmem:[#allocation2 + $0x32] sm:$0xff]  ;;  %v4534_v33 = vld [vmem:[#allocation2 + $0x4a] sm:$0xff]  ;;  %v8800_v31 = vld [vmem:[%s11627_s4 + $0x160] sm:$0xff]  }
 0x260   : > { %v3652_v42 = vpack.c.bf16 %v3587_v54, %v3586_v23  ;;  %v3723_v37 = vpack.c.bf16 %v3702_v62, %v3701_v24  ;;  %v3303_v44 = vadd.f32 %v10224_v63, %v3260_v45  ;;  %v4533_v23 = vld [vmem:[#allocation2 + $0x42] sm:$0xff]  ;;  %v4231_v6 = vpack.c.bf16 %v4198_v59, %v4197_v25  ;;  %v4200_v39 = vld [vmem:[#allocation2 + $0x39] sm:$0xff]  ;;  %v4199_v5 = vld [vmem:[#allocation2 + $0x31] sm:$0xff] }
 0x261   : > { %3636 = vst [vmem:[#allocation2 + $0x123] sm:$0xff] %v3592_v35  ;;  %v3590_v51 = vmul.f32 %v3541_v13, %v3338_v16  ;;  %v3341_v60 = vmax.f32 %v3305_v32, 0.0  ;;  %v4528_v13 = vld [vmem:[#allocation2 + $0x1a] sm:$0xff]  ;;  %v10640_v55 = vpack.c.bf16 %v4532_v40, %v4531_v21  ;;  %v8793_v38 = vld [vmem:[%s11627_s4 + $0xe8] sm:$0xff]   ;;  %v4232_v24 = vpack.c.bf16 %v4200_v39, %v4199_v5  ;;  %v8802_v32 = vld [vmem:[%s11627_s4 + $0x150] sm:$0xff]  }
 0x262   : > { %8212 = vmatmul.mubr.bf16.gmra.mxu1 %v3722_v52  ;;  %8267 = vmatprep.mubr.bf16.mxu0 %v3652_v42  ;;  %v3339_v61 = vmax.f32 %v3303_v44, 0.0  ;;  %v10627_v22 = vpack.c.bf16 %v4528_v13, %v4527_v18  ;;  %v4201_v54 = vld [vmem:[#allocation2 + $0x41] sm:$0xff]  ;;  %v8801_v26 = vld [vmem:[%s11627_s4 + $0x158] sm:$0xff]   ;;  %v4538_v45 = vld [vmem:[#allocation2 + $0x6a] sm:$0xff] }
 0x263   : > { %8215 = vmatprep.mubr.bf16.mxu1 %v3723_v37  ;;  %8268 = vmatmul.mubr.bf16.gmra.mxu0 %v3653_v8  ;;  %3634 = vst [vmem:[#allocation2 + $0x113] sm:$0xff] %v3590_v51  ;;  %v3593_v34 = vmul.f32 %v3556_v11, %v3341_v60  ;;  %v3703_v49 = vld [vmem:[#allocation2 + $0xf0] sm:$0xff]  ;;  %v3706_v9 = vld [vmem:[#allocation2 + $0x108] sm:$0xff]  ;;  %v4536_v17 = vld [vmem:[#allocation2 + $0x5a] sm:$0xff] }
 0x264   : > { %v3591_v53 = vmul.f32 %v3546_v20, %v3339_v61  ;;  %v10645_v20 = vpack.c.bf16 %v4534_v33, %v4533_v23  ;;  %v4537_v15 = vld [vmem:[#allocation2 + $0x62] sm:$0xff]  ;;  %v4535_v8 = vld [vmem:[#allocation2 + $0x52] sm:$0xff]  ;;  %v4546_v18 = vld [vmem:[#allocation2 + $0xaa] sm:$0xff] }
 0x265   : > { %3637 = vst [vmem:[#allocation2 + $0x12b] sm:$0xff] %v3593_v34  ;;  %v3655_v57 = vpack.c.bf16 %v3593_v34, %v3592_v35  ;;  %v10659_v16 = vpack.c.bf16 %v4536_v17, %v4535_v8  ;;  %v8794_v52 = vld [vmem:[%s11627_s4 + $0xe0] sm:$0xff]   ;;  %v10664_v62 = vpack.c.bf16 %v4538_v45, %v4537_v15  ;;  %v8796_v37 = vld [vmem:[%s11627_s4 + $0xd8] sm:$0xff]   ;;  %v8804_v60 = vld [vmem:[%s11627_s4 + $0x148] sm:$0xff]  }
 0x266   : > { %v3704_v43 = vld [vmem:[#allocation2 + $0xf8] sm:$0xff]  ;;  %v3705_v46 = vld [vmem:[#allocation2 + $0x100] sm:$0xff]  ;;  %3635 = vst [vmem:[#allocation2 + $0x11b] sm:$0xff] %v3591_v53  ;;  %v3654_v30 = vpack.c.bf16 %v3591_v53, %v3590_v51  ;;  %v4210_v13 = vld [vmem:[#allocation2 + $0x89] sm:$0xff] }
 0x267   : > { %v3724_v63 = vpack.c.bf16 %v3704_v43, %v3703_v49  ;;  %v3725_v47 = vpack.c.bf16 %v3706_v9, %v3705_v46  ;;  %v4204_v42 = vld [vmem:[#allocation2 + $0x59] sm:$0xff]  ;;  %v4205_v44 = vld [vmem:[#allocation2 + $0x61] sm:$0xff]  ;;  %v4203_v11 = vld [vmem:[#allocation2 + $0x51] sm:$0xff] }
 0x268   : > { %8271 = vmatprep.mubr.bf16.mxu0 %v3654_v30  ;;  %v4540_v51 = vld [vmem:[#allocation2 + $0x7a] sm:$0xff]  ;;  %v4541_v61 = vld [vmem:[#allocation2 + $0x82] sm:$0xff]  ;;  %v4234_v34 = vpack.c.bf16 %v4204_v42, %v4203_v11  ;;  %v4539_v53 = vld [vmem:[#allocation2 + $0x72] sm:$0xff] }
 0x269   : > { %v4206_v49 = vld [vmem:[#allocation2 + $0x69] sm:$0xff]  ;;  %v10677_v10 = vpack.c.bf16 %v4540_v51, %v4539_v53  ;;  %v10695_v56 = vld [vmem:[%s11627_s4 + $0x1f8] sm:$0xff]   ;;  %v8806_v27 = vld [vmem:[%s11627_s4 + $0xc0] sm:$0xff]  }
 0x26a   : > { %8216 = vmatmul.mubr.bf16.gmra.mxu1 %v3724_v63  ;;  %v3707_v28 = vld [vmem:[#allocation2 + $0x110] sm:$0xff]  ;;  %v4235_v19 = vpack.c.bf16 %v4206_v49, %v4205_v44  ;;  %v4208_v63 = vld [vmem:[#allocation2 + $0x79] sm:$0xff]  ;;  %v8803_v30 = vld [vmem:[%s11627_s4 + $0xc8] sm:$0xff]  }
 0x26b   : > { %8219 = vmatprep.mubr.bf16.mxu1 %v3725_v47  ;;  %8272 = vmatmul.mubr.bf16.gmra.mxu0 %v3655_v57  ;;  %v4542_v43 = vld [vmem:[#allocation2 + $0x8a] sm:$0xff]  ;;  %v8805_v57 = vld [vmem:[%s11627_s4 + $0x140] sm:$0xff]   ;;  %v4547_v21 = vld [vmem:[#allocation2 + $0xb2] sm:$0xff] }
 0x26c   : > { %8343 = vmatprep.mubr.bf16.mxu0 %v4561_v3  ;;  %v8799_v46 = vld [vmem:[%s11627_s4 + $0xd0] sm:$0xff]   ;;  %v10682_v9 = vpack.c.bf16 %v4542_v43, %v4541_v61  ;;  %v4209_v47 = vld [vmem:[#allocation2 + $0x81] sm:$0xff]  ;;  %v4212_v36 = vld [vmem:[#allocation2 + $0x99] sm:$0xff] }
 0x26d   : > { %v3708_v0 = vld [vmem:[#allocation2 + $0x118] sm:$0xff]  ;;  %v4237_v58 = vpack.c.bf16 %v4210_v13, %v4209_v47  ;;  %v4213_v25 = vld [vmem:[#allocation2 + $0xa1] sm:$0xff]  ;;  %v4214_v59 = vld [vmem:[#allocation2 + $0xa9] sm:$0xff] }
 0x26e   : > { %v3726_v29 = vpack.c.bf16 %v3708_v0, %v3707_v28  ;;  %v4544_v3 = vld [vmem:[#allocation2 + $0x9a] sm:$0xff]  ;;  %v4207_v41 = vld [vmem:[#allocation2 + $0x71] sm:$0xff]  ;;  %v4545_v28 = vld [vmem:[#allocation2 + $0xa2] sm:$0xff] }
 0x26f   : > { %v4236_v0 = vpack.c.bf16 %v4208_v63, %v4207_v41  ;;  %v4548_v40 = vld [vmem:[#allocation2 + $0xba] sm:$0xff]  ;;  %v4211_v12 = vld [vmem:[#allocation2 + $0x91] sm:$0xff]  ;;  %v4549_v23 = vld [vmem:[#allocation2 + $0xc2] sm:$0xff] }
 0x270   : > { %v10712_v33 = vpack.c.bf16 %v4548_v40, %v4547_v21  ;;  %v4216_v39 = vld [vmem:[#allocation2 + $0xb9] sm:$0xff]  ;;  %v4215_v17 = vld [vmem:[#allocation2 + $0xb1] sm:$0xff]  ;;  %v4218_v15 = vld [vmem:[#allocation2 + $0xc9] sm:$0xff] }
 0x271   : > { %v4240_v5 = vpack.c.bf16 %v4216_v39, %v4215_v17  ;;  %v4556_v42 = vld [vmem:[#allocation2 + $0xfa] sm:$0xff]  ;;  %v4557_v44 = vld [vmem:[#allocation2 + $0x102] sm:$0xff]  ;;  %v4555_v11 = vld [vmem:[#allocation2 + $0xf2] sm:$0xff] }
 0x272   : > { %8220 = vmatmul.mubr.bf16.gmra.mxu1 %v3726_v29  ;;  %v4543_v29 = vld [vmem:[#allocation2 + $0x92] sm:$0xff]  ;;  %v4558_v49 = vld [vmem:[#allocation2 + $0x10a] sm:$0xff]  ;;  %v4225_v43 = vld [vmem:[#allocation2 + $0x101] sm:$0xff] }
 0x273   : > { %8344 = vmatmul.mubr.bf16.vlgmr.msra.gmra.mxu0 %v10627_v22  ;;  %8291 = vmatprep.mubr.bf16.mxu1 %v4229_v14  ;;  %v10697_v14 = vpack.c.bf16 %v4544_v3, %v4543_v29  ;;  %v10727_v53 = vpack.c.bf16 %v4558_v49, %v4557_v44  ;;  %v5189_v63 = vld [vmem:[#allocation2 + $0x14] sm:$0xff]  ;;  %v4226_v3 = vld [vmem:[#allocation2 + $0x109] sm:$0xff] }
 0x274   : > { %8347 = vmatprep.mubr.bf16.mxu0 %v10632_v1  ;;  %8432 = vmatpush3.bf16.msra.mxu0 %v10574_v48  ;;  %v8792_v48 = vld [vmem:[%s11627_s4 + $0xf0] sm:$0xff]   ;;  %v4228_v29 = vld [vmem:[#allocation2 + $0x119] sm:$0xff]  ;;  %v5191_v40 = vld [vmem:[#allocation2 + $0x24] sm:$0xff] }
 0x275   : > { %8433 = vmatprep.subr.bf16.mxu0 %v8797_v2  ;;  %v4559_v41 = vld [vmem:[#allocation2 + $0x112] sm:$0xff]  ;;  %v5195_v39 = vld [vmem:[#allocation2 + $0x44] sm:$0xff] }
 0x276   : > { %v5196_v21 = vld [vmem:[#allocation2 + $0x4c] sm:$0xff]  ;;  %v5209_v49 = vld [vmem:[#allocation2 + $0xb4] sm:$0xff] }
 0x277   : > { %v8809_v17 = vld [vmem:[%s11627_s4 + $0x1a8] sm:$0xff]  }
 0x278   : > { %8434 = vmatpush3.bf16.msra.mxu0 %v8797_v2  ;;  %v10702_v2 = vpack.c.bf16 %v4546_v18, %v4545_v28  ;;  %v4245_v28 = vpack.c.bf16 %v4226_v3, %v4225_v43  ;;  %v4227_v18 = vld [vmem:[#allocation2 + $0x111] sm:$0xff]  ;;  %v5207_v43 = vld [vmem:[#allocation2 + $0xa4] sm:$0xff]  ;;  %v5214_v3 = vld [vmem:[#allocation2 + $0xdc] sm:$0xff] }
 0x279   : > { %8435 = vmatprep.subr.bf16.mxu0 %v8798_v7 }
 0x27a   : > { %8292 = vmatmul.mubr.bf16.vlgmr.msra.gmra.mxu1 %v4230_v50  ;;  %v4238_v50 = vpack.c.bf16 %v4212_v36, %v4211_v12  ;;  %v5194_v36 = vld [vmem:[#allocation2 + $0x3c] sm:$0xff] }
 0x27b   : > { %8295 = vmatprep.mubr.bf16.mxu1 %v4231_v6  ;;  %8348 = vmatmul.mubr.bf16.gmra.mxu0 %v10640_v55  ;;  %v4239_v6 = vpack.c.bf16 %v4214_v59, %v4213_v25  ;;  %v4246_v25 = vpack.c.bf16 %v4228_v29, %v4227_v18  ;;  %v8814_v59 = vld [vmem:[%s11627_s4 + $0x1e8] sm:$0xff]   ;;  %v5218_v29 = vld [vmem:[#allocation2 + $0xfc] sm:$0xff] }
 0x27c   : > { %8380 = vmatpush3.bf16.msra.mxu1 %v10590_v4  ;;  %8351 = vmatprep.mubr.bf16.mxu0 %v10645_v20  ;;  %v4202_v4 = vld [vmem:[#allocation2 + $0x49] sm:$0xff] }
 0x27d   : > { %8381 = vmatprep.subr.bf16.mxu1 %v8792_v48  ;;  %8436 = vmatpush3.bf16.msra.mxu0 %v8798_v7  ;;  %v4233_v35 = vpack.c.bf16 %v4202_v4, %v4201_v54  ;;  %v10710_v7 = vld [vmem:[%s11627_s4 + $0x1b8] sm:$0xff]  }
 0x27e   : > { %8437 = vmatprep.subr.bf16.mxu0 %v8800_v31  ;;  %v4552_v54 = vld [vmem:[#allocation2 + $0xda] sm:$0xff] }
 0x280   : > { %8382 = vmatpush3.bf16.msra.mxu1 %v8792_v48  ;;  %v4550_v48 = vld [vmem:[#allocation2 + $0xca] sm:$0xff] }
 0x281   : > { %8383 = vmatprep.subr.bf16.mxu1 %v8793_v38  ;;  %8438 = vmatpush3.bf16.msra.mxu0 %v8800_v31  ;;  %v10715_v31 = vpack.c.bf16 %v4550_v48, %v4549_v23  ;;  %v8813_v23 = vld [vmem:[%s11627_s4 + $0x1f0] sm:$0xff]   ;;  %v5198_v48 = vld [vmem:[#allocation2 + $0x5c] sm:$0xff] }
 0x282   : > { %8296 = vmatmul.mubr.bf16.gmra.mxu1 %v4232_v24  ;;  %8439 = vmatprep.subr.bf16.mxu0 %v8801_v26  ;;  %v4551_v24 = vld [vmem:[#allocation2 + $0xd2] sm:$0xff] }
 0x283   : > { %8299 = vmatprep.mubr.bf16.mxu1 %v4233_v35  ;;  %8352 = vmatmul.mubr.bf16.gmra.mxu0 %v10659_v16  ;;  %v10719_v8 = vpack.c.bf16 %v4552_v54, %v4551_v24  ;;  %v4554_v35 = vld [vmem:[#allocation2 + $0xea] sm:$0xff]  ;;  %v8816_v54 = vld [vmem:[%s11627_s4 + $0x1e0] sm:$0xff]  }
 0x284   : > { %8355 = vmatprep.mubr.bf16.mxu0 %v10664_v62  ;;  %8384 = vmatpush3.bf16.msra.mxu1 %v8793_v38  ;;  %v4217_v38 = vld [vmem:[#allocation2 + $0xc1] sm:$0xff] }
 0x285   : > { %8385 = vmatprep.subr.bf16.mxu1 %v8794_v52  ;;  %8440 = vmatpush3.bf16.msra.mxu0 %v8801_v26  ;;  %v4553_v26 = vld [vmem:[#allocation2 + $0xe2] sm:$0xff]  ;;  %v4241_v4 = vpack.c.bf16 %v4218_v15, %v4217_v38  ;;  %v10748_v38 = vpack.c.bf16 %v5196_v21, %v5195_v39 }
 0x286   : > { %8441 = vmatprep.subr.bf16.mxu0 %v8802_v32  ;;  %v10721_v45 = vpack.c.bf16 %v4554_v35, %v4553_v26  ;;  %v8817_v26 = vld [vmem:[%s11627_s4 + $0x1d8] sm:$0xff]   ;;  %v5199_v15 = vld [vmem:[#allocation2 + $0x64] sm:$0xff]  ;;  %v8818_v35 = vld [vmem:[%s11627_s4 + $0x1d0] sm:$0xff]  }
 0x288   : > { %8386 = vmatpush3.bf16.msra.mxu1 %v8794_v52  ;;  %v4220_v52 = vld [vmem:[#allocation2 + $0xd9] sm:$0xff] }
 0x289   : > { %8387 = vmatprep.subr.bf16.mxu1 %v8796_v37  ;;  %8442 = vmatpush3.bf16.msra.mxu0 %v8802_v32  ;;  %v4221_v32 = vld [vmem:[#allocation2 + $0xe1] sm:$0xff] }
 0x28a   : > { %8300 = vmatmul.mubr.bf16.gmra.mxu1 %v4234_v34  ;;  %8443 = vmatprep.subr.bf16.mxu0 %v8804_v60  ;;  %v10725_v34 = vpack.c.bf16 %v4556_v42, %v4555_v11  ;;  %v5205_v42 = vld [vmem:[#allocation2 + $0x94] sm:$0xff]  ;;  %v8821_v11 = vld [vmem:[%s11627_s4 + $0x1c0] sm:$0xff]  }
 0x28b   : > { %8303 = vmatprep.mubr.bf16.mxu1 %v4235_v19  ;;  %8356 = vmatmul.mubr.bf16.gmra.mxu0 %v10677_v10  ;;  %v4224_v19 = vld [vmem:[#allocation2 + $0xf9] sm:$0xff] }
 0x28c   : > { %8359 = vmatprep.mubr.bf16.mxu0 %v10682_v9  ;;  %8388 = vmatpush3.bf16.msra.mxu1 %v8796_v37  ;;  %v4219_v37 = vld [vmem:[#allocation2 + $0xd1] sm:$0xff] }
 0x28d   : > { %8389 = vmatprep.subr.bf16.mxu1 %v8799_v46  ;;  %8444 = vmatpush3.bf16.msra.mxu0 %v8804_v60  ;;  %v4242_v51 = vpack.c.bf16 %v4220_v52, %v4219_v37  ;;  %v4222_v60 = vld [vmem:[#allocation2 + $0xe9] sm:$0xff]  ;;  %v8812_v52 = vld [vmem:[%s11627_s4 + $0x198] sm:$0xff]  }
 0x28e   : > { %8445 = vmatprep.subr.bf16.mxu0 %v8805_v57  ;;  %v4243_v61 = vpack.c.bf16 %v4222_v60, %v4221_v32  ;;  %v8820_v32 = vld [vmem:[%s11627_s4 + $0x1c8] sm:$0xff]   ;;  %v5206_v37 = vld [vmem:[#allocation2 + $0x9c] sm:$0xff] }
 0x28f   : > { %v10795_v60 = vpack.c.bf16 %v5206_v37, %v5205_v42 }
 0x290   : > { %8390 = vmatpush3.bf16.msra.mxu1 %v8799_v46  ;;  %v4560_v46 = vld [vmem:[#allocation2 + $0x11a] sm:$0xff] }
 0x291   : > { %8391 = vmatprep.subr.bf16.mxu1 %v8803_v30  ;;  %8446 = vmatpush3.bf16.msra.mxu0 %v8805_v57  ;;  %v4223_v57 = vld [vmem:[#allocation2 + $0xf1] sm:$0xff] }
 0x292   : > { %8304 = vmatmul.mubr.bf16.gmra.mxu1 %v4236_v0  ;;  %8535 = vmatprep.subr.bf16.mxu0 %v10695_v56  ;;  %v4244_v47 = vpack.c.bf16 %v4224_v19, %v4223_v57  ;;  %v10731_v0 = vpack.c.bf16 %v4560_v46, %v4559_v41  ;;  %v5210_v19 = vld [vmem:[#allocation2 + $0xbc] sm:$0xff]  ;;  %v5211_v41 = vld [vmem:[#allocation2 + $0xc4] sm:$0xff] }
 0x293   : > { %8307 = vmatprep.mubr.bf16.mxu1 %v4237_v58  ;;  %8360 = vmatmul.mubr.bf16.gmra.mxu0 %v10697_v14  ;;  %v5192_v58 = vld [vmem:[#allocation2 + $0x2c] sm:$0xff]  ;;  %v10812_v57 = vpack.c.bf16 %v5210_v19, %v5209_v49  ;;  %v5855_v19 = vld [vmem:[#allocation2 + $0x35] sm:$0xff] }
 0x294   : > { %8363 = vmatprep.mubr.bf16.mxu0 %v10702_v2  ;;  %8392 = vmatpush3.bf16.msra.mxu1 %v8803_v30  ;;  %v5190_v30 = vld [vmem:[#allocation2 + $0x1c] sm:$0xff]  ;;  %v10734_v12 = vpack.c.bf16 %v5192_v58, %v5191_v40  ;;  %v5215_v58 = vld [vmem:[#allocation2 + $0xe4] sm:$0xff]  ;;  %v5221_v40 = vld [vmem:[#allocation2 + $0x114] sm:$0xff] }
 0x295   : > { %8393 = vmatprep.subr.bf16.mxu1 %v8806_v27  ;;  %v5225_v13 = vpack.c.bf16 %v5190_v30, %v5189_v63  ;;  %v10820_v63 = vld [vmem:[%s11627_s4 + $0x238] sm:$0xff]   ;;  %v5212_v30 = vld [vmem:[#allocation2 + $0xcc] sm:$0xff] }
 0x298   : > { %8394 = vmatpush3.bf16.msra.mxu1 %v8806_v27  ;;  %v5193_v27 = vld [vmem:[#allocation2 + $0x34] sm:$0xff] }
 0x299   : > { %8483 = vmatprep.subr.bf16.mxu1 %v10710_v7 }
 0x29a   : > { %8308 = vmatmul.mubr.bf16.gmra.mxu1 %v4238_v50  ;;  %v10739_v50 = vpack.c.bf16 %v5194_v36, %v5193_v27 }
 0x29b   : > { %8311 = vmatprep.mubr.bf16.mxu1 %v4239_v6  ;;  %8364 = vmatmul.mubr.bf16.gmra.mxu0 %v10712_v33  ;;  %v5197_v6 = vld [vmem:[#allocation2 + $0x54] sm:$0xff] }
 0x29c   : > { %8367 = vmatprep.mubr.bf16.mxu0 %v10715_v31 }
 0x2a2   : > { %8312 = vmatmul.mubr.bf16.gmra.mxu1 %v4240_v5  ;;  %v5201_v5 = vld [vmem:[#allocation2 + $0x74] sm:$0xff] }
 0x2a3   : > { %8315 = vmatprep.mubr.bf16.mxu1 %v4241_v4  ;;  %8368 = vmatmul.mubr.bf16.gmra.mxu0 %v10719_v8 }
 0x2a4   : > { %8371 = vmatprep.mubr.bf16.mxu0 %v10721_v45 }
 0x2aa   : > { %8316 = vmatmul.mubr.bf16.gmra.mxu1 %v4242_v51  ;;  %v8815_v51 = vld [vmem:[%s11627_s4 + $0x190] sm:$0xff]  }
 0x2ab   : > { %8319 = vmatprep.mubr.bf16.mxu1 %v4243_v61  ;;  %8372 = vmatmul.mubr.bf16.gmra.mxu0 %v10725_v34  ;;  %v8819_v61 = vld [vmem:[%s11627_s4 + $0x188] sm:$0xff]  }
 0x2ac   : > { %8375 = vmatprep.mubr.bf16.mxu0 %v10727_v53 }
 0x2b2   : > { %8320 = vmatmul.mubr.bf16.gmra.mxu1 %v4244_v47  ;;  %v5213_v47 = vld [vmem:[#allocation2 + $0xd4] sm:$0xff] }
 0x2b3   : > { %8323 = vmatprep.mubr.bf16.mxu1 %v4245_v28  ;;  %8376 = vmatmul.mubr.bf16.gmra.mxu0 %v10731_v0  ;;  %v5216_v28 = vld [vmem:[#allocation2 + $0xec] sm:$0xff] }
 0x2b4   : > { %8447 = vmatprep.mubr.bf16.mxu0 %v5225_v13  ;;  %v5217_v13 = vld [vmem:[#allocation2 + $0xf4] sm:$0xff]  ;;  %v10831_v18 = vpack.c.bf16 %v5216_v28, %v5215_v58 }
 0x2b5   : > { %v10834_v27 = vpack.c.bf16 %v5218_v29, %v5217_v13  ;;  %v5857_v29 = vld [vmem:[#allocation2 + $0x45] sm:$0xff] }
 0x2ba   : > { %8324 = vmatmul.mubr.bf16.gmra.mxu1 %v4246_v25 }
 0x2bb   : > { %8395 = vmatprep.mubr.bf16.mxu1 %v10627_v22  ;;  %8448 = vmatmul.mubr.bf16.vlgmr.msra.gmra.mxu0 %v10734_v12  ;;  %v8808_v22 = vld [vmem:[%s11627_s4 + $0x1b0] sm:$0xff]  }
 0x2bc   : > { %8451 = vmatprep.mubr.bf16.mxu0 %v10739_v50  ;;  %8536 = vmatpush3.bf16.msra.mxu0 %v10695_v56  ;;  %v10754_v56 = vpack.c.bf16 %v5198_v48, %v5197_v6 }
 0x2bd   : > { %8537 = vmatprep.subr.bf16.mxu0 %v8813_v23 }
 0x2c0   : > { %8538 = vmatpush3.bf16.msra.mxu0 %v8813_v23  ;;  %v5222_v23 = vld [vmem:[#allocation2 + $0x11c] sm:$0xff] }
 0x2c1   : > { %8539 = vmatprep.subr.bf16.mxu0 %v8814_v59 }
 0x2c2   : > { %8396 = vmatmul.mubr.bf16.vlgmr.msra.gmra.mxu1 %v10632_v1  ;;  %v5200_v1 = vld [vmem:[#allocation2 + $0x6c] sm:$0xff] }
 0x2c3   : > { %8399 = vmatprep.mubr.bf16.mxu1 %v10640_v55  ;;  %8452 = vmatmul.mubr.bf16.gmra.mxu0 %v10748_v38  ;;  %v5202_v55 = vld [vmem:[#allocation2 + $0x7c] sm:$0xff]  ;;  %v10769_v24 = vpack.c.bf16 %v5200_v1, %v5199_v15  ;;  %v5854_v15 = vld [vmem:[#allocation2 + $0x2d] sm:$0xff] }
 0x2c4   : > { %8484 = vmatpush3.bf16.msra.mxu1 %v10710_v7  ;;  %8455 = vmatprep.mubr.bf16.mxu0 %v10754_v56  ;;  %v8810_v7 = vld [vmem:[%s11627_s4 + $0x1a0] sm:$0xff]   ;;  %v10775_v4 = vpack.c.bf16 %v5202_v55, %v5201_v5  ;;  %v5224_v5 = vld [vmem:[#allocation2 + $0x12c] sm:$0xff] }
 0x2c5   : > { %8485 = vmatprep.subr.bf16.mxu1 %v8808_v22  ;;  %8540 = vmatpush3.bf16.msra.mxu0 %v8814_v59  ;;  %v5219_v59 = vld [vmem:[#allocation2 + $0x104] sm:$0xff] }
 0x2c6   : > { %8541 = vmatprep.subr.bf16.mxu0 %v8816_v54 }
 0x2c8   : > { %8486 = vmatpush3.bf16.msra.mxu1 %v8808_v22 }
 0x2c9   : > { %8487 = vmatprep.subr.bf16.mxu1 %v8809_v17  ;;  %8542 = vmatpush3.bf16.msra.mxu0 %v8816_v54 }
 0x2ca   : > { %8400 = vmatmul.mubr.bf16.gmra.mxu1 %v10645_v20  ;;  %8543 = vmatprep.subr.bf16.mxu0 %v8817_v26  ;;  %v5204_v20 = vld [vmem:[#allocation2 + $0x8c] sm:$0xff] }
 0x2cb   : > { %8403 = vmatprep.mubr.bf16.mxu1 %v10659_v16  ;;  %8456 = vmatmul.mubr.bf16.gmra.mxu0 %v10769_v24  ;;  %v5203_v16 = vld [vmem:[#allocation2 + $0x84] sm:$0xff] }
 0x2cc   : > { %8459 = vmatprep.mubr.bf16.mxu0 %v10775_v4  ;;  %8488 = vmatpush3.bf16.msra.mxu1 %v8809_v17  ;;  %v10789_v44 = vpack.c.bf16 %v5204_v20, %v5203_v16  ;;  %v5853_v20 = vld [vmem:[#allocation2 + $0x25] sm:$0xff] }
 0x2cd   : > { %8489 = vmatprep.subr.bf16.mxu1 %v8810_v7  ;;  %8544 = vmatpush3.bf16.msra.mxu0 %v8817_v26  ;;  %v5223_v26 = vld [vmem:[#allocation2 + $0x124] sm:$0xff]  ;;  %v5889_v42 = vpack.c.bf16 %v5854_v15, %v5853_v20 }
 0x2ce   : > { %8545 = vmatprep.subr.bf16.mxu0 %v8818_v35  ;;  %v5861_v15 = vld [vmem:[#allocation2 + $0x65] sm:$0xff] }
 0x2d0   : > { %8490 = vmatpush3.bf16.msra.mxu1 %v8810_v7 }
 0x2d1   : > { %8491 = vmatprep.subr.bf16.mxu1 %v8812_v52  ;;  %8546 = vmatpush3.bf16.msra.mxu0 %v8818_v35 }
 0x2d2   : > { %8404 = vmatmul.mubr.bf16.gmra.mxu1 %v10664_v62  ;;  %8547 = vmatprep.subr.bf16.mxu0 %v8820_v32  ;;  %v5208_v62 = vld [vmem:[#allocation2 + $0xac] sm:$0xff] }
 0x2d3   : > { %8407 = vmatprep.mubr.bf16.mxu1 %v10677_v10  ;;  %8460 = vmatmul.mubr.bf16.gmra.mxu0 %v10789_v44  ;;  %v10806_v46 = vpack.c.bf16 %v5208_v62, %v5207_v43  ;;  %v8822_v10 = vld [vmem:[%s11627_s4 + $0x180] sm:$0xff]  }
 0x2d4   : > { %8463 = vmatprep.mubr.bf16.mxu0 %v10795_v60  ;;  %8492 = vmatpush3.bf16.msra.mxu1 %v8812_v52  ;;  %v4891_v62 = vld [vmem:[#allocation2 + $0x122] sm:$0xff] }
 0x2d5   : > { %8493 = vmatprep.subr.bf16.mxu1 %v8815_v51  ;;  %8548 = vmatpush3.bf16.msra.mxu0 %v8820_v32  ;;  %v5856_v43 = vld [vmem:[#allocation2 + $0x3d] sm:$0xff] }
 0x2d6   : > { %8549 = vmatprep.subr.bf16.mxu0 %v8821_v11  ;;  %v5890_v13 = vpack.c.bf16 %v5856_v43, %v5855_v19 }
 0x2d8   : > { %8494 = vmatpush3.bf16.msra.mxu1 %v8815_v51 }
 0x2d9   : > { %8495 = vmatprep.subr.bf16.mxu1 %v8819_v61  ;;  %8550 = vmatpush3.bf16.msra.mxu0 %v8821_v11 }
 0x2da   : > { %8408 = vmatmul.mubr.bf16.gmra.mxu1 %v10682_v9  ;;  %v10822_v9 = vpack.c.bf16 %v5212_v30, %v5211_v41  ;;  %v4892_v30 = vld [vmem:[#allocation2 + $0x12a] sm:$0xff] }
 0x2db   : > { %8411 = vmatprep.mubr.bf16.mxu1 %v10697_v14  ;;  %8464 = vmatmul.mubr.bf16.gmra.mxu0 %v10806_v46  ;;  %v10826_v14 = vpack.c.bf16 %v5214_v3, %v5213_v47  ;;  %v5858_v47 = vld [vmem:[#allocation2 + $0x4d] sm:$0xff]  ;;  %v4910_v41 = vpack.c.bf16 %v4892_v30, %v4891_v62  ;;  %v5863_v62 = vld [vmem:[#allocation2 + $0x75] sm:$0xff] }
 0x2dc   : > { %8467 = vmatprep.mubr.bf16.mxu0 %v10812_v57  ;;  %8496 = vmatpush3.bf16.msra.mxu1 %v8819_v61 }
 0x2dd   : > { %8497 = vmatprep.subr.bf16.mxu1 %v8822_v10 }
 0x2e0   : > { %8498 = vmatpush3.bf16.msra.mxu1 %v8822_v10 }
 0x2e1   : > { %8587 = vmatprep.subr.bf16.mxu1 %v10820_v63 }
 0x2e2   : > { %8412 = vmatmul.mubr.bf16.gmra.mxu1 %v10702_v2 }
 0x2e3   : > { %8415 = vmatprep.mubr.bf16.mxu1 %v10712_v33  ;;  %8468 = vmatmul.mubr.bf16.gmra.mxu0 %v10822_v9  ;;  %v5220_v33 = vld [vmem:[#allocation2 + $0x10c] sm:$0xff] }
 0x2e4   : > { %8471 = vmatprep.mubr.bf16.mxu0 %v10826_v14  ;;  %v10839_v6 = vpack.c.bf16 %v5220_v33, %v5219_v59 }
 0x2e9   : > { %v8241_v36 = vpop.f32.mrf.mxu0 }
 0x2ea   : > { %8416 = vmatmul.mubr.bf16.gmra.mxu1 %v10715_v31  ;;  %v10842_v31 = vpack.c.bf16 %v5222_v23, %v5221_v40 }
 0x2eb   : > { %8419 = vmatprep.mubr.bf16.mxu1 %v10719_v8  ;;  %8472 = vmatmul.mubr.bf16.gmra.mxu0 %v10831_v18  ;;  %v4050_v2 = vpop.f32.mrf.mxu0 }
 0x2ec   : > { %8475 = vmatprep.mubr.bf16.mxu0 %v10834_v27 }
 0x2ed   : > { %v8242_v25 = vpop.f32.mrf.mxu0 }
 0x2ef   : > { %v4053_v21 = vpop.f32.mrf.mxu0 }
 0x2f0   : > { %v8189_v48 = vpop.f32.mrf.mxu1 }
 0x2f1   : > { %v10844_v39 = vadd.f32 %v8241_v36, %v8189_v48  ;;  %v5891_v36 = vpack.c.bf16 %v5858_v47, %v5857_v29  ;;  %v5860_v48 = vld [vmem:[#allocation2 + $0x5d] sm:$0xff] }
 0x2f2   : > { %8420 = vmatmul.mubr.bf16.gmra.mxu1 %v10721_v45  ;;  %v8245_v8 = vpop.f32.mrf.mxu0  ;;  %v3825_v22 = vpop.f32.mrf.mxu1 }
 0x2f3   : > { %8423 = vmatprep.mubr.bf16.mxu1 %v10725_v34  ;;  %8476 = vmatmul.mubr.bf16.gmra.mxu0 %v10839_v6  ;;  %v10849_v54 = vadd.f32 %v4050_v2, %v3825_v22  ;;  %v10855_v34 = vpack.c.bf16 %v5224_v5, %v5223_v26 }
 0x2f4   : > { %8479 = vmatprep.mubr.bf16.mxu0 %v10842_v31  ;;  %v4066_v17 = vpop.f32.mrf.mxu0  ;;  %v8190_v1 = vpop.f32.mrf.mxu1 }
 0x2f5   : > { %v10851_v55 = vadd.f32 %v8242_v25, %v8190_v1 }
 0x2f6   : > { %v8246_v45 = vpop.f32.mrf.mxu0  ;;  %v3828_v7 = vpop.f32.mrf.mxu1 }
 0x2f7   : > { %v10853_v35 = vadd.f32 %v4053_v21, %v3828_v7  ;;  %v5859_v21 = vld [vmem:[#allocation2 + $0x55] sm:$0xff] }
 0x2f8   : > { %v4069_v52 = vpop.f32.mrf.mxu0 }
 0x2f9   : > { %v8193_v32 = vpop.f32.mrf.mxu1 }
 0x2fa   : > { %8424 = vmatmul.mubr.bf16.gmra.mxu1 %v10727_v53  ;;  %v10858_v37 = vadd.f32 %v8245_v8, %v8193_v32  ;;  %v8249_v16 = vpop.f32.mrf.mxu0 }
 0x2fb   : > { %8427 = vmatprep.mubr.bf16.mxu1 %v10731_v0  ;;  %8480 = vmatmul.mubr.bf16.gmra.mxu0 %v10855_v34  ;;  %v3841_v51 = vpop.f32.mrf.mxu1 }
 0x2fc   : > { %8551 = vmatprep.mubr.bf16.mxu0 %v5889_v42  ;;  %v10862_v11 = vadd.f32 %v4066_v17, %v3841_v51  ;;  %v4082_v61 = vpop.f32.mrf.mxu0  ;;  %v5862_v17 = vld [vmem:[#allocation2 + $0x6d] sm:$0xff] }
 0x2fd   : > { %v8194_v49 = vpop.f32.mrf.mxu1 }
 0x2fe   : > { %v10864_v10 = vadd.f32 %v8246_v45, %v8194_v49  ;;  %v8250_v53 = vpop.f32.mrf.mxu0  ;;  %v5892_v45 = vpack.c.bf16 %v5860_v48, %v5859_v21  ;;  %v5864_v49 = vld [vmem:[#allocation2 + $0x7d] sm:$0xff] }
 0x2ff   : > { %v3844_v3 = vpop.f32.mrf.mxu1  ;;  %v5894_v47 = vpack.c.bf16 %v5864_v49, %v5863_v62  ;;  %v5868_v21 = vld [vmem:[#allocation2 + $0x9d] sm:$0xff]  ;;  %v8829_v62 = vld [vmem:[%s11627_s4 + $0x208] sm:$0xff]  }
 0x300   : > { %v10866_v28 = vadd.f32 %v4069_v52, %v3844_v3  ;;  %v4085_v0 = vpop.f32.mrf.mxu0  ;;  %v5893_v52 = vpack.c.bf16 %v5862_v17, %v5861_v15  ;;  %v5865_v3 = vld [vmem:[#allocation2 + $0x85] sm:$0xff]  ;;  %v5870_v17 = vld [vmem:[#allocation2 + $0xad] sm:$0xff] }
 0x301   : > { %v8197_v58 = vpop.f32.mrf.mxu1  ;;  %v5869_v15 = vld [vmem:[#allocation2 + $0xa5] sm:$0xff] }
 0x302   : > { %8428 = vmatmul.mubr.bf16.gmra.mxu1 %v4910_v41  ;;  %v10868_v2 = vadd.f32 %v8249_v16, %v8197_v58  ;;  %v8253_v33 = vpop.f32.mrf.mxu0  ;;  %v8826_v41 = vld [vmem:[%s11627_s4 + $0x220] sm:$0xff]  }
 0x303   : > { %8499 = vmatprep.mubr.bf16.mxu1 %v10734_v12  ;;  %8552 = vmatmul.mubr.bf16.vlgmr.msra.gmra.mxu0 %v5890_v13  ;;  %v3857_v25 = vpop.f32.mrf.mxu1  ;;  %v8824_v12 = vld [vmem:[%s11627_s4 + $0x230] sm:$0xff]  }
 0x304   : > { %8555 = vmatprep.mubr.bf16.mxu0 %v5891_v36  ;;  %v10871_v40 = vadd.f32 %v4082_v61, %v3857_v25  ;;  %v4098_v23 = vpop.f32.mrf.mxu0  ;;  %v8825_v61 = vld [vmem:[%s11627_s4 + $0x228] sm:$0xff]  }
 0x305   : > { %v8198_v59 = vpop.f32.mrf.mxu1 }
 0x306   : > { %v10873_v8 = vadd.f32 %v8250_v53, %v8198_v59  ;;  %v8254_v22 = vpop.f32.mrf.mxu0 }
 0x307   : > { %v3860_v1 = vpop.f32.mrf.mxu1 }
 0x308   : > { %v10875_v26 = vadd.f32 %v4085_v0, %v3860_v1  ;;  %v4101_v5 = vpop.f32.mrf.mxu0 }
 0x30a   : > { %v8201_v7 = vpop.f32.mrf.mxu1  ;;  %8500 = vmatmul.mubr.bf16.vlgmr.msra.gmra.mxu1 %v10739_v50 }
 0x30b   : > { %v10881_v20 = vadd.f32 %v8253_v33, %v8201_v7  ;;  %v8257_v32 = vpop.f32.mrf.mxu0  ;;  %8503 = vmatprep.mubr.bf16.mxu1 %v10748_v38  ;;  %8556 = vmatmul.mubr.bf16.gmra.mxu0 %v5892_v45  ;;  %v5866_v38 = vld [vmem:[#allocation2 + $0x8d] sm:$0xff] }
 0x30c   : > { %8588 = vmatpush3.bf16.msra.mxu1 %v10820_v63  ;;  %v3873_v42 = vpop.f32.mrf.mxu1  ;;  %8559 = vmatprep.mubr.bf16.mxu0 %v5893_v52  ;;  %v5895_v13 = vpack.c.bf16 %v5866_v38, %v5865_v3  ;;  %v5897_v52 = vpack.c.bf16 %v5870_v17, %v5869_v15  ;;  %v5875_v17 = vld [vmem:[#allocation2 + $0xd5] sm:$0xff] }
 0x30d   : > { %v10885_v16 = vadd.f32 %v4098_v23, %v3873_v42  ;;  %v4114_v51 = vpop.f32.mrf.mxu0  ;;  %8589 = vmatprep.subr.bf16.mxu1 %v8824_v12  ;;  %v8827_v23 = vld [vmem:[%s11627_s4 + $0x218] sm:$0xff]  }
 0x30e   : > { %v8202_v50 = vpop.f32.mrf.mxu1 }
 0x30f   : > { %v10890_v19 = vadd.f32 %v8254_v22, %v8202_v50  ;;  %v8258_v43 = vpop.f32.mrf.mxu0 }
 0x310   : > { %v3876_v53 = vpop.f32.mrf.mxu1  ;;  %8590 = vmatpush3.bf16.msra.mxu1 %v8824_v12  ;;  %v8828_v12 = vld [vmem:[%s11627_s4 + $0x210] sm:$0xff]  }
 0x311   : > { %v10892_v63 = vadd.f32 %v4101_v5, %v3876_v53  ;;  %v4117_v30 = vpop.f32.mrf.mxu0  ;;  %8591 = vmatprep.subr.bf16.mxu1 %v8825_v61 }
 0x312   : > { %v8205_v0 = vpop.f32.mrf.mxu1  ;;  %8504 = vmatmul.mubr.bf16.gmra.mxu1 %v10754_v56  ;;  %v5867_v56 = vld [vmem:[#allocation2 + $0x95] sm:$0xff] }
 0x313   : > { %v10898_v29 = vadd.f32 %v8257_v32, %v8205_v0  ;;  %v8261_v58 = vpop.f32.mrf.mxu0  ;;  %8507 = vmatprep.mubr.bf16.mxu1 %v10769_v24  ;;  %8560 = vmatmul.mubr.bf16.gmra.mxu0 %v5894_v47  ;;  %v5896_v45 = vpack.c.bf16 %v5868_v21, %v5867_v56  ;;  %v5873_v0 = vld [vmem:[#allocation2 + $0xc5] sm:$0xff] }
 0x314   : > { %v3889_v36 = vpop.f32.mrf.mxu1  ;;  %8563 = vmatprep.mubr.bf16.mxu0 %v5895_v13  ;;  %8592 = vmatpush3.bf16.msra.mxu1 %v8825_v61  ;;  %v8830_v13 = vld [vmem:[%s11627_s4 + $0x200] sm:$0xff]  }
 0x315   : > { %v10901_v33 = vadd.f32 %v4114_v51, %v3889_v36  ;;  %v4130_v25 = vpop.f32.mrf.mxu0  ;;  %8593 = vmatprep.subr.bf16.mxu1 %v8826_v41 }
 0x316   : > { %v8206_v59 = vpop.f32.mrf.mxu1 }
 0x317   : > { %v10906_v48 = vadd.f32 %v8258_v43, %v8206_v59  ;;  %v8262_v22 = vpop.f32.mrf.mxu0  ;;  %v5872_v43 = vld [vmem:[#allocation2 + $0xbd] sm:$0xff] }
 0x318   : > { %v3892_v24 = vpop.f32.mrf.mxu1  ;;  %8594 = vmatpush3.bf16.msra.mxu1 %v8826_v41 }
 0x319   : > { %v10908_v1 = vadd.f32 %v4117_v30, %v3892_v24  ;;  %v4133_v5 = vpop.f32.mrf.mxu0  ;;  %8595 = vmatprep.subr.bf16.mxu1 %v8827_v23  ;;  %v5874_v30 = vld [vmem:[#allocation2 + $0xcd] sm:$0xff]  ;;  %v5876_v24 = vld [vmem:[#allocation2 + $0xdd] sm:$0xff] }
 0x31a   : > { %v8209_v7 = vpop.f32.mrf.mxu1  ;;  %8508 = vmatmul.mubr.bf16.gmra.mxu1 %v10775_v4  ;;  %v5871_v4 = vld [vmem:[#allocation2 + $0xb5] sm:$0xff]  ;;  %v5899_v36 = vpack.c.bf16 %v5874_v30, %v5873_v0  ;;  %v5882_v0 = vld [vmem:[#allocation2 + $0x10d] sm:$0xff] }
 0x31b   : > { %v10914_v32 = vadd.f32 %v8261_v58, %v8209_v7  ;;  %v8265_v42 = vpop.f32.mrf.mxu0  ;;  %8511 = vmatprep.mubr.bf16.mxu1 %v10789_v44  ;;  %8564 = vmatmul.mubr.bf16.gmra.mxu0 %v5896_v45  ;;  %v5898_v41 = vpack.c.bf16 %v5872_v43, %v5871_v4  ;;  %v5878_v45 = vld [vmem:[#allocation2 + $0xed] sm:$0xff]  ;;  %v5900_v7 = vpack.c.bf16 %v5876_v24, %v5875_v17  ;;  %v5879_v30 = vld [vmem:[#allocation2 + $0xf5] sm:$0xff] }
 0x31c   : > { %v3905_v51 = vpop.f32.mrf.mxu1  ;;  %8567 = vmatprep.mubr.bf16.mxu0 %v5897_v52  ;;  %8596 = vmatpush3.bf16.msra.mxu1 %v8827_v23  ;;  %v5877_v52 = vld [vmem:[#allocation2 + $0xe5] sm:$0xff] }
 0x31d   : > { %v10917_v61 = vadd.f32 %v4130_v25, %v3905_v51  ;;  %v4146_v50 = vpop.f32.mrf.mxu0  ;;  %8597 = vmatprep.subr.bf16.mxu1 %v8828_v12  ;;  %v5901_v51 = vpack.c.bf16 %v5878_v45, %v5877_v52 }
 0x31e   : > { %v8210_v49 = vpop.f32.mrf.mxu1 }
 0x31f   : > { %v10922_v38 = vadd.f32 %v8262_v22, %v8210_v49  ;;  %v8266_v53 = vpop.f32.mrf.mxu0 }
 0x320   : > { %v3908_v44 = vpop.f32.mrf.mxu1  ;;  %8598 = vmatpush3.bf16.msra.mxu1 %v8828_v12 }
 0x321   : > { %v10924_v47 = vadd.f32 %v4133_v5, %v3908_v44  ;;  %v4149_v3 = vpop.f32.mrf.mxu0  ;;  %8599 = vmatprep.subr.bf16.mxu1 %v8829_v62  ;;  %v5880_v44 = vld [vmem:[#allocation2 + $0xfd] sm:$0xff] }
 0x322   : > { %v8213_v58 = vpop.f32.mrf.mxu1  ;;  %8512 = vmatmul.mubr.bf16.gmra.mxu1 %v10795_v60 }
 0x323   : > { %v10930_v25 = vadd.f32 %v8265_v42, %v8213_v58  ;;  %v8269_v23 = vpop.f32.mrf.mxu0  ;;  %8515 = vmatprep.mubr.bf16.mxu1 %v10806_v46  ;;  %8568 = vmatmul.mubr.bf16.gmra.mxu0 %v5898_v41 }
 0x324   : > { %v3921_v59 = vpop.f32.mrf.mxu1  ;;  %8571 = vmatprep.mubr.bf16.mxu0 %v5899_v36  ;;  %8600 = vmatpush3.bf16.msra.mxu1 %v8829_v62  ;;  %v5902_v36 = vpack.c.bf16 %v5880_v44, %v5879_v30 }
 0x325   : > { %v10933_v56 = vadd.f32 %v4146_v50, %v3921_v59  ;;  %v4162_v21 = vpop.f32.mrf.mxu0  ;;  %8601 = vmatprep.subr.bf16.mxu1 %v8830_v13 }
 0x326   : > { %v8214_v22 = vpop.f32.mrf.mxu1 }
 0x327   : > { %v10935_v5 = vadd.f32 %v8266_v53, %v8214_v22  ;;  %v8270_v60 = vpop.f32.mrf.mxu0 }
 0x328   : > { %v3924_v15 = vpop.f32.mrf.mxu1  ;;  %8602 = vmatpush3.bf16.msra.mxu1 %v8830_v13 }
 0x329   : > { %v10937_v12 = vadd.f32 %v4149_v3, %v3924_v15  ;;  %v4165_v46 = vpop.f32.mrf.mxu0  ;;  %v5883_v15 = vld [vmem:[#allocation2 + $0x115] sm:$0xff] }
 0x32a   : > { %v8217_v42 = vpop.f32.mrf.mxu1  ;;  %8516 = vmatmul.mubr.bf16.gmra.mxu1 %v10812_v57 }
 0x32b   : > { %v10940_v50 = vadd.f32 %v8269_v23, %v8217_v42  ;;  %v8273_v62 = vpop.f32.mrf.mxu0  ;;  %8519 = vmatprep.mubr.bf16.mxu1 %v10822_v9  ;;  %8572 = vmatmul.mubr.bf16.gmra.mxu0 %v5900_v7  ;;  %v5881_v23 = vld [vmem:[#allocation2 + $0x105] sm:$0xff] }
 0x32c   : > { %v3937_v49 = vpop.f32.mrf.mxu1  ;;  %8575 = vmatprep.mubr.bf16.mxu0 %v5901_v51  ;;  %v5903_v59 = vpack.c.bf16 %v5882_v0, %v5881_v23  ;;  %v5885_v42 = vld [vmem:[#allocation2 + $0x125] sm:$0xff]  ;;  %v5887_v0 = vld [vmem:[#allocation2 + $0x135] sm:$0xff] }
 0x32d   : > { %v10943_v4 = vadd.f32 %v4162_v21, %v3937_v49  ;;  %v4178_v43 = vpop.f32.mrf.mxu0 }
 0x32e   : > { %v8218_v53 = vpop.f32.mrf.mxu1 }
 0x32f   : > { %v10945_v3 = vadd.f32 %v8270_v60, %v8218_v53  ;;  %v8274_v41 = vpop.f32.mrf.mxu0 }
 0x330   : > { %v3940_v57 = vpop.f32.mrf.mxu1 }
 0x331   : > { %v10947_v13 = vadd.f32 %v4165_v46, %v3940_v57  ;;  %v4181_v58 = vpop.f32.mrf.mxu0  ;;  %v5884_v46 = vld [vmem:[#allocation2 + $0x11d] sm:$0xff] }
 0x332   : > { %v8221_v9 = vpop.f32.mrf.mxu1  ;;  %8520 = vmatmul.mubr.bf16.gmra.mxu1 %v10826_v14  ;;  %v5886_v14 = vld [vmem:[#allocation2 + $0x12d] sm:$0xff]  ;;  %v5904_v53 = vpack.c.bf16 %v5884_v46, %v5883_v15  ;;  %v5888_v57 = vld [vmem:[#allocation2 + $0x13d] sm:$0xff] }
 0x333   : > { %v10950_v21 = vadd.f32 %v8273_v62, %v8221_v9  ;;  %v8345_v22 = vpop.f32.mrf.mxu0  ;;  %8523 = vmatprep.mubr.bf16.mxu1 %v10831_v18  ;;  %8576 = vmatmul.mubr.bf16.gmra.mxu0 %v5902_v36  ;;  %v5905_v30 = vpack.c.bf16 %v5886_v14, %v5885_v42  ;;  %v5555_v14 = vld [vmem:[#allocation2 + $0x134] sm:$0xff] }
 0x334   : > { %v3953_v17 = vpop.f32.mrf.mxu1  ;;  %8579 = vmatprep.mubr.bf16.mxu0 %v5903_v59 }
 0x335   : > { %v10953_v24 = vadd.f32 %v4178_v43, %v3953_v17  ;;  %v4678_v60 = vpop.f32.mrf.mxu0  ;;  %v5906_v17 = vpack.c.bf16 %v5888_v57, %v5887_v0  ;;  %v6185_v0 = vld [vmem:[#allocation2 + $0x26] sm:$0xff] }
 0x336   : > { %v8222_v45 = vpop.f32.mrf.mxu1 }
 0x337   : > { %v10955_v7 = vadd.f32 %v8274_v41, %v8222_v45  ;;  %v8346_v52 = vpop.f32.mrf.mxu0 }
 0x338   : > { %v3956_v51 = vpop.f32.mrf.mxu1 }
 0x339   : > { %v10957_v62 = vadd.f32 %v4181_v58, %v3956_v51  ;;  %v4681_v49 = vpop.f32.mrf.mxu0 }
 0x33a   : > { %v8293_v18 = vpop.f32.mrf.mxu1  ;;  %8524 = vmatmul.mubr.bf16.gmra.mxu1 %v10834_v27 }
 0x33b   : > { %v4491_v43 = vadd.f32 %v8293_v18, %v10844_v39  ;;  %v8349_v44 = vpop.f32.mrf.mxu0  ;;  %8527 = vmatprep.mubr.bf16.mxu1 %v10839_v6  ;;  %8580 = vmatmul.mubr.bf16.gmra.mxu0 %v5904_v53 }
 0x33c   : > { %v4346_v41 = vpop.f32.mrf.mxu1  ;;  %8583 = vmatprep.mubr.bf16.mxu0 %v5905_v30 }
 0x33d   : > { %v4489_v36 = vadd.f32 %v4346_v41, %v10849_v54  ;;  %v4694_v58 = vpop.f32.mrf.mxu0  ;;  %v10963_v23 = vadd.f32 %v8345_v22, %v4491_v43  ;;  %v6186_v43 = vld [vmem:[#allocation2 + $0x2e] sm:$0xff] }
 0x33e   : > { %v8294_v9 = vpop.f32.mrf.mxu1 }
 0x33f   : > { %v4492_v59 = vadd.f32 %v8294_v9, %v10851_v55  ;;  %v8350_v27 = vpop.f32.mrf.mxu0  ;;  %v10966_v45 = vadd.f32 %v4678_v60, %v4489_v36  ;;  %v5556_v55 = vld [vmem:[#allocation2 + $0x13c] sm:$0xff]  ;;  %v6221_v36 = vpack.c.bf16 %v6186_v43, %v6185_v0 }
 0x340   : > { %v4349_v39 = vpop.f32.mrf.mxu1  ;;  %v5574_v30 = vpack.c.bf16 %v5556_v55, %v5555_v14  ;;  %v6190_v14 = vld [vmem:[#allocation2 + $0x4e] sm:$0xff] }
 0x341   : > { %v4490_v6 = vadd.f32 %v4349_v39, %v10853_v35  ;;  %v4697_v15 = vpop.f32.mrf.mxu0  ;;  %v10969_v46 = vadd.f32 %v8346_v52, %v4492_v59 }
 0x342   : > { %v8297_v42 = vpop.f32.mrf.mxu1  ;;  %8528 = vmatmul.mubr.bf16.gmra.mxu1 %v10842_v31 }
 0x343   : > { %v4495_v54 = vadd.f32 %v8297_v42, %v10858_v37  ;;  %v8353_v22 = vpop.f32.mrf.mxu0  ;;  %8531 = vmatprep.mubr.bf16.mxu1 %v10855_v34  ;;  %8584 = vmatmul.mubr.bf16.gmra.mxu0 %v5906_v17  ;;  %v10974_v51 = vadd.f32 %v4681_v49, %v4490_v6  ;;  %v6187_v6 = vld [vmem:[#allocation2 + $0x36] sm:$0xff]  ;;  %v6188_v42 = vld [vmem:[#allocation2 + $0x3e] sm:$0xff] }
 0x344   : > { %v4362_v60 = vpop.f32.mrf.mxu1 }
 0x345   : > { %v4493_v53 = vadd.f32 %v4362_v60, %v10862_v11  ;;  %v4710_v35 = vpop.f32.mrf.mxu0  ;;  %v10977_v18 = vadd.f32 %v8349_v44, %v4495_v54 }
 0x346   : > { %v8298_v52 = vpop.f32.mrf.mxu1 }
 0x347   : > { %v4496_v31 = vadd.f32 %v8298_v52, %v10864_v10  ;;  %v8354_v37 = vpop.f32.mrf.mxu0  ;;  %v10980_v41 = vadd.f32 %v4694_v58, %v4493_v53  ;;  %v6222_v53 = vpack.c.bf16 %v6188_v42, %v6187_v6  ;;  %v6189_v52 = vld [vmem:[#allocation2 + $0x46] sm:$0xff] }
 0x348   : > { %v4365_v34 = vpop.f32.mrf.mxu1  ;;  %v6223_v43 = vpack.c.bf16 %v6190_v14, %v6189_v52 }
 0x349   : > { %v4494_v57 = vadd.f32 %v4365_v34, %v10866_v28  ;;  %v4713_v49 = vpop.f32.mrf.mxu0  ;;  %v10983_v9 = vadd.f32 %v8350_v27, %v4496_v31 }
 0x34a   : > { %v8301_v11 = vpop.f32.mrf.mxu1  ;;  %8532 = vmatmul.mubr.bf16.gmra.mxu1 %v5574_v30 }
 0x34b   : > { %v4499_v44 = vadd.f32 %v8301_v11, %v10868_v2  ;;  %v8357_v59 = vpop.f32.mrf.mxu0  ;;  %8603 = vmatprep.mubr.bf16.mxu1 %v6221_v36  ;;  %v10986_v17 = vadd.f32 %v4697_v15, %v4494_v57  ;;  %v6191_v36 = vld [vmem:[#allocation2 + $0x56] sm:$0xff]  ;;  %v6192_v11 = vld [vmem:[#allocation2 + $0x5e] sm:$0xff] }
 0x34c   : > { %v4378_v10 = vpop.f32.mrf.mxu1  ;;  %v6224_v42 = vpack.c.bf16 %v6192_v11, %v6191_v36 }
 0x34d   : > { %v4497_v58 = vadd.f32 %v4378_v10, %v10871_v40  ;;  %v4726_v39 = vpop.f32.mrf.mxu0  ;;  %v10989_v54 = vadd.f32 %v8353_v22, %v4499_v44  ;;  %v6194_v10 = vld [vmem:[#allocation2 + $0x6e] sm:$0xff] }
 0x34e   : > { %v8302_v28 = vpop.f32.mrf.mxu1 }
 0x34f   : > { %v4500_v27 = vadd.f32 %v8302_v28, %v10873_v8  ;;  %v8358_v55 = vpop.f32.mrf.mxu0  ;;  %v10992_v60 = vadd.f32 %v4710_v35, %v4497_v58  ;;  %v6193_v28 = vld [vmem:[#allocation2 + $0x66] sm:$0xff] }
 0x350   : > { %v4381_v2 = vpop.f32.mrf.mxu1 }
 0x351   : > { %v4498_v15 = vadd.f32 %v4381_v2, %v10875_v26  ;;  %v4729_v30 = vpop.f32.mrf.mxu0  ;;  %v10995_v40 = vadd.f32 %v8354_v37, %v4500_v27  ;;  %v6225_v27 = vpack.c.bf16 %v6194_v10, %v6193_v28 }
 0x352   : > { %v8305_v31 = vpop.f32.mrf.mxu1  ;;  %8604 = vmatmul.mubr.bf16.vlgmr.msra.gmra.mxu1 %v6222_v53 }
 0x353   : > { %v4503_v22 = vadd.f32 %v8305_v31, %v10881_v20  ;;  %v8361_v34 = vpop.f32.mrf.mxu0  ;;  %8607 = vmatprep.mubr.bf16.mxu1 %v6223_v43  ;;  %v10998_v0 = vadd.f32 %v4713_v49, %v4498_v15  ;;  %v6195_v43 = vld [vmem:[#allocation2 + $0x76] sm:$0xff]  ;;  %v6196_v31 = vld [vmem:[#allocation2 + $0x7e] sm:$0xff] }
 0x354   : > { %v4394_v8 = vpop.f32.mrf.mxu1  ;;  %v6226_v11 = vpack.c.bf16 %v6196_v31, %v6195_v43 }
 0x355   : > { %v4501_v35 = vadd.f32 %v4394_v8, %v10885_v16  ;;  %v4742_v57 = vpop.f32.mrf.mxu0  ;;  %v11001_v44 = vadd.f32 %v8357_v59, %v4503_v22  ;;  %v6198_v8 = vld [vmem:[#allocation2 + $0x8e] sm:$0xff] }
 0x356   : > { %v8306_v26 = vpop.f32.mrf.mxu1 }
 0x357   : > { %v4504_v37 = vadd.f32 %v8306_v26, %v10890_v19  ;;  %v8362_v58 = vpop.f32.mrf.mxu0  ;;  %v11004_v6 = vadd.f32 %v4726_v39, %v4501_v35  ;;  %v6197_v26 = vld [vmem:[#allocation2 + $0x86] sm:$0xff] }
 0x358   : > { %v4397_v20 = vpop.f32.mrf.mxu1 }
 0x359   : > { %v4502_v49 = vadd.f32 %v4397_v20, %v10892_v63  ;;  %v4745_v14 = vpop.f32.mrf.mxu0  ;;  %v11007_v16 = vadd.f32 %v8358_v55, %v4504_v37  ;;  %v6227_v37 = vpack.c.bf16 %v6198_v8, %v6197_v26 }
 0x35a   : > { %v8309_v2 = vpop.f32.mrf.mxu1  ;;  %8608 = vmatmul.mubr.bf16.gmra.mxu1 %v6224_v42 }
 0x35b   : > { %v4507_v59 = vadd.f32 %v8309_v2, %v10898_v29  ;;  %v8365_v53 = vpop.f32.mrf.mxu0  ;;  %8611 = vmatprep.mubr.bf16.mxu1 %v6225_v27  ;;  %v11010_v52 = vadd.f32 %v4729_v30, %v4502_v49  ;;  %v6199_v27 = vld [vmem:[#allocation2 + $0x96] sm:$0xff]  ;;  %v6200_v2 = vld [vmem:[#allocation2 + $0x9e] sm:$0xff] }
 0x35c   : > { %v4410_v19 = vpop.f32.mrf.mxu1  ;;  %v6228_v31 = vpack.c.bf16 %v6200_v2, %v6199_v27 }
 0x35d   : > { %v4505_v39 = vadd.f32 %v4410_v19, %v10901_v33  ;;  %v4758_v15 = vpop.f32.mrf.mxu0  ;;  %v11013_v22 = vadd.f32 %v8361_v34, %v4507_v59  ;;  %v6202_v19 = vld [vmem:[#allocation2 + $0xae] sm:$0xff] }
 0x35e   : > { %v8310_v63 = vpop.f32.mrf.mxu1 }
 0x35f   : > { %v4508_v55 = vadd.f32 %v8310_v63, %v10906_v48  ;;  %v8366_v35 = vpop.f32.mrf.mxu0  ;;  %v11016_v36 = vadd.f32 %v4742_v57, %v4505_v39  ;;  %v6201_v63 = vld [vmem:[#allocation2 + $0xa6] sm:$0xff] }
 0x360   : > { %v4413_v29 = vpop.f32.mrf.mxu1 }
 0x361   : > { %v4506_v30 = vadd.f32 %v4413_v29, %v10908_v1  ;;  %v4761_v10 = vpop.f32.mrf.mxu0  ;;  %v11019_v33 = vadd.f32 %v8362_v58, %v4508_v55  ;;  %v6229_v55 = vpack.c.bf16 %v6202_v19, %v6201_v63 }
 0x362   : > { %v8313_v20 = vpop.f32.mrf.mxu1  ;;  %8612 = vmatmul.mubr.bf16.gmra.mxu1 %v6226_v11 }
 0x363   : > { %v4511_v34 = vadd.f32 %v8313_v20, %v10914_v32  ;;  %v8369_v42 = vpop.f32.mrf.mxu0  ;;  %8615 = vmatprep.mubr.bf16.mxu1 %v6227_v37  ;;  %v11022_v28 = vadd.f32 %v4745_v14, %v4506_v30  ;;  %v6203_v37 = vld [vmem:[#allocation2 + $0xb6] sm:$0xff]  ;;  %v6204_v20 = vld [vmem:[#allocation2 + $0xbe] sm:$0xff] }
 0x364   : > { %v4426_v48 = vpop.f32.mrf.mxu1  ;;  %v6230_v2 = vpack.c.bf16 %v6204_v20, %v6203_v37 }
 0x365   : > { %v4509_v57 = vadd.f32 %v4426_v48, %v10917_v61  ;;  %v4774_v49 = vpop.f32.mrf.mxu0  ;;  %v11025_v59 = vadd.f32 %v8365_v53, %v4511_v34  ;;  %v6206_v48 = vld [vmem:[#allocation2 + $0xce] sm:$0xff] }
 0x366   : > { %v8314_v1 = vpop.f32.mrf.mxu1 }
 0x367   : > { %v4512_v58 = vadd.f32 %v8314_v1, %v10922_v38  ;;  %v8370_v39 = vpop.f32.mrf.mxu0  ;;  %v11028_v43 = vadd.f32 %v4758_v15, %v4509_v57  ;;  %v6205_v1 = vld [vmem:[#allocation2 + $0xc6] sm:$0xff] }
 0x368   : > { %v4429_v32 = vpop.f32.mrf.mxu1 }
 0x369   : > { %v4510_v14 = vadd.f32 %v4429_v32, %v10924_v47  ;;  %v4777_v8 = vpop.f32.mrf.mxu0  ;;  %v11031_v61 = vadd.f32 %v8366_v35, %v4512_v58  ;;  %v6231_v58 = vpack.c.bf16 %v6206_v48, %v6205_v1 }
 0x36a   : > { %v8317_v29 = vpop.f32.mrf.mxu1  ;;  %8616 = vmatmul.mubr.bf16.gmra.mxu1 %v6228_v31 }
 0x36b   : > { %v4515_v53 = vadd.f32 %v8317_v29, %v10930_v25  ;;  %v8373_v11 = vpop.f32.mrf.mxu0  ;;  %8619 = vmatprep.mubr.bf16.mxu1 %v6229_v55  ;;  %v11034_v26 = vadd.f32 %v4761_v10, %v4510_v14  ;;  %v6207_v55 = vld [vmem:[#allocation2 + $0xd6] sm:$0xff]  ;;  %v6208_v29 = vld [vmem:[#allocation2 + $0xde] sm:$0xff] }
 0x36c   : > { %v4442_v38 = vpop.f32.mrf.mxu1  ;;  %v6232_v20 = vpack.c.bf16 %v6208_v29, %v6207_v55 }
 0x36d   : > { %v4513_v15 = vadd.f32 %v4442_v38, %v10933_v56  ;;  %v4790_v30 = vpop.f32.mrf.mxu0  ;;  %v11037_v34 = vadd.f32 %v8369_v42, %v4515_v53  ;;  %v6210_v38 = vld [vmem:[#allocation2 + $0xee] sm:$0xff] }
 0x36e   : > { %v8318_v47 = vpop.f32.mrf.mxu1 }
 0x36f   : > { %v4516_v35 = vadd.f32 %v8318_v47, %v10935_v5  ;;  %v8374_v57 = vpop.f32.mrf.mxu0  ;;  %v11040_v27 = vadd.f32 %v4774_v49, %v4513_v15  ;;  %v6209_v47 = vld [vmem:[#allocation2 + $0xe6] sm:$0xff] }
 0x370   : > { %v4445_v25 = vpop.f32.mrf.mxu1 }
 0x371   : > { %v4514_v10 = vadd.f32 %v4445_v25, %v10937_v12  ;;  %v4793_v19 = vpop.f32.mrf.mxu0  ;;  %v11043_v56 = vadd.f32 %v8370_v39, %v4516_v35  ;;  %v6233_v35 = vpack.c.bf16 %v6210_v38, %v6209_v47 }
 0x372   : > { %v8321_v32 = vpop.f32.mrf.mxu1  ;;  %8620 = vmatmul.mubr.bf16.gmra.mxu1 %v6230_v2 }
 0x373   : > { %v4519_v42 = vadd.f32 %v8321_v32, %v10940_v50  ;;  %v8377_v31 = vpop.f32.mrf.mxu0  ;;  %8623 = vmatprep.mubr.bf16.mxu1 %v6231_v58  ;;  %v11046_v63 = vadd.f32 %v4777_v8, %v4514_v10  ;;  %v6211_v58 = vld [vmem:[#allocation2 + $0xf6] sm:$0xff]  ;;  %v6212_v32 = vld [vmem:[#allocation2 + $0xfe] sm:$0xff] }
 0x374   : > { %v4458_v5 = vpop.f32.mrf.mxu1  ;;  %v6234_v29 = vpack.c.bf16 %v6212_v32, %v6211_v58 }
 0x375   : > { %v4517_v49 = vadd.f32 %v4458_v5, %v10943_v4  ;;  %v4806_v14 = vpop.f32.mrf.mxu0  ;;  %v11049_v53 = vadd.f32 %v8373_v11, %v4519_v42  ;;  %v6214_v5 = vld [vmem:[#allocation2 + $0x10e] sm:$0xff] }
 0x376   : > { %v8322_v12 = vpop.f32.mrf.mxu1 }
 0x377   : > { %v4520_v39 = vadd.f32 %v8322_v12, %v10945_v3  ;;  %v8378_v15 = vpop.f32.mrf.mxu0  ;;  %v11052_v37 = vadd.f32 %v4790_v30, %v4517_v49  ;;  %v6213_v12 = vld [vmem:[#allocation2 + $0x106] sm:$0xff] }
 0x378   : > { %v4461_v50 = vpop.f32.mrf.mxu1 }
 0x379   : > { %v4518_v8 = vadd.f32 %v4461_v50, %v10947_v13  ;;  %v4809_v48 = vpop.f32.mrf.mxu0  ;;  %v11055_v4 = vadd.f32 %v8374_v57, %v4520_v39  ;;  %v6235_v39 = vpack.c.bf16 %v6214_v5, %v6213_v12  ;;  %v6219_v12 = vld [vmem:[#allocation2 + $0x136] sm:$0xff] }
 0x37a   : > { %v8325_v25 = vpop.f32.mrf.mxu1  ;;  %8624 = vmatmul.mubr.bf16.gmra.mxu1 %v6232_v20 }
 0x37b   : > { %v4523_v11 = vadd.f32 %v8325_v25, %v10950_v21  ;;  %v8449_v2 = vpop.f32.mrf.mxu0  ;;  %8627 = vmatprep.mubr.bf16.mxu1 %v6233_v35  ;;  %v11058_v1 = vadd.f32 %v4793_v19, %v4518_v8  ;;  %v6215_v35 = vld [vmem:[#allocation2 + $0x116] sm:$0xff]  ;;  %v6216_v25 = vld [vmem:[#allocation2 + $0x11e] sm:$0xff] }
 0x37c   : > { %v4474_v3 = vpop.f32.mrf.mxu1 }
 0x37d   : > { %v4521_v30 = vadd.f32 %v4474_v3, %v10953_v24  ;;  %v5342_v10 = vpop.f32.mrf.mxu0  ;;  %v11061_v42 = vadd.f32 %v8377_v31, %v4523_v11  ;;  %v6217_v3 = vld [vmem:[#allocation2 + $0x126] sm:$0xff] }
 0x37e   : > { %v8326_v13 = vpop.f32.mrf.mxu1 }
 0x37f   : > { %v4524_v57 = vadd.f32 %v8326_v13, %v10955_v7  ;;  %v8450_v49 = vpop.f32.mrf.mxu0  ;;  %v11064_v55 = vadd.f32 %v4806_v14, %v4521_v30  ;;  %v6236_v13 = vpack.c.bf16 %v6216_v25, %v6215_v35 }
 0x380   : > { %v4477_v21 = vpop.f32.mrf.mxu1 }
 0x381   : > { %v4522_v19 = vadd.f32 %v4477_v21, %v10957_v62  ;;  %v5345_v38 = vpop.f32.mrf.mxu0  ;;  %v11067_v24 = vadd.f32 %v8378_v15, %v4524_v57  ;;  %v6218_v15 = vld [vmem:[#allocation2 + $0x12e] sm:$0xff] }
 0x382   : > { %v8397_v50 = vpop.f32.mrf.mxu1  ;;  %8628 = vmatmul.mubr.bf16.gmra.mxu1 %v6234_v29  ;;  %v6237_v57 = vpack.c.bf16 %v6218_v15, %v6217_v3 }
 0x383   : > { %v5155_v31 = vadd.f32 %v8397_v50, %v10963_v23  ;;  %v8453_v20 = vpop.f32.mrf.mxu0  ;;  %8631 = vmatprep.mubr.bf16.mxu1 %v6235_v39  ;;  %v11070_v47 = vadd.f32 %v4809_v48, %v4522_v19  ;;  %v6220_v19 = vld [vmem:[#allocation2 + $0x13e] sm:$0xff] }
 0x384   : > { %v5010_v7 = vpop.f32.mrf.mxu1 }
 0x385   : > { %v5153_v14 = vadd.f32 %v5010_v7, %v10966_v45  ;;  %v5358_v8 = vpop.f32.mrf.mxu0  ;;  %v11073_v11 = vadd.f32 %v8449_v2, %v5155_v31  ;;  %v6238_v7 = vpack.c.bf16 %v6220_v19, %v6219_v12 }
 0x386   : > { %v8398_v62 = vpop.f32.mrf.mxu1 }
 0x387   : > { %v5156_v30 = vadd.f32 %v8398_v62, %v10969_v46  ;;  %v8454_v58 = vpop.f32.mrf.mxu0  ;;  %v11076_v32 = vadd.f32 %v5342_v10, %v5153_v14 }
 0x388   : > { %v5013_v23 = vpop.f32.mrf.mxu1 }
 0x389   : > { %v5154_v48 = vadd.f32 %v5013_v23, %v10974_v51  ;;  %v5361_v5 = vpop.f32.mrf.mxu0  ;;  %v11079_v45 = vadd.f32 %v8450_v49, %v5156_v30 }
 0x38a   : > { %v8401_v21 = vpop.f32.mrf.mxu1  ;;  %8632 = vmatmul.mubr.bf16.gmra.mxu1 %v6236_v13 }
 0x38b   : > { %v5159_v2 = vadd.f32 %v8401_v21, %v10977_v18  ;;  %v8457_v29 = vpop.f32.mrf.mxu0  ;;  %8635 = vmatprep.mubr.bf16.mxu1 %v6237_v57  ;;  %v11082_v46 = vadd.f32 %v5345_v38, %v5154_v48 }
 0x38c   : > { %v5026_v10 = vpop.f32.mrf.mxu1 }
 0x38d   : > { %v5157_v39 = vadd.f32 %v5026_v10, %v10980_v41  ;;  %v5374_v50 = vpop.f32.mrf.mxu0  ;;  %v11085_v31 = vadd.f32 %v8453_v20, %v5159_v2 }
 0x38e   : > { %v8402_v51 = vpop.f32.mrf.mxu1 }
 0x38f   : > { %v5160_v49 = vadd.f32 %v8402_v51, %v10983_v9  ;;  %v8458_v14 = vpop.f32.mrf.mxu0  ;;  %v11088_v35 = vadd.f32 %v5358_v8, %v5157_v39 }
 0x390   : > { %v5029_v18 = vpop.f32.mrf.mxu1 }
 0x391   : > { %v5158_v25 = vadd.f32 %v5029_v18, %v10986_v17  ;;  %v5377_v62 = vpop.f32.mrf.mxu0  ;;  %v11091_v3 = vadd.f32 %v8454_v58, %v5160_v49 }
 0x392   : > { %v8405_v38 = vpop.f32.mrf.mxu1  ;;  %8636 = vmatmul.mubr.bf16.gmra.mxu1 %v6238_v7 }
 0x393   : > { %v5163_v41 = vadd.f32 %v8405_v38, %v10989_v54  ;;  %v8461_v15 = vpop.f32.mrf.mxu0  ;;  %v11094_v20 = vadd.f32 %v5361_v5, %v5158_v25 }
 0x394   : > { %v5042_v30 = vpop.f32.mrf.mxu1 }
 0x395   : > { %v5161_v23 = vadd.f32 %v5042_v30, %v10992_v60  ;;  %v5390_v9 = vpop.f32.mrf.mxu0  ;;  %v11097_v13 = vadd.f32 %v8457_v29, %v5163_v41 }
 0x396   : > { %v8406_v8 = vpop.f32.mrf.mxu1 }
 0x397   : > { %v5164_v48 = vadd.f32 %v8406_v8, %v10995_v40  ;;  %v8462_v17 = vpop.f32.mrf.mxu0  ;;  %v11100_v57 = vadd.f32 %v5374_v50, %v5161_v23 }
 0x398   : > { %v5045_v58 = vpop.f32.mrf.mxu1 }
 0x399   : > { %v5162_v21 = vadd.f32 %v5045_v58, %v10998_v0  ;;  %v5393_v2 = vpop.f32.mrf.mxu0  ;;  %v11103_v54 = vadd.f32 %v8458_v14, %v5164_v48 }
 0x39a   : > { %v8409_v5 = vpop.f32.mrf.mxu1 }
 0x39b   : > { %v5167_v12 = vadd.f32 %v8409_v5, %v11001_v44  ;;  %v8465_v19 = vpop.f32.mrf.mxu0  ;;  %v11106_v60 = vadd.f32 %v5377_v62, %v5162_v21 }
 0x39c   : > { %v5058_v29 = vpop.f32.mrf.mxu1 }
 0x39d   : > { %v5165_v10 = vadd.f32 %v5058_v29, %v11004_v6  ;;  %v5406_v39 = vpop.f32.mrf.mxu0  ;;  %v11109_v40 = vadd.f32 %v8461_v15, %v5167_v12 }
 0x39e   : > { %v8410_v50 = vpop.f32.mrf.mxu1 }
 0x39f   : > { %v5168_v51 = vadd.f32 %v8410_v50, %v11007_v16  ;;  %v8466_v7 = vpop.f32.mrf.mxu0  ;;  %v11112_v0 = vadd.f32 %v5390_v9, %v5165_v10 }
 0x3a0   : > { %v5061_v49 = vpop.f32.mrf.mxu1 }
 0x3a1   : > { %v5166_v14 = vadd.f32 %v5061_v49, %v11010_v52  ;;  %v5409_v18 = vpop.f32.mrf.mxu0  ;;  %v11115_v44 = vadd.f32 %v8462_v17, %v5168_v51 }
 0x3a2   : > { %v8413_v25 = vpop.f32.mrf.mxu1 }
 0x3a3   : > { %v5171_v62 = vadd.f32 %v8413_v25, %v11013_v22  ;;  %v8469_v38 = vpop.f32.mrf.mxu0  ;;  %v11118_v6 = vadd.f32 %v5393_v2, %v5166_v14 }
 0x3a4   : > { %v5074_v41 = vpop.f32.mrf.mxu1 }
 0x3a5   : > { %v5169_v15 = vadd.f32 %v5074_v41, %v11016_v36  ;;  %v5422_v30 = vpop.f32.mrf.mxu0  ;;  %v11121_v16 = vadd.f32 %v8465_v19, %v5171_v62 }
 0x3a6   : > { %v8414_v23 = vpop.f32.mrf.mxu1 }
 0x3a7   : > { %v5172_v9 = vadd.f32 %v8414_v23, %v11019_v33  ;;  %v8470_v8 = vpop.f32.mrf.mxu0  ;;  %v11124_v52 = vadd.f32 %v5406_v39, %v5169_v15 }
 0x3a8   : > { %v5077_v48 = vpop.f32.mrf.mxu1 }
 0x3a9   : > { %v5170_v17 = vadd.f32 %v5077_v48, %v11022_v28  ;;  %v5425_v58 = vpop.f32.mrf.mxu0  ;;  %v11127_v22 = vadd.f32 %v8466_v7, %v5172_v9 }
 0x3aa   : > { %v8417_v21 = vpop.f32.mrf.mxu1 }
 0x3ab   : > { %v5175_v2 = vadd.f32 %v8417_v21, %v11025_v59  ;;  %v8473_v5 = vpop.f32.mrf.mxu0  ;;  %v11130_v36 = vadd.f32 %v5409_v18, %v5170_v17 }
 0x3ac   : > { %v5090_v12 = vpop.f32.mrf.mxu1 }
 0x3ad   : > { %v5173_v19 = vadd.f32 %v5090_v12, %v11028_v43  ;;  %v5438_v29 = vpop.f32.mrf.mxu0  ;;  %v11133_v33 = vadd.f32 %v8469_v38, %v5175_v2 }
 0x3ae   : > { %v8418_v10 = vpop.f32.mrf.mxu1 }
 0x3af   : > { %v5176_v39 = vadd.f32 %v8418_v10, %v11031_v61  ;;  %v8474_v50 = vpop.f32.mrf.mxu0  ;;  %v11136_v28 = vadd.f32 %v5422_v30, %v5173_v19 }
 0x3b0   : > { %v5093_v51 = vpop.f32.mrf.mxu1 }
 0x3b1   : > { %v5174_v7 = vadd.f32 %v5093_v51, %v11034_v26  ;;  %v5441_v49 = vpop.f32.mrf.mxu0  ;;  %v11139_v59 = vadd.f32 %v8470_v8, %v5176_v39 }
 0x3b2   : > { %v8421_v14 = vpop.f32.mrf.mxu1 }
 0x3b3   : > { %v5179_v18 = vadd.f32 %v8421_v14, %v11037_v34  ;;  %v8477_v25 = vpop.f32.mrf.mxu0  ;;  %v11142_v43 = vadd.f32 %v5425_v58, %v5174_v7 }
 0x3b4   : > { %v5106_v62 = vpop.f32.mrf.mxu1 }
 0x3b5   : > { %v5177_v38 = vadd.f32 %v5106_v62, %v11040_v27  ;;  %v5454_v41 = vpop.f32.mrf.mxu0  ;;  %v11145_v61 = vadd.f32 %v8473_v5, %v5179_v18 }
 0x3b6   : > { %v8422_v15 = vpop.f32.mrf.mxu1 }
 0x3b7   : > { %v5180_v30 = vadd.f32 %v8422_v15, %v11043_v56  ;;  %v8478_v23 = vpop.f32.mrf.mxu0  ;;  %v11148_v26 = vadd.f32 %v5438_v29, %v5177_v38 }
 0x3b8   : > { %v5109_v9 = vpop.f32.mrf.mxu1 }
 0x3b9   : > { %v5178_v8 = vadd.f32 %v5109_v9, %v11046_v63  ;;  %v5457_v48 = vpop.f32.mrf.mxu0  ;;  %v11151_v34 = vadd.f32 %v8474_v50, %v5180_v30 }
 0x3ba   : > { %v8425_v17 = vpop.f32.mrf.mxu1 }
 0x3bb   : > { %v5183_v58 = vadd.f32 %v8425_v17, %v11049_v53  ;;  %v8481_v21 = vpop.f32.mrf.mxu0  ;;  %v11154_v27 = vadd.f32 %v5441_v49, %v5178_v8 }
 0x3bc   : > { %v5122_v2 = vpop.f32.mrf.mxu1 }
 0x3bd   : > { %v5181_v5 = vadd.f32 %v5122_v2, %v11052_v37  ;;  %v5470_v12 = vpop.f32.mrf.mxu0  ;;  %v11157_v56 = vadd.f32 %v8477_v25, %v5183_v58 }
 0x3be   : > { %v8426_v19 = vpop.f32.mrf.mxu1 }
 0x3bf   : > { %v5184_v29 = vadd.f32 %v8426_v19, %v11055_v4  ;;  %v11160_v10 = vadd.f32 %v5454_v41, %v5181_v5  ;;  %v8482_v39 = vpop.f32.mrf.mxu0 }
 0x3c0   : > { %v5125_v63 = vpop.f32.mrf.mxu1 }
 0x3c1   : > { %v5182_v50 = vadd.f32 %v5125_v63, %v11058_v1  ;;  %v11163_v51 = vadd.f32 %v8478_v23, %v5184_v29  ;;  %v5473_v14 = vpop.f32.mrf.mxu0 }
 0x3c2   : > { %v8429_v53 = vpop.f32.mrf.mxu1 }
 0x3c3   : > { %v5187_v7 = vadd.f32 %v8429_v53, %v11061_v42  ;;  %v11166_v49 = vadd.f32 %v5457_v48, %v5182_v50  ;;  %v11174_v1 = vpop.f32.mrf.mxu0 }
 0x3c4   : > { %v5138_v37 = vpop.f32.mrf.mxu1 }
 0x3c5   : > { %v5185_v18 = vadd.f32 %v5138_v37, %v11064_v55  ;;  %v11169_v25 = vadd.f32 %v8481_v21, %v5187_v7  ;;  %v11184_v8 = vpop.f32.mrf.mxu0 }
 0x3c6   : > { %v8430_v4 = vpop.f32.mrf.mxu1 }
 0x3c7   : > { %v5188_v62 = vadd.f32 %v8430_v4, %v11067_v24  ;;  %v11172_v38 = vadd.f32 %v5470_v12, %v5185_v18 }
 0x3c8   : > { %v5141_v41 = vpop.f32.mrf.mxu1 }
 0x3c9   : > { %v5186_v15 = vadd.f32 %v5141_v41, %v11070_v47  ;;  %v11177_v30 = vadd.f32 %v8482_v39, %v5188_v62  ;;  %v11192_v47 = vpop.f32.mrf.mxu0 }
 0x3ca   : > { %v8501_v42 = vpop.f32.mrf.mxu1 }
 0x3cb   : > { %v11180_v23 = vadd.f32 %v8501_v42, %v11073_v11  ;;  %v11182_v9 = vadd.f32 %v5473_v14, %v5186_v15  ;;  %v11200_v12 = vpop.f32.mrf.mxu0 }
 0x3cc   : > { %v5674_v55 = vpop.f32.mrf.mxu1 }
 0x3cd   : > { %v11187_v24 = vadd.f32 %v5674_v55, %v11076_v32  ;;  %v11208_v63 = vpop.f32.mrf.mxu0 }
 0x3ce   : > { %v8502_v48 = vpop.f32.mrf.mxu1 }
 0x3cf   : > { %v11190_v17 = vadd.f32 %v8502_v48, %v11079_v45  ;;  %v11216_v53 = vpop.f32.mrf.mxu0 }
 0x3d0   : > { %v5677_v58 = vpop.f32.mrf.mxu1 }
 0x3d1   : > { %v11195_v21 = vadd.f32 %v5677_v58, %v11082_v46  ;;  %v11224_v14 = vpop.f32.mrf.mxu0 }
 0x3d2   : > { %v8505_v11 = vpop.f32.mrf.mxu1 }
 0x3d3   : > { %v11198_v2 = vadd.f32 %v8505_v11, %v11085_v31  ;;  %v11232_v62 = vpop.f32.mrf.mxu0 }
 0x3d4   : > { %v5690_v5 = vpop.f32.mrf.mxu1 }
 0x3d5   : > { %v11203_v32 = vadd.f32 %v5690_v5, %v11088_v35  ;;  %v11240_v42 = vpop.f32.mrf.mxu0 }
 0x3d6   : > { %v8506_v19 = vpop.f32.mrf.mxu1 }
 0x3d7   : > { %v11206_v45 = vadd.f32 %v8506_v19, %v11091_v3  ;;  %v11248_v58 = vpop.f32.mrf.mxu0 }
 0x3d8   : > { %v5693_v29 = vpop.f32.mrf.mxu1 }
 0x3d9   : > { %v11211_v46 = vadd.f32 %v5693_v29, %v11094_v20  ;;  %v11256_v19 = vpop.f32.mrf.mxu0 }
 0x3da   : > { %v8509_v39 = vpop.f32.mrf.mxu1 }
 0x3db   : > { %v11214_v31 = vadd.f32 %v8509_v39, %v11097_v13 }
 0x3dc   : > { %v5706_v50 = vpop.f32.mrf.mxu1 }
 0x3dd   : > { %v11219_v35 = vadd.f32 %v5706_v50, %v11100_v57  ;;  %v11264_v50 = vpop.f32.mrf.mxu0 }
 0x3de   : > { %v8510_v7 = vpop.f32.mrf.mxu1 }
 0x3df   : > { %v11222_v3 = vadd.f32 %v8510_v7, %v11103_v54 }
 0x3e0   : > { %v5709_v37 = vpop.f32.mrf.mxu1 }
 0x3e1   : > { %v11227_v20 = vadd.f32 %v5709_v37, %v11106_v60 }
 0x3e2   : > { %v8513_v18 = vpop.f32.mrf.mxu1 }
 0x3e3   : > { %v11230_v13 = vadd.f32 %v8513_v18, %v11109_v40  ;;  %v11272_v18 = vpop.f32.mrf.mxu0 }
 0x3e4   : > { %v5722_v4 = vpop.f32.mrf.mxu1 }
 0x3e5   : > { %v11235_v57 = vadd.f32 %v5722_v4, %v11112_v0 }
 0x3e6   : > { %v8514_v41 = vpop.f32.mrf.mxu1 }
 0x3e7   : > { %v11238_v54 = vadd.f32 %v8514_v41, %v11115_v44 }
 0x3e8   : > { %v5725_v15 = vpop.f32.mrf.mxu1 }
 0x3e9   : > { %v11243_v60 = vadd.f32 %v5725_v15, %v11118_v6  ;;  %v11280_v15 = vpop.f32.mrf.mxu0 }
 0x3ea   : > { %v8517_v55 = vpop.f32.mrf.mxu1 }
 0x3eb   : > { %v11246_v40 = vadd.f32 %v8517_v55, %v11121_v16 }
 0x3ec   : > { %v5738_v48 = vpop.f32.mrf.mxu1 }
 0x3ed   : > { %v11251_v0 = vadd.f32 %v5738_v48, %v11124_v52 }
 0x3ee   : > { %v8518_v11 = vpop.f32.mrf.mxu1 }
 0x3ef   : > { %v11254_v44 = vadd.f32 %v8518_v11, %v11127_v22  ;;  %v11288_v11 = vpop.f32.mrf.mxu0 }
 0x3f0   : > { %v5741_v5 = vpop.f32.mrf.mxu1 }
 0x3f1   : > { %v11259_v6 = vadd.f32 %v5741_v5, %v11130_v36 }
 0x3f2   : > { %v8521_v29 = vpop.f32.mrf.mxu1 }
 0x3f3   : > { %v11262_v16 = vadd.f32 %v8521_v29, %v11133_v33 }
 0x3f4   : > { %v5754_v39 = vpop.f32.mrf.mxu1 }
 0x3f5   : > { %v11267_v52 = vadd.f32 %v5754_v39, %v11136_v28  ;;  %v11296_v39 = vpop.f32.mrf.mxu0 }
 0x3f6   : > { %v8522_v7 = vpop.f32.mrf.mxu1 }
 0x3f7   : > { %v11270_v22 = vadd.f32 %v8522_v7, %v11139_v59 }
 0x3f8   : > { %v5757_v37 = vpop.f32.mrf.mxu1 }
 0x3f9   : > { %v11275_v36 = vadd.f32 %v5757_v37, %v11142_v43 }
 0x3fa   : > { %v8525_v4 = vpop.f32.mrf.mxu1 }
 0x3fb   : > { %v11278_v33 = vadd.f32 %v8525_v4, %v11145_v61  ;;  %v11304_v4 = vpop.f32.mrf.mxu0 }
 0x3fc   : > { %v5770_v41 = vpop.f32.mrf.mxu1 }
 0x3fd   : > { %v11283_v28 = vadd.f32 %v5770_v41, %v11148_v26 }
 0x3fe   : > { %v8526_v55 = vpop.f32.mrf.mxu1 }
 0x3ff   : > { %v11286_v59 = vadd.f32 %v8526_v55, %v11151_v34 }
 0x400   : > { %v5773_v48 = vpop.f32.mrf.mxu1 }
 0x401   : > { %v11291_v43 = vadd.f32 %v5773_v48, %v11154_v27  ;;  %v11312_v48 = vpop.f32.mrf.mxu0 }
 0x402   : > { %v8529_v5 = vpop.f32.mrf.mxu1 }
 0x403   : > { %v11294_v61 = vadd.f32 %v8529_v5, %v11157_v56 }
 0x404   : > { %v5786_v29 = vpop.f32.mrf.mxu1 }
 0x405   : > { %v11299_v26 = vadd.f32 %v5786_v29, %v11160_v10 }
 0x406   : > { %v8530_v7 = vpop.f32.mrf.mxu1 }
 0x407   : > { %v11302_v34 = vadd.f32 %v8530_v7, %v11163_v51  ;;  %v11320_v7 = vpop.f32.mrf.mxu0 }
 0x408   : > { %v5789_v37 = vpop.f32.mrf.mxu1 }
 0x409   : > { %11734 = vst [vmem:[#allocation6_spill] sm:$0xff] %v11302_v34  ;;  %v11307_v27 = vadd.f32 %v5789_v37, %v11166_v49 }
 0x40a   : > { %v8533_v41 = vpop.f32.mrf.mxu1 }
 0x40b   : > { %11735 = vst [vmem:[#allocation7_spill] sm:$0xff] %v11307_v27  ;;  %v11310_v56 = vadd.f32 %v8533_v41, %v11169_v25  ;;  %v6151_v25 = vadd.f32 %v11174_v1, %v11180_v23  ;;  %v6149_v41 = vadd.f32 %v11184_v8, %v11187_v24  ;;  %v6606_v27 = vld [vmem:[%s9027_s12 + $0x2b] sm:$0xff] }
 0x40c   : > { %v5802_v55 = vpop.f32.mrf.mxu1 }
 0x40d   : > { %11736 = vst [vmem:[#allocation8_spill] sm:$0xff] %v11310_v56  ;;  %v11315_v10 = vadd.f32 %v5802_v55, %v11172_v38  ;;  %v11330_v38 = vld [vmem:[%s11628_s5] ss:$0 sm:$0xff] }
 0x40e   : > { %v8534_v5 = vpop.f32.mrf.mxu1 }
 0x40f   : > { %11737 = vst [vmem:[#allocation9_spill] sm:$0xff] %v11315_v10  ;;  %v11318_v51 = vadd.f32 %v8534_v5, %v11177_v30  ;;  %v11340_v5 = vpop.f32.mrf.mxu0  ;;  %v6603_v10 = vld [vmem:[%s9027_s12 + $0x13] sm:$0xff] }
 0x410   : > { %v5805_v29 = vpop.f32.mrf.mxu1 }
 0x411   : > { %11738 = vst [vmem:[#allocation27_spill] sm:$0xff] %v11318_v51  ;;  %v11323_v49 = vadd.f32 %v5805_v29, %v11182_v9  ;;  %v11338_v9 = vld [vmem:[%s11629_s6] ss:$0 sm:$0xff]  ;;  %v6152_v29 = vadd.f32 %v11192_v47, %v11190_v17  ;;  %v6150_v51 = vadd.f32 %v11200_v12, %v11195_v21 }
 0x412   : > { %v8605_v37 = vpop.f32.mrf.mxu1 }
 0x413   : > { %11739 = vst [vmem:[#allocation10_spill] sm:$0xff] %v11323_v49  ;;  %v6483_v30 = vadd.f32 %v8605_v37, %v6151_v25  ;;  %v6605_v25 = vld [vmem:[%s9027_s12 + $0x23] sm:$0xff] }
 0x414   : > { %v6338_v55 = vpop.f32.mrf.mxu1 }
 0x415   : > { %v6526_v1 = vmul.f32 %v11330_v38, %v6483_v30  ;;  %v6481_v23 = vadd.f32 %v6338_v55, %v6149_v41  ;;  %v11353_v41 = vpop.f32.mrf.mxu0 }
 0x416   : > { %v8606_v37 = vpop.f32.mrf.mxu1 }
 0x417   : > { %v6569_v8 = vadd.f32 %v11338_v9, %v6526_v1  ;;  %v6524_v24 = vmul.f32 %v11330_v38, %v6481_v23  ;;  %v6484_v49 = vadd.f32 %v8606_v37, %v6152_v29  ;;  %v6155_v1 = vadd.f32 %v11208_v63, %v11198_v2 }
 0x418   : > { %v6341_v30 = vpop.f32.mrf.mxu1  ;;  %v6153_v29 = vadd.f32 %v11216_v53, %v11203_v32 }
 0x419   : > { %v6641_v55 = vadd.f32 %v6605_v25, %v6569_v8  ;;  %v6567_v17 = vadd.f32 %v11338_v9, %v6524_v24  ;;  %v6527_v47 = vmul.f32 %v11330_v38, %v6484_v49  ;;  %v6482_v56 = vadd.f32 %v6341_v30, %v6150_v51  ;;  %v6604_v25 = vld [vmem:[%s9027_s12 + $0x1b] sm:$0xff]  ;;  %v11367_v49 = vpop.f32.mrf.mxu0 }
 0x41a   : > { %v8609_v23 = vpop.f32.mrf.mxu1  ;;  %v6156_v51 = vadd.f32 %v11224_v14, %v11206_v45  ;;  %v6154_v45 = vadd.f32 %v11232_v62, %v11211_v46 }
 0x41b   : > { %v6677_v21 = vmax.f32 %v6641_v55, 0.0  ;;  %v6639_v12 = vadd.f32 %v6603_v10, %v6567_v17  ;;  %v6570_v37 = vadd.f32 %v11338_v9, %v6527_v47  ;;  %v6525_v34 = vmul.f32 %v11330_v38, %v6482_v56  ;;  %v6609_v55 = vld [vmem:[%s9027_s12 + $0x43] sm:$0xff] }
 0x41c   : > { %v6487_v8 = vadd.f32 %v8609_v23, %v6155_v1  ;;  %v6354_v24 = vpop.f32.mrf.mxu1  ;;  %v6159_v23 = vadd.f32 %v11240_v42, %v11214_v31 }
 0x41d   : > { %6713 = vst [vmem:[%s11369_s18 + $0x10] sm:$0xff] %v6677_v21  ;;  %v6675_v2 = vmax.f32 %v6639_v12, 0.0  ;;  %v6642_v32 = vadd.f32 %v6606_v27, %v6570_v37  ;;  %v6568_v63 = vadd.f32 %v11338_v9, %v6525_v34  ;;  %v6485_v53 = vadd.f32 %v6354_v24, %v6153_v29  ;;  %v6607_v34 = vld [vmem:[%s9027_s12 + $0x33] sm:$0xff]  ;;  %v11383_v29 = vpop.f32.mrf.mxu0 }
 0x41e   : > { %v6530_v56 = vmul.f32 %v11330_v38, %v6487_v8  ;;  %v8610_v10 = vpop.f32.mrf.mxu1 }
 0x41f   : > { %6711 = vst [vmem:[%s11369_s18] sm:$0xff] %v6675_v2  ;;  %v6678_v14 = vmax.f32 %v6642_v32, 0.0  ;;  %v6640_v30 = vadd.f32 %v6604_v25, %v6568_v63  ;;  %v6528_v17 = vmul.f32 %v11330_v38, %v6485_v53  ;;  %v6488_v47 = vadd.f32 %v8610_v10, %v6156_v51  ;;  %v6610_v25 = vld [vmem:[%s9027_s12 + $0x4b] sm:$0xff]  ;;  %v6608_v32 = vld [vmem:[%s9027_s12 + $0x3b] sm:$0xff]  ;;  %v11397_v10 = vpop.f32.mrf.mxu0 }
 0x420   : > { %v6573_v27 = vadd.f32 %v11338_v9, %v6530_v56  ;;  %v6357_v1 = vpop.f32.mrf.mxu1  ;;  %v6157_v63 = vadd.f32 %v11248_v58, %v11219_v35  ;;  %v6160_v56 = vadd.f32 %v11256_v19, %v11222_v3  ;;  %v6158_v35 = vadd.f32 %v11264_v50, %v11227_v20  ;;  %v6611_v50 = vld [vmem:[%s9027_s12 + $0x53] sm:$0xff] }
 0x421   : > { %6714 = vst [vmem:[%s11369_s18 + $0x18] sm:$0xff] %v6678_v14  ;;  %v6676_v46 = vmax.f32 %v6640_v30, 0.0  ;;  %v6571_v62 = vadd.f32 %v11338_v9, %v6528_v17  ;;  %v6531_v21 = vmul.f32 %v11330_v38, %v6488_v47  ;;  %v6486_v12 = vadd.f32 %v6357_v1, %v6154_v45  ;;  %v6613_v17 = vld [vmem:[%s9027_s12 + $0x63] sm:$0xff] }
 0x422   : > { %v6645_v37 = vadd.f32 %v6609_v55, %v6573_v27  ;;  %v8613_v8 = vpop.f32.mrf.mxu1 }
 0x423   : > { %6712 = vst [vmem:[%s11369_s18 + $0x8] sm:$0xff] %v6676_v46  ;;  %v6643_v24 = vadd.f32 %v6607_v34, %v6571_v62  ;;  %v6574_v51 = vadd.f32 %v11338_v9, %v6531_v21  ;;  %v6529_v31 = vmul.f32 %v11330_v38, %v6486_v12  ;;  %v6491_v42 = vadd.f32 %v8613_v8, %v6159_v23  ;;  %v11410_v62 = vpop.f32.mrf.mxu0  ;;  %v6614_v8 = vld [vmem:[%s9027_s12 + $0x6b] sm:$0xff] }
 0x424   : > { %v6681_v2 = vmax.f32 %v6645_v37, 0.0  ;;  %v6370_v53 = vpop.f32.mrf.mxu1  ;;  %v6163_v46 = vadd.f32 %v11272_v18, %v11230_v13 }
 0x425   : > { %v6679_v45 = vmax.f32 %v6643_v24, 0.0  ;;  %v6646_v14 = vadd.f32 %v6610_v25, %v6574_v51  ;;  %v6572_v30 = vadd.f32 %v11338_v9, %v6529_v31  ;;  %v6534_v55 = vmul.f32 %v11330_v38, %v6491_v42 }
 0x426   : > { %6717 = vst [vmem:[%s11369_s18 + $0x30] sm:$0xff] %v6681_v2  ;;  %v6489_v47 = vadd.f32 %v6370_v53, %v6157_v63  ;;  %v8614_v27 = vpop.f32.mrf.mxu1  ;;  %v6161_v51 = vadd.f32 %v11280_v15, %v11235_v57  ;;  %v11423_v53 = vpop.f32.mrf.mxu0 }
 0x427   : > { %6715 = vst [vmem:[%s11369_s18 + $0x20] sm:$0xff] %v6679_v45  ;;  %v6682_v3 = vmax.f32 %v6646_v14, 0.0  ;;  %v6644_v58 = vadd.f32 %v6608_v32, %v6572_v30  ;;  %v6577_v19 = vadd.f32 %v11338_v9, %v6534_v55  ;;  %v6492_v34 = vadd.f32 %v8614_v27, %v6160_v56  ;;  %v6612_v32 = vld [vmem:[%s9027_s12 + $0x5b] sm:$0xff]  ;;  %v6617_v30 = vld [vmem:[%s9027_s12 + $0x83] sm:$0xff] }
 0x428   : > { %v6532_v1 = vmul.f32 %v11330_v38, %v6489_v47  ;;  %v6373_v23 = vpop.f32.mrf.mxu1  ;;  %v6164_v55 = vadd.f32 %v11288_v11, %v11238_v54  ;;  %v6162_v47 = vadd.f32 %v11296_v39, %v11243_v60  ;;  %v11439_v54 = vpop.f32.mrf.mxu0 }
 0x429   : > { %6718 = vst [vmem:[%s11369_s18 + $0x38] sm:$0xff] %v6682_v3  ;;  %v6680_v21 = vmax.f32 %v6644_v58, 0.0  ;;  %v6649_v20 = vadd.f32 %v6613_v17, %v6577_v19  ;;  %v6535_v12 = vmul.f32 %v11330_v38, %v6492_v34  ;;  %v6490_v37 = vadd.f32 %v6373_v23, %v6158_v35  ;;  %v6615_v19 = vld [vmem:[%s9027_s12 + $0x73] sm:$0xff] }
 0x42a   : > { %v6575_v25 = vadd.f32 %v11338_v9, %v6532_v1  ;;  %v8617_v24 = vpop.f32.mrf.mxu1  ;;  %v6167_v23 = vadd.f32 %v11304_v4, %v11246_v40  ;;  %v6618_v4 = vld [vmem:[%s9027_s12 + $0x8b] sm:$0xff] }
 0x42b   : > { %6716 = vst [vmem:[%s11369_s18 + $0x28] sm:$0xff] %v6680_v21  ;;  %v6685_v13 = vmax.f32 %v6649_v20, 0.0  ;;  %v6578_v18 = vadd.f32 %v11338_v9, %v6535_v12  ;;  %v6533_v31 = vmul.f32 %v11330_v38, %v6490_v37  ;;  %v6495_v42 = vadd.f32 %v8617_v24, %v6163_v46  ;;  %v6616_v24 = vld [vmem:[%s9027_s12 + $0x7b] sm:$0xff] }
 0x42c   : > { %v6647_v2 = vadd.f32 %v6611_v50, %v6575_v25  ;;  %v6386_v63 = vpop.f32.mrf.mxu1  ;;  %v6165_v50 = vadd.f32 %v11312_v48, %v11251_v0 }
 0x42d   : > { %6721 = vst [vmem:[%s11369_s18 + $0x50] sm:$0xff] %v6685_v13  ;;  %v6650_v56 = vadd.f32 %v6614_v8, %v6578_v18  ;;  %v6576_v45 = vadd.f32 %v11338_v9, %v6533_v31  ;;  %v6538_v57 = vmul.f32 %v11330_v38, %v6495_v42  ;;  %v6493_v15 = vadd.f32 %v6386_v63, %v6161_v51  ;;  %v11453_v18 = vpop.f32.mrf.mxu0 }
 0x42e   : > { %v6683_v14 = vmax.f32 %v6647_v2, 0.0  ;;  %v8618_v17 = vpop.f32.mrf.mxu1  ;;  %v6168_v13 = vadd.f32 %v11320_v7, %v11254_v44 }
 0x42f   : > { %v6686_v27 = vmax.f32 %v6650_v56, 0.0  ;;  %v6648_v35 = vadd.f32 %v6612_v32, %v6576_v45  ;;  %v6581_v3 = vadd.f32 %v11338_v9, %v6538_v57  ;;  %v6536_v58 = vmul.f32 %v11330_v38, %v6493_v15  ;;  %v6621_v32 = vld [vmem:[%s9027_s12 + $0xa3] sm:$0xff]  ;;  %v6619_v15 = vld [vmem:[%s9027_s12 + $0x93] sm:$0xff] }
 0x430   : > { %6719 = vst [vmem:[%s11369_s18 + $0x40] sm:$0xff] %v6683_v14  ;;  %v6496_v34 = vadd.f32 %v8618_v17, %v6164_v55  ;;  %v6389_v1 = vpop.f32.mrf.mxu1  ;;  %v6166_v14 = vadd.f32 %v11340_v5, %v11259_v6  ;;  %v6171_v55 = vadd.f32 %v11353_v41, %v11262_v16  ;;  %v11467_v17 = vpop.f32.mrf.mxu0  ;;  %v6169_v6 = vadd.f32 %v11367_v49, %v11267_v52  ;;  %v6620_v49 = vld [vmem:[%s9027_s12 + $0x9b] sm:$0xff] }
 0x431   : > { %6722 = vst [vmem:[%s11369_s18 + $0x58] sm:$0xff] %v6686_v27  ;;  %v6684_v60 = vmax.f32 %v6648_v35, 0.0  ;;  %v6653_v11 = vadd.f32 %v6617_v30, %v6581_v3  ;;  %v6579_v39 = vadd.f32 %v11338_v9, %v6536_v58  ;;  %v6494_v46 = vadd.f32 %v6389_v1, %v6162_v47  ;;  %v6622_v58 = vld [vmem:[%s9027_s12 + $0xab] sm:$0xff] }
 0x432   : > { %v6539_v21 = vmul.f32 %v11330_v38, %v6496_v34  ;;  %v8621_v20 = vpop.f32.mrf.mxu1 }
 0x433   : > { %6720 = vst [vmem:[%s11369_s18 + $0x48] sm:$0xff] %v6684_v60  ;;  %v6689_v12 = vmax.f32 %v6653_v11, 0.0  ;;  %v6651_v40 = vadd.f32 %v6615_v19, %v6579_v39  ;;  %v6537_v37 = vmul.f32 %v11330_v38, %v6494_v46  ;;  %v6499_v25 = vadd.f32 %v8621_v20, %v6167_v23  ;;  %v11480_v39 = vpop.f32.mrf.mxu0 }
 0x434   : > { %v6582_v8 = vadd.f32 %v11338_v9, %v6539_v21  ;;  %v6402_v51 = vpop.f32.mrf.mxu1  ;;  %v6172_v11 = vadd.f32 %v11383_v29, %v11270_v22 }
 0x435   : > { %6725 = vst [vmem:[%s11369_s18 + $0x70] sm:$0xff] %v6689_v12  ;;  %v6687_v0 = vmax.f32 %v6651_v40, 0.0  ;;  %v6580_v48 = vadd.f32 %v11338_v9, %v6537_v37  ;;  %v6542_v31 = vmul.f32 %v11330_v38, %v6499_v25  ;;  %v6497_v42 = vadd.f32 %v6402_v51, %v6165_v50  ;;  %v6625_v12 = vld [vmem:[%s9027_s12 + $0xc3] sm:$0xff] }
 0x436   : > { %v6654_v2 = vadd.f32 %v6618_v4, %v6582_v8  ;;  %v8622_v63 = vpop.f32.mrf.mxu1  ;;  %v6170_v4 = vadd.f32 %v11397_v10, %v11275_v36 }
 0x437   : > { %6723 = vst [vmem:[%s11369_s18 + $0x60] sm:$0xff] %v6687_v0  ;;  %v6652_v56 = vadd.f32 %v6616_v24, %v6580_v48  ;;  %v6585_v45 = vadd.f32 %v11338_v9, %v6542_v31  ;;  %v6540_v44 = vmul.f32 %v11330_v38, %v6497_v42  ;;  %v6500_v7 = vadd.f32 %v8622_v63, %v6168_v13  ;;  %v6623_v24 = vld [vmem:[%s9027_s12 + $0xb3] sm:$0xff]  ;;  %v8582_v13 = vpop.f32.mrf.mxu0  ;;  %v6626_v42 = vld [vmem:[%s9027_s12 + $0xcb] sm:$0xff] }
 0x438   : > { %v6690_v57 = vmax.f32 %v6654_v2, 0.0  ;;  %v6405_v30 = vpop.f32.mrf.mxu1  ;;  %v6175_v2 = vadd.f32 %v11410_v62, %v11278_v33  ;;  %v6173_v63 = vadd.f32 %v11423_v53, %v11283_v28 }
 0x439   : > { %v6688_v47 = vmax.f32 %v6652_v56, 0.0  ;;  %v6657_v27 = vadd.f32 %v6621_v32, %v6585_v45  ;;  %v6583_v35 = vadd.f32 %v11338_v9, %v6540_v44  ;;  %v6543_v3 = vmul.f32 %v11330_v38, %v6500_v7  ;;  %v6121_v33 = vpop.f32.mrf.mxu0 }
 0x43a   : > { %6726 = vst [vmem:[%s11369_s18 + $0x78] sm:$0xff] %v6690_v57  ;;  %v6498_v19 = vadd.f32 %v6405_v30, %v6166_v14  ;;  %v8625_v34 = vpop.f32.mrf.mxu1  ;;  %v6624_v57 = vld [vmem:[%s9027_s12 + $0xbb] sm:$0xff]  ;;  %v6176_v30 = vadd.f32 %v11439_v54, %v11286_v59  ;;  %v6629_v54 = vld [vmem:[%s9027_s12 + $0xe3] sm:$0xff] }
 0x43b   : > { %6724 = vst [vmem:[%s11369_s18 + $0x68] sm:$0xff] %v6688_v47  ;;  %v6693_v16 = vmax.f32 %v6657_v27, 0.0  ;;  %v6655_v5 = vadd.f32 %v6619_v15, %v6583_v35  ;;  %v6586_v41 = vadd.f32 %v11338_v9, %v6543_v3  ;;  %v6503_v1 = vadd.f32 %v8625_v34, %v6171_v55  ;;  %v8585_v3 = vpop.f32.mrf.mxu0 }
 0x43c   : > { %v6541_v23 = vmul.f32 %v11330_v38, %v6498_v19  ;;  %v6418_v60 = vpop.f32.mrf.mxu1  ;;  %v6174_v35 = vadd.f32 %v11453_v18, %v11291_v43 }
 0x43d   : > { %6729 = vst [vmem:[%s11369_s18 + $0x90] sm:$0xff] %v6693_v16  ;;  %v6691_v46 = vmax.f32 %v6655_v5, 0.0  ;;  %v6658_v52 = vadd.f32 %v6622_v58, %v6586_v41  ;;  %v6546_v21 = vmul.f32 %v11330_v38, %v6503_v1  ;;  %v6501_v20 = vadd.f32 %v6418_v60, %v6169_v6  ;;  %v6627_v16 = vld [vmem:[%s9027_s12 + $0xd3] sm:$0xff] }
 0x43e   : > { %v6584_v50 = vadd.f32 %v11338_v9, %v6541_v23  ;;  %v8626_v40 = vpop.f32.mrf.mxu1  ;;  %v6179_v41 = vadd.f32 %v11467_v17, %v11294_v61 }
 0x43f   : > { %6727 = vst [vmem:[%s11369_s18 + $0x80] sm:$0xff] %v6691_v46  ;;  %v6694_v22 = vmax.f32 %v6658_v52, 0.0  ;;  %v6589_v29 = vadd.f32 %v11338_v9, %v6546_v21  ;;  %v6544_v37 = vmul.f32 %v11330_v38, %v6501_v20  ;;  %v6504_v25 = vadd.f32 %v8626_v40, %v6172_v11  ;;  %v6630_v11 = vld [vmem:[%s9027_s12 + $0xeb] sm:$0xff]  ;;  %v6134_v52 = vpop.f32.mrf.mxu0 }
 0x440   : > { %v6656_v8 = vadd.f32 %v6620_v49, %v6584_v50  ;;  %v6421_v51 = vpop.f32.mrf.mxu1  ;;  %v6628_v50 = vld [vmem:[%s9027_s12 + $0xdb] sm:$0xff] }
 0x441   : > { %6730 = vst [vmem:[%s11369_s18 + $0x98] sm:$0xff] %v6694_v22  ;;  %v6661_v0 = vadd.f32 %v6625_v12, %v6589_v29  ;;  %v6587_v48 = vadd.f32 %v11338_v9, %v6544_v37  ;;  %v6547_v36 = vmul.f32 %v11330_v38, %v6504_v25  ;;  %v6502_v10 = vadd.f32 %v6421_v51, %v6170_v4  ;;  %v11740_v4 = vld [vmem:[#allocation6_spill] sm:$0xff] }
 0x442   : > { %v6692_v31 = vmax.f32 %v6656_v8, 0.0  ;;  %v8629_v32 = vpop.f32.mrf.mxu1  ;;  %v6177_v12 = vadd.f32 %v11480_v39, %v11299_v26  ;;  %v6180_v22 = vadd.f32 %v8582_v13, %v11740_v4 }
 0x443   : > { %v6697_v56 = vmax.f32 %v6661_v0, 0.0  ;;  %v6659_v45 = vadd.f32 %v6623_v24, %v6587_v48  ;;  %v6590_v44 = vadd.f32 %v11338_v9, %v6547_v36  ;;  %v6545_v7 = vmul.f32 %v11330_v38, %v6502_v10  ;;  %v6633_v24 = vld [vmem:[%s9027_s12 + $0x103] sm:$0xff]  ;;  %v8586_v10 = vpop.f32.mrf.mxu0 }
 0x444   : > { %6728 = vst [vmem:[%s11369_s18 + $0x88] sm:$0xff] %v6692_v31  ;;  %v6507_v15 = vadd.f32 %v8629_v32, %v6175_v2  ;;  %v6434_v14 = vpop.f32.mrf.mxu1  ;;  %v11741_v48 = vld [vmem:[#allocation7_spill] sm:$0xff] }
 0x445   : > { %6733 = vst [vmem:[%s11369_s18 + $0xb0] sm:$0xff] %v6697_v56  ;;  %v6695_v62 = vmax.f32 %v6659_v45, 0.0  ;;  %v6662_v28 = vadd.f32 %v6626_v42, %v6590_v44  ;;  %v6588_v53 = vadd.f32 %v11338_v9, %v6545_v7  ;;  %v6505_v55 = vadd.f32 %v6434_v14, %v6173_v63  ;;  %v11742_v42 = vld [vmem:[#allocation8_spill] sm:$0xff]  ;;  %v6631_v44 = vld [vmem:[%s9027_s12 + $0xf3] sm:$0xff] }
 0x446   : > { %v6550_v47 = vmul.f32 %v11330_v38, %v6507_v15  ;;  %v8630_v27 = vpop.f32.mrf.mxu1  ;;  %v6178_v36 = vadd.f32 %v6121_v33, %v11741_v48  ;;  %v6183_v2 = vadd.f32 %v8585_v3, %v11742_v42  ;;  %v11743_v15 = vld [vmem:[#allocation9_spill] sm:$0xff]  ;;  %v6632_v3 = vld [vmem:[%s9027_s12 + $0xfb] sm:$0xff] }
 0x447   : > { %6731 = vst [vmem:[%s11369_s18 + $0xa0] sm:$0xff] %v6695_v62  ;;  %v6698_v58 = vmax.f32 %v6662_v28, 0.0  ;;  %v6660_v59 = vadd.f32 %v6624_v57, %v6588_v53  ;;  %v6548_v19 = vmul.f32 %v11330_v38, %v6505_v55  ;;  %v6508_v34 = vadd.f32 %v8630_v27, %v6176_v30  ;;  %v6634_v33 = vld [vmem:[%s9027_s12 + $0x10b] sm:$0xff]  ;;  %v6137_v28 = vpop.f32.mrf.mxu0 }
 0x448   : > { %v6593_v6 = vadd.f32 %v11338_v9, %v6550_v47  ;;  %v6437_v5 = vpop.f32.mrf.mxu1  ;;  %v6181_v14 = vadd.f32 %v6134_v52, %v11743_v15  ;;  %v6635_v52 = vld [vmem:[%s9027_s12 + $0x113] sm:$0xff] }
 0x449   : > { %6734 = vst [vmem:[%s11369_s18 + $0xb8] sm:$0xff] %v6698_v58  ;;  %v6696_v43 = vmax.f32 %v6660_v59, 0.0  ;;  %v6591_v18 = vadd.f32 %v11338_v9, %v6548_v19  ;;  %v6551_v1 = vmul.f32 %v11330_v38, %v6508_v34  ;;  %v6506_v23 = vadd.f32 %v6437_v5, %v6174_v35  ;;  %v11745_v5 = vld [vmem:[#allocation10_spill] sm:$0xff] }
 0x44a   : > { %v6665_v60 = vadd.f32 %v6629_v54, %v6593_v6  ;;  %v8633_v46 = vpop.f32.mrf.mxu1  ;;  %v11744_v6 = vld [vmem:[#allocation27_spill] sm:$0xff] }
 0x44b   : > { %6732 = vst [vmem:[%s11369_s18 + $0xa8] sm:$0xff] %v6696_v43  ;;  %v6663_v49 = vadd.f32 %v6627_v16, %v6591_v18  ;;  %v6594_v21 = vadd.f32 %v11338_v9, %v6551_v1  ;;  %v6549_v61 = vmul.f32 %v11330_v38, %v6506_v23  ;;  %v6511_v17 = vadd.f32 %v8633_v46, %v6179_v41  ;;  %v6637_v18 = vld [vmem:[%s9027_s12 + $0x123] sm:$0xff] }
 0x44c   : > { %v6701_v20 = vmax.f32 %v6665_v60, 0.0  ;;  %v6450_v40 = vpop.f32.mrf.mxu1  ;;  %v6184_v16 = vadd.f32 %v8586_v10, %v11744_v6  ;;  %v6182_v41 = vadd.f32 %v6137_v28, %v11745_v5 }
 0x44d   : > { %v6699_v29 = vmax.f32 %v6663_v49, 0.0  ;;  %v6666_v37 = vadd.f32 %v6630_v11, %v6594_v21  ;;  %v6592_v25 = vadd.f32 %v11338_v9, %v6549_v61  ;;  %v6554_v8 = vmul.f32 %v11330_v38, %v6511_v17 }
 0x44e   : > { %6737 = vst [vmem:[%s11369_s18 + $0xd0] sm:$0xff] %v6701_v20  ;;  %v6509_v51 = vadd.f32 %v6450_v40, %v6177_v12  ;;  %v8634_v0 = vpop.f32.mrf.mxu1 }
 0x44f   : > { %6735 = vst [vmem:[%s11369_s18 + $0xc0] sm:$0xff] %v6699_v29  ;;  %v6702_v26 = vmax.f32 %v6666_v37, 0.0  ;;  %v6664_v39 = vadd.f32 %v6628_v50, %v6592_v25  ;;  %v6597_v13 = vadd.f32 %v11338_v9, %v6554_v8  ;;  %v6512_v31 = vadd.f32 %v8634_v0, %v6180_v22  ;;  %v6638_v22 = vld [vmem:[%s9027_s12 + $0x12b] sm:$0xff]  ;;  %v6636_v25 = vld [vmem:[%s9027_s12 + $0x11b] sm:$0xff]  ;;  %s8831_s12 = scalar_lea.vmem %s11577_s20, 4608 }
 0x450   : > { %v6552_v32 = vmul.f32 %v11330_v38, %v6509_v51  ;;  %v6453_v63 = vpop.f32.mrf.mxu1  ;;  %p8832_p11 = scmp.ne.s32.totalorder %s11577_s20, %s8831_s12  ;;  %p8839_p1 = scmp.lt.s32.totalorder %s8837_s10, %s8831_s12 }
 0x451   : > { %6738 = vst [vmem:[%s11369_s18 + $0xd8] sm:$0xff] %v6702_v26  ;;  %v6700_v56 = vmax.f32 %v6664_v39, 0.0  ;;  %v6669_v45 = vadd.f32 %v6633_v24, %v6597_v13  ;;  %v6555_v7 = vmul.f32 %v11330_v38, %v6512_v31  ;;  %v6510_v57 = vadd.f32 %v6453_v63, %v6178_v36 }
 0x452   : > { %v6595_v30 = vadd.f32 %v11338_v9, %v6552_v32  ;;  %v8637_v62 = vpop.f32.mrf.mxu1  ;;  %p8833_p12 = pnand %p8832_p11, %p8982_p5  ;;  %p8840_p2 = por %p8839_p1, %p8838_p0 }
 0x453   : > { %6736 = vst [vmem:[%s11369_s18 + $0xc8] sm:$0xff] %v6700_v56  ;;  %v6705_v53 = vmax.f32 %v6669_v45, 0.0  ;;  %v6598_v55 = vadd.f32 %v11338_v9, %v6555_v7  ;;  %v6553_v47 = vmul.f32 %v11330_v38, %v6510_v57  ;;  %v6515_v27 = vadd.f32 %v8637_v62, %v6183_v2 }
 0x454   : > { %v6667_v35 = vadd.f32 %v6631_v44, %v6595_v30  ;;  %v6466_v58 = vpop.f32.mrf.mxu1  ;;  %p8834_p13 = pneg %p8833_p12 }
 0x455   : > { %6741 = vst [vmem:[%s11369_s18 + $0xf0] sm:$0xff] %v6705_v53  ;;  %v6670_v59 = vadd.f32 %v6634_v33, %v6598_v55  ;;  %v6596_v54 = vadd.f32 %v11338_v9, %v6553_v47  ;;  %v6558_v19 = vmul.f32 %v11330_v38, %v6515_v27  ;;  %v6513_v34 = vadd.f32 %v6466_v58, %v6181_v14 }
 0x456   : > { %v6703_v43 = vmax.f32 %v6667_v35, 0.0  ;;  %v8638_v1 = vpop.f32.mrf.mxu1  ;;  %p8841_p3 = pnand %p8840_p2, %p8834_p13 }
 0x457   : > { %v6706_v23 = vmax.f32 %v6670_v59, 0.0  ;;  %v6668_v60 = vadd.f32 %v6632_v3, %v6596_v54  ;;  %v6601_v11 = vadd.f32 %v11338_v9, %v6558_v19  ;;  %v6556_v46 = vmul.f32 %v11330_v38, %v6513_v34 }
 0x458   : > { %6739 = vst [vmem:[%s11369_s18 + $0xe0] sm:$0xff] %v6703_v43  ;;  %v6516_v49 = vadd.f32 %v8638_v1, %v6184_v16  ;;  %v6469_v21 = vpop.f32.mrf.mxu1 }
 0x459   : > { %6742 = vst [vmem:[%s11369_s18 + $0xf8] sm:$0xff] %v6706_v23  ;;  %v6704_v61 = vmax.f32 %v6668_v60, 0.0  ;;  %v6673_v17 = vadd.f32 %v6637_v18, %v6601_v11  ;;  %v6599_v20 = vadd.f32 %v11338_v9, %v6556_v46  ;;  %v6514_v50 = vadd.f32 %v6469_v21, %v6182_v41 }
 0x45a   : > { %v6559_v12 = vmul.f32 %v11330_v38, %v6516_v49 }
 0x45b   : > { %6740 = vst [vmem:[%s11369_s18 + $0xe8] sm:$0xff] %v6704_v61  ;;  %v6709_v40 = vmax.f32 %v6673_v17, 0.0  ;;  %v6671_v4 = vadd.f32 %v6635_v52, %v6599_v20  ;;  %v6557_v29 = vmul.f32 %v11330_v38, %v6514_v50 }
 0x45c   : > { %v6602_v37 = vadd.f32 %v11338_v9, %v6559_v12 }
 0x45d   : > { %6745 = vst [vmem:[%s11369_s18 + $0x110] sm:$0xff] %v6709_v40  ;;  %v6707_v8 = vmax.f32 %v6671_v4, 0.0  ;;  %v6600_v24 = vadd.f32 %v11338_v9, %v6557_v29 }
 0x45e   : > { %v6674_v51 = vadd.f32 %v6638_v22, %v6602_v37 }
 0x45f   : > { %6743 = vst [vmem:[%s11369_s18 + $0x100] sm:$0xff] %v6707_v8  ;;  %v6672_v0 = vadd.f32 %v6636_v25, %v6600_v24 }
 0x460   : > { %v6710_v48 = vmax.f32 %v6674_v51, 0.0 }
 0x461   : > { %v6708_v38 = vmax.f32 %v6672_v0, 0.0 }
 0x462   : > { %6746 = vst [vmem:[%s11369_s18 + $0x118] sm:$0xff] %v6710_v48 }
 0x463   : > { %6744 = vst [vmem:[%s11369_s18 + $0x108] sm:$0xff] %v6708_v38 }
 0x464   : > { %8844 = shalt.err (!%p8841_p3)
}
 0x465   : > { %s8845_s26 = scalar_lea.hbm %s11575_s23, 4608  ;;  %s8849_s18 = scalar_lea.hbm %s11631_s8, 9216 }
 0x466   : > { %p8846_p4 = scmp.ne.s32.totalorder %s11575_s23, %s8845_s26  ;;  %p8850_p9 = scmp.lt.s32.totalorder %s11575_s23, %s11631_s8 }
 0x467   : > { %p8851_p10 = scmp.lt.s32.totalorder %s8849_s18, %s8845_s26 }
 0x468   : > { %p8847_p7 = pnand %p8846_p4, %p8982_p5 }
 0x469   : > { %p8852_p11 = por %p8851_p10, %p8850_p9 }
 0x46a   : > { %p8848_p8 = pneg %p8847_p7 }
 0x46c   : > { %p8853_p12 = pnand %p8852_p11, %p8848_p8 }
 0x46e   : > { %8856 = shalt.err (!%p8853_p12)
}
 0x46f   : > { %s8897_s22 = smov 128   ;;  %s8898_s12 = smov 8  }
 0x470   : > { %8642 = dma.vmem_to_hbm [thread:$0]  (%p8982_p5), %s11577_s20, 4608, %s11575_s23, %s11583_s9, %s8897_s22, %s8897_s22, %s8898_s12  }
 0x471 PF: > { %p8648_p13 = scmp.ge.s32.totalorder %s8891_s30, 2  ;;  %s6776_s24 = sand.u32 1, %s8879_s27  }
 0x472   : > { %s6777_s25 = scalar_lea.sflag [#allocation4], %s6776_s24 }
 0x473   : > { %p8645_p0 = pnand %p8648_p13, %p8986_p6 }
 0x475   : > { %p8646_p1 = pneg %p8645_p0 }
 0x477   : > { %8874 = dma.done.wait (%p8646_p1), %s6777_s25, 4608  }
 0x478   : > { %8876 = vsyncadd (%p8646_p1), %s6777_s25, 4294962688  ;;  %p18_p2 = scmp.ge.s32.totalorder %s8969_s11, 4   ;;  %s11746_s27 = smov %s8883_s28 }
 0x479   : > { %s11747_s28 = smov %s8887_s29  ;;  %s11748_s29 = smov %s8980_s14 }
 0x47a   : > { %s11749_s30 = smov %s8969_s11  ;;  %20 = sbr.rel (!%p18_p2) target bundleno = 3 (0x3), region = 103 }
 0x47f   :  { %6782 = vsyncpa [#allocation4], 1 }
 0x480   :  { %6784 = vsyncpa [#allocation4 + $0x1], 1 }

</bundles_post_ra>
